<compile_context>
chip_gen: v6e
topology: v6e:2x2x1
jax: 0.10.0
libtpu: 0.0.40
codegen_flags: <defaults>
</compile_context>

<pallas_src>
import jax
import jax.numpy as jnp
from jax.experimental import pallas as pl
from jax.experimental.pallas import tpu as pltpu

EPS = 1e-4  # self.epsilon in WindModelE2E

_VMEM = pl.BlockSpec(memory_space=pltpu.MemorySpace.VMEM)
_SMEM = pl.BlockSpec(memory_space=pltpu.MemorySpace.SMEM)


# ---------------------------------------------------------------------------
# Stage 1: fused pixel stage (flow stand-in + f1221 + GAP of both branches).
# ---------------------------------------------------------------------------
def _pick_row_tile(R, max_rows=1024):
    """Largest multiple-of-8 divisor of R that keeps tiles ~<= 1.5 MB."""
    if R <= max_rows:
        return R
    d = max_rows - (max_rows % 8)
    while d >= 8:
        if R % d == 0:
            return d
        d -= 8
    return R  # no aligned divisor -> full frame per tile


def _pixel_kernel(x_ref, f_ref, gap_ref, prev_ref, acc_ref):
    t = pl.program_id(1)
    p = pl.program_id(2)
    n_p = pl.num_programs(2)

    C, RT, _ = x_ref.shape           # (3, row_tile, 128)
    R = prev_ref.shape[1]            # rows per channel of a full frame
    inv_p = 1.0 / float(R * 128)     # 1 / (H*W)

    row0 = pl.multiple_of(p * RT, RT)
    cur = x_ref[...].astype(jnp.float32)             # (C, RT, 128) dense tile

    # Zero the resident GAP block once per batch sequence.
    @pl.when(jnp.logical_and(t == 0, p == 0))
    def _():
        gap_ref[...] = jnp.zeros_like(gap_ref)

    # Reset the per-frame lane-partial GAP accumulator at the first P-tile.
    @pl.when(p == 0)
    def _():
        acc_ref[...] = jnp.zeros_like(acc_ref)

    # RGB GAP lane-partials (sublane reduce only; cross-lane reduce deferred
    # to once per frame).  Rows 3..5 of the accumulator.
    for c in range(3):
        acc_ref[3 + c:4 + c, :] = (acc_ref[3 + c:4 + c, :]
                                   + jnp.sum(cur[c], axis=0, keepdims=True))

    # Frame-pair slot 0 has no previous frame: write a defined zero tile (it
    # is deterministically overwritten with the real pair-0 data at t==1).
    @pl.when(t == 0)
    def _():
        f_ref[...] = jnp.zeros_like(f_ref)

    # Flow stand-in + flow-image GAP: only when a previous frame exists.
    @pl.when(t > 0)
    def _():
        prev = prev_ref[:, pl.ds(row0, RT), :]        # (C, RT, 128)
        u = cur[0] - prev[0]                          # (RT, 128)
        v = cur[1] - prev[1]
        # fw/bw flow stack: four separate dense per-channel stores (bf16).
        f_ref[0] = u.astype(f_ref.dtype)
        f_ref[1] = v.astype(f_ref.dtype)
        f_ref[2] = (-u).astype(f_ref.dtype)
        f_ref[3] = (-v).astype(f_ref.dtype)
        # Flow "image" channels (mag, sig(u), sig(v)) reduced directly; the
        # (3, P) flow image is never materialized.
        mag = jnp.sqrt(u * u + v * v + 1e-8)
        acc_ref[0:1, :] = acc_ref[0:1, :] + jnp.sum(mag, axis=0, keepdims=True)
        acc_ref[1:2, :] = (acc_ref[1:2, :]
                           + jnp.sum(jax.nn.sigmoid(u), axis=0, keepdims=True))
        acc_ref[2:3, :] = (acc_ref[2:3, :]
                           + jnp.sum(jax.nn.sigmoid(v), axis=0, keepdims=True))

    # Carry the current tile for frame t+1 (single full-frame scratch).
    prev_ref[:, pl.ds(row0, RT), :] = cur

    # Finalize column t of the resident GAP block on the last P-tile.
    @pl.when(p == n_p - 1)
    def _():
        col = jnp.sum(acc_ref[...], axis=1, keepdims=True) * inv_p   # (8, 1)
        lane = jax.lax.broadcasted_iota(jnp.int32, gap_ref.shape, 1)
        gap_ref[...] = jnp.where(lane == t, col, gap_ref[...])


def pixel_stage(x, *, flow_dtype=jnp.bfloat16, row_tile=None):
    """x: (B, L, C, R, 128) -> f1221 (B, L-1, 4, R, 128), gaps (B, 8, L)."""
    B, L, C, R, lanes = x.shape
    assert lanes == 128 and C == 3
    RT = row_tile or _pick_row_tile(R)
    assert R % RT == 0
    NP = R // RT
    P = R * 128

    in_b = x.dtype.itemsize
    fl_b = jnp.dtype(flow_dtype).itemsize
    # Double-buffered in/out tiles + full-frame carry + GAP accumulator.
    need = (2 * C * RT * 128 * in_b + 2 * 4 * RT * 128 * fl_b
            + 2 * 8 * 128 * 4 + C * R * 128 * 4 + 8 * 128 * 4)
    vmem_limit = int(min(60 << 20, max(2 * need + (4 << 20), 32 << 20)))

    cost = pl.CostEstimate(
        flops=int(12 * B * L * P),
        transcendentals=int(3 * B * (L - 1) * P),
        bytes_accessed=int(B * L * C * P * in_b
                           + B * (L - 1) * 4 * P * fl_b + B * 8 * L * 4))

    return pl.pallas_call(
        _pixel_kernel,
        out_shape=(jax.ShapeDtypeStruct((B, L - 1, 4, R, 128), flow_dtype),
                   jax.ShapeDtypeStruct((B, 8, L), jnp.float32)),
        grid_spec=pltpu.PrefetchScalarGridSpec(
            num_scalar_prefetch=0,
            grid=(B, L, NP),
            in_specs=[pl.BlockSpec((None, None, C, RT, 128),
                                   lambda b, t, p: (b, t, 0, p, 0))],
            out_specs=(
                # Pair (t-1, t) is produced at step t; the zero tile written
                # at t==0 is overwritten by the real pair-0 data at t==1
                # (per-b grid order is preserved under megacore splitting).
                pl.BlockSpec((None, None, 4, RT, 128),
                             lambda b, t, p: (b, jnp.maximum(t - 1, 0), 0, p, 0)),
                # Resident, lane-dense GAP block: one writeback per batch.
                pl.BlockSpec((None, 8, L), lambda b, t, p: (b, 0, 0)),
            ),
            scratch_shapes=[pltpu.VMEM((C, R, 128), jnp.float32),   # prev frame
                            pltpu.VMEM((8, 128), jnp.float32)],     # GAP partials
        ),
        compiler_params=pltpu.CompilerParams(
            dimension_semantics=("parallel", "arbitrary", "arbitrary"),
            vmem_limit_bytes=vmem_limit),
        cost_estimate=cost,
    )(x)


# ---------------------------------------------------------------------------
# Stage 2: features + hoisted LSTM input projection + fused two-branch
# recurrence + heads + weighted fusion, in one launch.
# ---------------------------------------------------------------------------
def _fuse_gate_cols(wf, wr, hid):
    """Block-diag per-gate fusion: (in_f,4H) & (in_r,4H) -> (in_f+in_r, 8H)
    with column order [i_f i_r f_f f_r g_f g_r o_f o_r]."""
    in_f, in_r = wf.shape[0], wr.shape[0]
    zf = jnp.zeros((in_f, hid), wf.dtype)
    zr = jnp.zeros((in_r, hid), wr.dtype)
    cols = []
    for k in range(4):
        cf = wf[:, k * hid:(k + 1) * hid]
        cr = wr[:, k * hid:(k + 1) * hid]
        cols.append(jnp.concatenate(
            [jnp.concatenate([cf, zf], axis=1),
             jnp.concatenate([zr, cr], axis=1)], axis=0))
    return jnp.concatenate(cols, axis=1)


def _fuse_gate_bias(bf, br, hid):
    return jnp.concatenate(
        [jnp.concatenate([bf[:, k * hid:(k + 1) * hid],
                          br[:, k * hid:(k + 1) * hid]], axis=1)
         for k in range(4)], axis=1)


def _make_head_kernel(B, L, hid, nl):
    H2 = 2 * hid   # fused state width  [h_flow | h_rgb]

    def kernel(*refs):
        (gaps_ref,
         wc_f, bc_f, wp_f, bp_f,
         wc_r, bc_r, wp_r, bp_r) = refs[0:9]
        wih = refs[9:9 + nl]                     # fused (block-diag) W_ih per layer
        bih = refs[9 + nl:9 + 2 * nl]            # fused biases per layer
        whh = refs[9 + 2 * nl:9 + 3 * nl]        # fused W_hh per layer
        base = 9 + 3 * nl
        (w1_f, b1_f, w2_f, b2_f,
         w1_r, b1_r, w2_r, b2_r,
         fw_ref, wfc_ref, bfc_ref) = refs[base:base + 11]
        out_ref = refs[base + 11]
        xg_ref = refs[base + 12]                 # (L, B, 8H) hoisted-gate scratch

        g = gaps_ref[...]                        # (L*B, 8) time-major rows
        gflow = g[:, 0:3]
        grgb = g[:, 3:6]

        def cnn_fcpre(gp, wc, bc, wp, bp):
            # ResNet18 stand-in: GAP (done in pixel stage) + Linear(3,512)+ReLU.
            # K=3 contraction as VPU FMAs instead of a degenerate MXU dot.
            f512 = (bc[...]
                    + gp[:, 0:1] * wc[0:1, :]
                    + gp[:, 1:2] * wc[1:2, :]
                    + gp[:, 2:3] * wc[2:3, :])
            f512 = jnp.maximum(f512, 0.0)
            # fc_pre Linear(512,256); Dropout = identity (eval mode).
            return jnp.dot(f512, wp[...],
                           preferred_element_type=jnp.float32) + bp[...]

        f256_f = cnn_fcpre(gflow, wc_f, bc_f, wp_f, bp_f)   # (L*B, 256)
        f256_r = cnn_fcpre(grgb, wc_r, bc_r, wp_r, bp_r)
        feat = jnp.concatenate([f256_f, f256_r], axis=1)    # (L*B, 512)
        # Hoisted layer-0 input projection for ALL timesteps, both branches,
        # as ONE matmul into the fused gate layout.
        xg = (jnp.dot(feat, wih[0][...], preferred_element_type=jnp.float32)
              + bih[0][...])                                # (L*B, 8H)
        for t in range(L):                                  # static, aligned fill
            xg_ref[t] = xg[t * B:(t + 1) * B, :]

        # Hoist loop-invariant weight loads out of the serial recurrence.
        whh_v = [w[...] for w in whh]
        wih_v = [None] + [w[...] for w in wih[1:]]
        bih_v = [None] + [b[...] for b in bih[1:]]

        # Mask that zeroes the flow half (lanes < hid) of the fused state.
        rgb_keep = (jax.lax.broadcasted_iota(jnp.int32, (1, H2), 1)
                    >= hid).astype(jnp.float32)

        def cell(gates, c):
            # Fused gate layout [i_f i_r | f_f f_r | g_f g_r | o_f o_r].
            i = jax.nn.sigmoid(gates[:, 0 * H2:1 * H2])
            f = jax.nn.sigmoid(gates[:, 1 * H2:2 * H2])
            gg = jnp.tanh(gates[:, 2 * H2:3 * H2])
            o = jax.nn.sigmoid(gates[:, 3 * H2:4 * H2])
            c_new = f * c + i * gg
            return o * jnp.tanh(c_new), c_new

        def loop_body(t, carry):
            hs, cs = carry                      # tuples of fused (B, 2H) states
            x0 = xg_ref[t]                      # (B, 8H) precomputed gates
            new_h, new_c = [], []
            layer_in = None
            for l in range(nl):
                if l == 0:
                    gates = x0 + jnp.dot(hs[0], whh_v[0],
                                         preferred_element_type=jnp.float32)
                else:
                    gates = (jnp.dot(layer_in, wih_v[l],
                                     preferred_element_type=jnp.float32)
                             + bih_v[l]
                             + jnp.dot(hs[l], whh_v[l],
                                       preferred_element_type=jnp.float32))
                h_l, c_l = cell(gates, cs[l])
                # Flow branch has only L-1 real timesteps (frame pairs); slot 0
                # is padding -> reset the flow half of the fused state, which is
                # identical to running the flow LSTM from zero init over the
                # L-1 pair features.
                h_l = jnp.where(t > 0, h_l, h_l * rgb_keep)
                c_l = jnp.where(t > 0, c_l, c_l * rgb_keep)
                new_h.append(h_l)
                new_c.append(c_l)
                layer_in = h_l
            return tuple(new_h), tuple(new_c)

        zeros = tuple(jnp.zeros((B, H2), jnp.float32) for _ in range(nl))
        hs, _ = jax.lax.fori_loop(0, L, loop_body, (zeros, zeros),
                                  unroll=min(4, L))

        h_last = hs[nl - 1]                     # (B, 2H) fused
        hf = h_last[:, 0:hid]
        hr = h_last[:, hid:H2]

        def head(h, w1, b1, w2, b2):
            z = jax.nn.sigmoid(jnp.dot(h, w1[...],
                                       preferred_element_type=jnp.float32)
                               + b1[...])       # sigmoid; dropout = identity
            return jnp.dot(z, w2[...],
                           preferred_element_type=jnp.float32) + b2[...]

        out_flow = head(hf, w1_f, b1_f, w2_f, b2_f)   # Classifier
        out_rgb = head(hr, w1_r, b1_r, w2_r, b2_r)    # Classifier_rgb

        w0 = jnp.maximum(fw_ref[0], 0.0)        # ReLU(fuse_weight)
        w1v = jnp.maximum(fw_ref[1], 0.0)
        inv = 1.0 / (w0 + w1v + EPS)
        mix = (w0 * inv) * out_flow + (w1v * inv) * out_rgb
        sw = mix * jax.nn.sigmoid(mix)          # Swish
        out_ref[...] = (jnp.dot(sw, wfc_ref[...],
                                preferred_element_type=jnp.float32)
                        + bfc_ref[...])

    return kernel


def fused_head(gaps2d, params, B, L):
    pf, pr = params['clf'], params['clf_rgb']
    nl = len(pf['lstm'])
    hid = pf['lstm'][0][1].shape[0]
    nc = params['wfc'].shape[-1]
    H2, H8 = 2 * hid, 8 * hid

    # Build the fused block-diagonal LSTM weights (outside the kernel; tiny).
    wih_bd, bih_bd, whh_bd = [], [], []
    for l in range(nl):
        wf, uf, bf = pf['lstm'][l]
        wr, ur, br = pr['lstm'][l]
        wih_bd.append(_fuse_gate_cols(wf, wr, hid))
        whh_bd.append(_fuse_gate_cols(uf, ur, hid))
        bih_bd.append(_fuse_gate_bias(bf, br, hid))

    args = [gaps2d,
            pf['wc'], pf['bc'], pf['wp'], pf['bp'],
            pr['wc'], pr['bc'], pr['wp'], pr['bp'],
            *wih_bd, *bih_bd, *whh_bd,
            pf['w1'], pf['b1'], pf['w2'], pf['b2'],
            pr['w1'], pr['b1'], pr['w2'], pr['b2'],
            params['fuse_weight'], params['wfc'], params['bfc']]
    in_specs = [_VMEM] * len(args)
    in_specs[-3] = _SMEM                         # fuse_weight: 2 scalars

    lb = L * B
    flops = (2 * 2 * lb * 3 * 512 + 2 * 2 * lb * 512 * 256
             + 2 * lb * 512 * H8 + L * nl * 2 * 2 * B * H2 * H8
             + 2 * 2 * B * (hid * 64 + 64 * nc) + 2 * B * nc * nc)
    trans = L * nl * B * (H8 + H2) + 4 * B * 64 + 3 * B * nc
    bytes_acc = sum(int(a.size) * a.dtype.itemsize for a in args) + B * nc * 4
    cost = pl.CostEstimate(flops=int(flops), transcendentals=int(trans),
                           bytes_accessed=int(bytes_acc))

    kernel = _make_head_kernel(B, L, hid, nl)
    return pl.pallas_call(
        kernel,
        out_shape=jax.ShapeDtypeStruct((B, nc), jnp.float32),
        in_specs=in_specs,
        out_specs=_VMEM,
        scratch_shapes=[pltpu.VMEM((L, B, H8), jnp.float32)],
        cost_estimate=cost,
    )(*args)


# ------------------------------- model glue --------------------------------
def wind_model_e2e(inputs, params, flow_dtype=jnp.bfloat16):
    """inputs: (B, L, 3, H, W).  Pass flow_dtype=jnp.float32 for exact f32 flows."""
    B, L, C, H, W = inputs.shape
    P = H * W
    assert C == 3
    # TODO(synk): pad H*W to a multiple of 128 for arbitrary resolutions.
    assert P % 128 == 0, "H*W must be a multiple of 128"
    R = P // 128
    x = inputs.reshape(B, L, C, R, 128)            # dense (rows, 128) pixel layout
    f1221, gap_out = pixel_stage(x, flow_dtype=flow_dtype)
    # (B, 8, L) -> (L*B, 8): tiny transpose/reshape between the two calls.
    gaps2d = jnp.transpose(gap_out, (2, 0, 1)).reshape(L * B, 8)
    outputs_fusion = fused_head(gaps2d, params, B, L)
    flows_1221_frame = f1221.reshape(B, L - 1, 4, H, W)
    return outputs_fusion, flows_1221_frame


def init_params(key, num_classes, lstm_layers, hidden):
    keys = iter(jax.random.split(key, 128))

    def dense(shape, scale=0.05):
        return scale * jax.random.normal(next(keys), shape, jnp.float32)

    def branch():
        lstm = []
        for l in range(lstm_layers):
            isz = 256 if l == 0 else hidden
            lstm.append((dense((isz, 4 * hidden)),        # W_ih^T
                         dense((hidden, 4 * hidden)),     # W_hh^T
                         dense((1, 4 * hidden))))         # b_ih + b_hh
        return dict(
            wc=dense((3, 512)), bc=dense((1, 512)),       # CNN stand-in proj
            wp=dense((512, 256)), bp=dense((1, 256)),     # fc_pre
            lstm=lstm,
            w1=dense((hidden, 64)), b1=dense((1, 64)),    # fc1
            w2=dense((64, num_classes)), b2=dense((1, num_classes)),  # fc2
        )

    return dict(
        clf=branch(),
        clf_rgb=branch(),
        fuse_weight=jnp.ones((2,), jnp.float32),
        wfc=dense((num_classes, num_classes)),            # final fc
        bfc=dense((1, num_classes)),
    )


if __name__ == "__main__":
    B, L, C, H, W = 2, 4, 3, 16, 16
    num_classes, lstm_layers, hidden = 4, 1, 32   # hid mult of 32 -> 4H == 128

    key = jax.random.PRNGKey(0)
    k_in, k_par = jax.random.split(key)
    inputs = jax.random.normal(k_in, (B, L, C, H, W), jnp.float32)
    params = init_params(k_par, num_classes, lstm_layers, hidden)

    fwd = jax.jit(wind_model_e2e)
    outputs_fusion, flows_1221_frame = fwd(inputs, params)
    jax.block_until_ready((outputs_fusion, flows_1221_frame))

    assert outputs_fusion.shape == (B, num_classes)
    assert flows_1221_frame.shape == (B, L - 1, 4, H, W)
    assert bool(jnp.all(jnp.isfinite(outputs_fusion)))
    assert bool(jnp.all(jnp.isfinite(flows_1221_frame.astype(jnp.float32))))
    print("KERNEL_OK")
</pallas_src>

<mosaic_0001>
module attributes {stable_mosaic.version = 11 : i64} {
  func.func @_pixel_kernel(%arg0: i32, %arg1: i32, %arg2: i32, %arg3: memref<1x1x3x2x128xf32, #tpu.memory_space<vmem>>, %arg4: memref<1x1x4x2x128xbf16, #tpu.memory_space<vmem>>, %arg5: memref<1x8x4xf32, #tpu.memory_space<vmem>>, %arg6: memref<3x2x128xf32, #tpu.memory_space<vmem>>, %arg7: memref<8x128xf32, #tpu.memory_space<vmem>>) attributes {dimension_semantics = [#tpu.dimension_semantics<parallel>, #tpu.dimension_semantics<arbitrary>, #tpu.dimension_semantics<arbitrary>], iteration_bounds = array<i64: 2, 4, 1>, scalar_prefetch = 0 : i64, scratch_operands = 2 : i64, tpu.core_type = #tpu.core_type<tc>, window_params = [{transform_indices = @transform_0, window_bounds = array<i64: 1, 1, 3, 2, 128>}, {transform_indices = @transform_1, window_bounds = array<i64: 1, 1, 4, 2, 128>}, {transform_indices = @transform_2, window_bounds = array<i64: 1, 8, 4>}]} {
    %c2_i32 = arith.constant 2 : i32
    %0 = arith.muli %arg2, %c2_i32 : i32
    %1 = tpu.assume_multiple %0, 2 : i32
    %c0 = arith.constant 0 : index
    %c0_0 = arith.constant 0 : index
    %c0_1 = arith.constant 0 : index
    %c0_2 = arith.constant 0 : index
    %c0_3 = arith.constant 0 : index
    %2 = vector.load %arg3[%c0, %c0_0, %c0_1, %c0_2, %c0_3] : memref<1x1x3x2x128xf32, #tpu.memory_space<vmem>>, vector<1x1x3x2x128xf32>
    %3 = vector.shape_cast %2 : vector<1x1x3x2x128xf32> to vector<3x2x128xf32>
    %c0_i32 = arith.constant 0 : i32
    %4 = arith.cmpi eq, %arg1, %c0_i32 : i32
    %c0_i32_4 = arith.constant 0 : i32
    %5 = arith.cmpi eq, %arg2, %c0_i32_4 : i32
    %6 = arith.andi %4, %5 : i1
    %7 = arith.extui %6 : i1 to i32
    %c0_i32_5 = arith.constant 0 : i32
    %8 = arith.cmpi ne, %7, %c0_i32_5 : i32
    scf.if %8 {
      %cst_27 = arith.constant 0.000000e+00 : f32
      %44 = vector.broadcast %cst_27 : f32 to vector<8x4xf32>
      %c0_28 = arith.constant 0 : index
      %c0_29 = arith.constant 0 : index
      %c0_30 = arith.constant 0 : index
      %45 = vector.load %arg5[%c0_28, %c0_29, %c0_30] : memref<1x8x4xf32, #tpu.memory_space<vmem>>, vector<1x8x4xf32>
      %46 = vector.shape_cast %45 : vector<1x8x4xf32> to vector<8x4xf32>
      %47 = vector.shape_cast %44 : vector<8x4xf32> to vector<1x8x4xf32>
      tpu.vector_store %arg5[%c0_28, %c0_29, %c0_30], %47 {strides = array<i32>} : memref<1x8x4xf32, #tpu.memory_space<vmem>>, vector<1x8x4xf32>,
    } else {
    }
    %c0_i32_6 = arith.constant 0 : i32
    %9 = arith.cmpi eq, %arg2, %c0_i32_6 : i32
    %10 = arith.extui %9 : i1 to i32
    %c0_i32_7 = arith.constant 0 : i32
    %11 = arith.cmpi ne, %10, %c0_i32_7 : i32
    scf.if %11 {
      %cst_27 = arith.constant 0.000000e+00 : f32
      %44 = vector.broadcast %cst_27 : f32 to vector<8x128xf32>
      %c0_28 = arith.constant 0 : index
      %c0_29 = arith.constant 0 : index
      %45 = vector.load %arg7[%c0_28, %c0_29] : memref<8x128xf32, #tpu.memory_space<vmem>>, vector<8x128xf32>
      tpu.vector_store %arg7[%c0_28, %c0_29], %44 {strides = array<i32>} : memref<8x128xf32, #tpu.memory_space<vmem>>, vector<8x128xf32>,
    } else {
    }
    %c3 = arith.constant 3 : index
    %c0_8 = arith.constant 0 : index
    %12 = vector.load %arg7[%c3, %c0_8] : memref<8x128xf32, #tpu.memory_space<vmem>>, vector<1x128xf32>
    %13 = vector.extract_strided_slice %3 {offsets = [0, 0, 0], sizes = [1, 2, 128], strides = [1, 1, 1]} : vector<3x2x128xf32> to vector<1x2x128xf32>
    %14 = vector.shape_cast %13 : vector<1x2x128xf32> to vector<2x128xf32>
    %cst = arith.constant dense<0.000000e+00> : vector<128xf32>
    %15 = vector.multi_reduction <add>, %14, %cst [0] : vector<2x128xf32> to vector<128xf32>
    %16 = vector.shape_cast %15 : vector<128xf32> to vector<1x128xf32>
    %17 = arith.addf %12, %16 : vector<1x128xf32>
    %c3_9 = arith.constant 3 : index
    %c0_10 = arith.constant 0 : index
    %18 = vector.load %arg7[%c3_9, %c0_10] : memref<8x128xf32, #tpu.memory_space<vmem>>, vector<1x128xf32>
    tpu.vector_store %arg7[%c3_9, %c0_10], %17 {strides = array<i32>} : memref<8x128xf32, #tpu.memory_space<vmem>>, vector<1x128xf32>,
    %c4 = arith.constant 4 : index
    %c0_11 = arith.constant 0 : index
    %19 = vector.load %arg7[%c4, %c0_11] : memref<8x128xf32, #tpu.memory_space<vmem>>, vector<1x128xf32>
    %20 = vector.extract_strided_slice %3 {offsets = [1, 0, 0], sizes = [1, 2, 128], strides = [1, 1, 1]} : vector<3x2x128xf32> to vector<1x2x128xf32>
    %21 = vector.shape_cast %20 : vector<1x2x128xf32> to vector<2x128xf32>
    %cst_12 = arith.constant dense<0.000000e+00> : vector<128xf32>
    %22 = vector.multi_reduction <add>, %21, %cst_12 [0] : vector<2x128xf32> to vector<128xf32>
    %23 = vector.shape_cast %22 : vector<128xf32> to vector<1x128xf32>
    %24 = arith.addf %19, %23 : vector<1x128xf32>
    %c4_13 = arith.constant 4 : index
    %c0_14 = arith.constant 0 : index
    %25 = vector.load %arg7[%c4_13, %c0_14] : memref<8x128xf32, #tpu.memory_space<vmem>>, vector<1x128xf32>
    tpu.vector_store %arg7[%c4_13, %c0_14], %24 {strides = array<i32>} : memref<8x128xf32, #tpu.memory_space<vmem>>, vector<1x128xf32>,
    %c5 = arith.constant 5 : index
    %c0_15 = arith.constant 0 : index
    %26 = vector.load %arg7[%c5, %c0_15] : memref<8x128xf32, #tpu.memory_space<vmem>>, vector<1x128xf32>
    %27 = vector.extract_strided_slice %3 {offsets = [2, 0, 0], sizes = [1, 2, 128], strides = [1, 1, 1]} : vector<3x2x128xf32> to vector<1x2x128xf32>
    %28 = vector.shape_cast %27 : vector<1x2x128xf32> to vector<2x128xf32>
    %cst_16 = arith.constant dense<0.000000e+00> : vector<128xf32>
    %29 = vector.multi_reduction <add>, %28, %cst_16 [0] : vector<2x128xf32> to vector<128xf32>
    %30 = vector.shape_cast %29 : vector<128xf32> to vector<1x128xf32>
    %31 = arith.addf %26, %30 : vector<1x128xf32>
    %c5_17 = arith.constant 5 : index
    %c0_18 = arith.constant 0 : index
    %32 = vector.load %arg7[%c5_17, %c0_18] : memref<8x128xf32, #tpu.memory_space<vmem>>, vector<1x128xf32>
    tpu.vector_store %arg7[%c5_17, %c0_18], %31 {strides = array<i32>} : memref<8x128xf32, #tpu.memory_space<vmem>>, vector<1x128xf32>,
    %c0_i32_19 = arith.constant 0 : i32
    %33 = arith.cmpi eq, %arg1, %c0_i32_19 : i32
    %34 = arith.extui %33 : i1 to i32
    %c0_i32_20 = arith.constant 0 : i32
    %35 = arith.cmpi ne, %34, %c0_i32_20 : i32
    scf.if %35 {
      %cst_27 = arith.constant 0.000000e+00 : bf16
      %44 = vector.broadcast %cst_27 : bf16 to vector<4x2x128xbf16>
      %c0_28 = arith.constant 0 : index
      %c0_29 = arith.constant 0 : index
      %c0_30 = arith.constant 0 : index
      %c0_31 = arith.constant 0 : index
      %c0_32 = arith.constant 0 : index
      %45 = vector.load %arg4[%c0_28, %c0_29, %c0_30, %c0_31, %c0_32] : memref<1x1x4x2x128xbf16, #tpu.memory_space<vmem>>, vector<1x1x4x2x128xbf16>
      %46 = vector.shape_cast %45 : vector<1x1x4x2x128xbf16> to vector<4x2x128xbf16>
      %47 = vector.shape_cast %44 : vector<4x2x128xbf16> to vector<1x1x4x2x128xbf16>
      tpu.vector_store %arg4[%c0_28, %c0_29, %c0_30, %c0_31, %c0_32], %47 {strides = array<i32>} : memref<1x1x4x2x128xbf16, #tpu.memory_space<vmem>>, vector<1x1x4x2x128xbf16>,
    } else {
    }
    %c0_i32_21 = arith.constant 0 : i32
    %36 = arith.cmpi sgt, %arg1, %c0_i32_21 : i32
    %37 = arith.extui %36 : i1 to i32
    %c0_i32_22 = arith.constant 0 : i32
    %38 = arith.cmpi ne, %37, %c0_i32_22 : i32
    scf.if %38 {
      %c0_27 = arith.constant 0 : index
      %44 = arith.index_cast %1 : i32 to index
      %c0_28 = arith.constant 0 : index
      %45 = vector.load %arg6[%c0_27, %44, %c0_28] : memref<3x2x128xf32, #tpu.memory_space<vmem>>, vector<3x2x128xf32>
      %46 = vector.extract_strided_slice %3 {offsets = [0, 0, 0], sizes = [1, 2, 128], strides = [1, 1, 1]} : vector<3x2x128xf32> to vector<1x2x128xf32>
      %47 = vector.shape_cast %46 : vector<1x2x128xf32> to vector<2x128xf32>
      %48 = vector.extract_strided_slice %45 {offsets = [0, 0, 0], sizes = [1, 2, 128], strides = [1, 1, 1]} : vector<3x2x128xf32> to vector<1x2x128xf32>
      %49 = vector.shape_cast %48 : vector<1x2x128xf32> to vector<2x128xf32>
      %50 = arith.subf %47, %49 : vector<2x128xf32>
      %51 = vector.extract_strided_slice %3 {offsets = [1, 0, 0], sizes = [1, 2, 128], strides = [1, 1, 1]} : vector<3x2x128xf32> to vector<1x2x128xf32>
      %52 = vector.shape_cast %51 : vector<1x2x128xf32> to vector<2x128xf32>
      %53 = vector.extract_strided_slice %45 {offsets = [1, 0, 0], sizes = [1, 2, 128], strides = [1, 1, 1]} : vector<3x2x128xf32> to vector<1x2x128xf32>
      %54 = vector.shape_cast %53 : vector<1x2x128xf32> to vector<2x128xf32>
      %55 = arith.subf %52, %54 : vector<2x128xf32>
      %56 = arith.truncf %50 : vector<2x128xf32> to vector<2x128xbf16>
      %c0_29 = arith.constant 0 : index
      %c0_30 = arith.constant 0 : index
      %c0_31 = arith.constant 0 : index
      %c0_32 = arith.constant 0 : index
      %c0_33 = arith.constant 0 : index
      %57 = vector.load %arg4[%c0_29, %c0_30, %c0_31, %c0_32, %c0_33] : memref<1x1x4x2x128xbf16, #tpu.memory_space<vmem>>, vector<1x1x1x2x128xbf16>
      %58 = vector.shape_cast %57 : vector<1x1x1x2x128xbf16> to vector<2x128xbf16>
      %59 = vector.shape_cast %56 : vector<2x128xbf16> to vector<1x1x1x2x128xbf16>
      tpu.vector_store %arg4[%c0_29, %c0_30, %c0_31, %c0_32, %c0_33], %59 {strides = array<i32>} : memref<1x1x4x2x128xbf16, #tpu.memory_space<vmem>>, vector<1x1x1x2x128xbf16>,
      %60 = arith.truncf %55 : vector<2x128xf32> to vector<2x128xbf16>
      %c0_34 = arith.constant 0 : index
      %c0_35 = arith.constant 0 : index
      %c1 = arith.constant 1 : index
      %c0_36 = arith.constant 0 : index
      %c0_37 = arith.constant 0 : index
      %61 = vector.load %arg4[%c0_34, %c0_35, %c1, %c0_36, %c0_37] : memref<1x1x4x2x128xbf16, #tpu.memory_space<vmem>>, vector<1x1x1x2x128xbf16>
      %62 = vector.shape_cast %61 : vector<1x1x1x2x128xbf16> to vector<2x128xbf16>
      %63 = vector.shape_cast %60 : vector<2x128xbf16> to vector<1x1x1x2x128xbf16>
      tpu.vector_store %arg4[%c0_34, %c0_35, %c1, %c0_36, %c0_37], %63 {strides = array<i32>} : memref<1x1x4x2x128xbf16, #tpu.memory_space<vmem>>, vector<1x1x1x2x128xbf16>,
      %cst_38 = arith.constant 0.000000e+00 : f32
      %64 = vector.broadcast %cst_38 : f32 to vector<2x128xf32>
      %65 = arith.subf %64, %50 : vector<2x128xf32>
      %66 = arith.truncf %65 : vector<2x128xf32> to vector<2x128xbf16>
      %c0_39 = arith.constant 0 : index
      %c0_40 = arith.constant 0 : index
      %c2 = arith.constant 2 : index
      %c0_41 = arith.constant 0 : index
      %c0_42 = arith.constant 0 : index
      %67 = vector.load %arg4[%c0_39, %c0_40, %c2, %c0_41, %c0_42] : memref<1x1x4x2x128xbf16, #tpu.memory_space<vmem>>, vector<1x1x1x2x128xbf16>
      %68 = vector.shape_cast %67 : vector<1x1x1x2x128xbf16> to vector<2x128xbf16>
      %69 = vector.shape_cast %66 : vector<2x128xbf16> to vector<1x1x1x2x128xbf16>
      tpu.vector_store %arg4[%c0_39, %c0_40, %c2, %c0_41, %c0_42], %69 {strides = array<i32>} : memref<1x1x4x2x128xbf16, #tpu.memory_space<vmem>>, vector<1x1x1x2x128xbf16>,
      %cst_43 = arith.constant 0.000000e+00 : f32
      %70 = vector.broadcast %cst_43 : f32 to vector<2x128xf32>
      %71 = arith.subf %70, %55 : vector<2x128xf32>
      %72 = arith.truncf %71 : vector<2x128xf32> to vector<2x128xbf16>
      %c0_44 = arith.constant 0 : index
      %c0_45 = arith.constant 0 : index
      %c3_46 = arith.constant 3 : index
      %c0_47 = arith.constant 0 : index
      %c0_48 = arith.constant 0 : index
      %73 = vector.load %arg4[%c0_44, %c0_45, %c3_46, %c0_47, %c0_48] : memref<1x1x4x2x128xbf16, #tpu.memory_space<vmem>>, vector<1x1x1x2x128xbf16>
      %74 = vector.shape_cast %73 : vector<1x1x1x2x128xbf16> to vector<2x128xbf16>
      %75 = vector.shape_cast %72 : vector<2x128xbf16> to vector<1x1x1x2x128xbf16>
      tpu.vector_store %arg4[%c0_44, %c0_45, %c3_46, %c0_47, %c0_48], %75 {strides = array<i32>} : memref<1x1x4x2x128xbf16, #tpu.memory_space<vmem>>, vector<1x1x1x2x128xbf16>,
      %76 = arith.mulf %50, %50 : vector<2x128xf32>
      %77 = arith.mulf %55, %55 : vector<2x128xf32>
      %78 = arith.addf %76, %77 : vector<2x128xf32>
      %cst_49 = arith.constant 9.99999993E-9 : f32
      %79 = vector.broadcast %cst_49 : f32 to vector<2x128xf32>
      %80 = arith.addf %78, %79 : vector<2x128xf32>
      %81 = math.sqrt %80 : vector<2x128xf32>
      %c0_50 = arith.constant 0 : index
      %c0_51 = arith.constant 0 : index
      %82 = vector.load %arg7[%c0_50, %c0_51] : memref<8x128xf32, #tpu.memory_space<vmem>>, vector<1x128xf32>
      %cst_52 = arith.constant dense<0.000000e+00> : vector<128xf32>
      %83 = vector.multi_reduction <add>, %81, %cst_52 [0] : vector<2x128xf32> to vector<128xf32>
      %84 = vector.shape_cast %83 : vector<128xf32> to vector<1x128xf32>
      %85 = arith.addf %82, %84 : vector<1x128xf32>
      %c0_53 = arith.constant 0 : index
      %c0_54 = arith.constant 0 : index
      %86 = vector.load %arg7[%c0_53, %c0_54] : memref<8x128xf32, #tpu.memory_space<vmem>>, vector<1x128xf32>
      tpu.vector_store %arg7[%c0_53, %c0_54], %85 {strides = array<i32>} : memref<8x128xf32, #tpu.memory_space<vmem>>, vector<1x128xf32>,
      %c1_55 = arith.constant 1 : index
      %c0_56 = arith.constant 0 : index
      %87 = vector.load %arg7[%c1_55, %c0_56] : memref<8x128xf32, #tpu.memory_space<vmem>>, vector<1x128xf32>
      %88 = arith.negf %50 : vector<2x128xf32>
      %89 = math.exp %88 : vector<2x128xf32>
      %cst_57 = arith.constant 1.000000e+00 : f32
      %90 = vector.broadcast %cst_57 : f32 to vector<2x128xf32>
      %91 = arith.addf %90, %89 : vector<2x128xf32>
      %92 = arith.divf %90, %91 : vector<2x128xf32>
      %cst_58 = arith.constant dense<0.000000e+00> : vector<128xf32>
      %93 = vector.multi_reduction <add>, %92, %cst_58 [0] : vector<2x128xf32> to vector<128xf32>
      %94 = vector.shape_cast %93 : vector<128xf32> to vector<1x128xf32>
      %95 = arith.addf %87, %94 : vector<1x128xf32>
      %c1_59 = arith.constant 1 : index
      %c0_60 = arith.constant 0 : index
      %96 = vector.load %arg7[%c1_59, %c0_60] : memref<8x128xf32, #tpu.memory_space<vmem>>, vector<1x128xf32>
      tpu.vector_store %arg7[%c1_59, %c0_60], %95 {strides = array<i32>} : memref<8x128xf32, #tpu.memory_space<vmem>>, vector<1x128xf32>,
      %c2_61 = arith.constant 2 : index
      %c0_62 = arith.constant 0 : index
      %97 = vector.load %arg7[%c2_61, %c0_62] : memref<8x128xf32, #tpu.memory_space<vmem>>, vector<1x128xf32>
      %98 = arith.negf %55 : vector<2x128xf32>
      %99 = math.exp %98 : vector<2x128xf32>
      %cst_63 = arith.constant 1.000000e+00 : f32
      %100 = vector.broadcast %cst_63 : f32 to vector<2x128xf32>
      %101 = arith.addf %100, %99 : vector<2x128xf32>
      %102 = arith.divf %100, %101 : vector<2x128xf32>
      %cst_64 = arith.constant dense<0.000000e+00> : vector<128xf32>
      %103 = vector.multi_reduction <add>, %102, %cst_64 [0] : vector<2x128xf32> to vector<128xf32>
      %104 = vector.shape_cast %103 : vector<128xf32> to vector<1x128xf32>
      %105 = arith.addf %97, %104 : vector<1x128xf32>
      %c2_65 = arith.constant 2 : index
      %c0_66 = arith.constant 0 : index
      %106 = vector.load %arg7[%c2_65, %c0_66] : memref<8x128xf32, #tpu.memory_space<vmem>>, vector<1x128xf32>
      tpu.vector_store %arg7[%c2_65, %c0_66], %105 {strides = array<i32>} : memref<8x128xf32, #tpu.memory_space<vmem>>, vector<1x128xf32>,
    } else {
    }
    %c0_23 = arith.constant 0 : index
    %39 = arith.index_cast %1 : i32 to index
    %c0_24 = arith.constant 0 : index
    %40 = vector.load %arg6[%c0_23, %39, %c0_24] : memref<3x2x128xf32, #tpu.memory_space<vmem>>, vector<3x2x128xf32>
    tpu.vector_store %arg6[%c0_23, %39, %c0_24], %3 {strides = array<i32>} : memref<3x2x128xf32, #tpu.memory_space<vmem>>, vector<3x2x128xf32>,
    %c0_i32_25 = arith.constant 0 : i32
    %41 = arith.cmpi eq, %arg2, %c0_i32_25 : i32
    %42 = arith.extui %41 : i1 to i32
    %c0_i32_26 = arith.constant 0 : i32
    %43 = arith.cmpi ne, %42, %c0_i32_26 : i32
    scf.if %43 {
      %c0_27 = arith.constant 0 : index
      %c0_28 = arith.constant 0 : index
      %44 = vector.load %arg7[%c0_27, %c0_28] : memref<8x128xf32, #tpu.memory_space<vmem>>, vector<8x128xf32>
      %cst_29 = arith.constant dense<0.000000e+00> : vector<8xf32>
      %45 = vector.multi_reduction <add>, %44, %cst_29 [1] : vector<8x128xf32> to vector<8xf32>
      %46 = vector.shape_cast %45 : vector<8xf32> to vector<8x1xf32>
      %cst_30 = arith.constant 3.906250e-03 : f32
      %47 = vector.broadcast %cst_30 : f32 to vector<8x1xf32>
      %48 = arith.mulf %46, %47 : vector<8x1xf32>
      %49 = tpu.iota {dimensions = array<i32: 1>} : vector<8x4xi32>
      %50 = vector.broadcast %arg1 : i32 to vector<8x4xi32>
      %51 = arith.cmpi eq, %49, %50 : vector<8x4xi32>
      %c0_31 = arith.constant 0 : index
      %c0_32 = arith.constant 0 : index
      %c0_33 = arith.constant 0 : index
      %52 = vector.load %arg5[%c0_31, %c0_32, %c0_33] : memref<1x8x4xf32, #tpu.memory_space<vmem>>, vector<1x8x4xf32>
      %53 = vector.shape_cast %52 : vector<1x8x4xf32> to vector<8x4xf32>
      %54 = vector.shape_cast %48 : vector<8x1xf32> to vector<8x1xf32>
      %55 = vector.broadcast %54 : vector<8x1xf32> to vector<8x4xf32>
      %56 = arith.select %51, %55, %53 : vector<8x4xi1>, vector<8x4xf32>
      %c0_34 = arith.constant 0 : index
      %c0_35 = arith.constant 0 : index
      %c0_36 = arith.constant 0 : index
      %57 = vector.load %arg5[%c0_34, %c0_35, %c0_36] : memref<1x8x4xf32, #tpu.memory_space<vmem>>, vector<1x8x4xf32>
      %58 = vector.shape_cast %57 : vector<1x8x4xf32> to vector<8x4xf32>
      %59 = vector.shape_cast %56 : vector<8x4xf32> to vector<1x8x4xf32>
      tpu.vector_store %arg5[%c0_34, %c0_35, %c0_36], %59 {strides = array<i32>} : memref<1x8x4xf32, #tpu.memory_space<vmem>>, vector<1x8x4xf32>,
    } else {
    }
    return
  }
  func.func @transform_0(%arg0: i32, %arg1: i32, %arg2: i32) -> (i32, i32, i32, i32, i32) {
    %c0_i32 = arith.constant 0 : i32
    %c0_i32_0 = arith.constant 0 : i32
    %c0_i32_1 = arith.constant 0 : i32
    return %arg0, %arg1, %c0_i32, %arg2, %c0_i32_0 : i32, i32, i32, i32, i32
  }
  func.func @transform_1(%arg0: i32, %arg1: i32, %arg2: i32) -> (i32, i32, i32, i32, i32) {
    %c1_i32 = arith.constant 1 : i32
    %0 = arith.subi %arg1, %c1_i32 : i32
    %c0_i32 = arith.constant 0 : i32
    %1 = arith.maxsi %0, %c0_i32 : i32
    %c0_i32_0 = arith.constant 0 : i32
    %c0_i32_1 = arith.constant 0 : i32
    %c0_i32_2 = arith.constant 0 : i32
    return %arg0, %1, %c0_i32_0, %arg2, %c0_i32_1 : i32, i32, i32, i32, i32
  }
  func.func @transform_2(%arg0: i32, %arg1: i32, %arg2: i32) -> (i32, i32, i32) {
    %c0_i32 = arith.constant 0 : i32
    %c0_i32_0 = arith.constant 0 : i32
    %c0_i32_1 = arith.constant 0 : i32
    return %arg0, %c0_i32, %c0_i32_0 : i32, i32, i32
  }
}

module attributes {stable_mosaic.version = 11 : i64} {
  func.func @kernel(%arg0: memref<8x8xf32, #tpu.memory_space<vmem>>, %arg1: memref<3x512xf32, #tpu.memory_space<vmem>>, %arg2: memref<1x512xf32, #tpu.memory_space<vmem>>, %arg3: memref<512x256xf32, #tpu.memory_space<vmem>>, %arg4: memref<1x256xf32, #tpu.memory_space<vmem>>, %arg5: memref<3x512xf32, #tpu.memory_space<vmem>>, %arg6: memref<1x512xf32, #tpu.memory_space<vmem>>, %arg7: memref<512x256xf32, #tpu.memory_space<vmem>>, %arg8: memref<1x256xf32, #tpu.memory_space<vmem>>, %arg9: memref<512x256xf32, #tpu.memory_space<vmem>>, %arg10: memref<1x256xf32, #tpu.memory_space<vmem>>, %arg11: memref<64x256xf32, #tpu.memory_space<vmem>>, %arg12: memref<32x64xf32, #tpu.memory_space<vmem>>, %arg13: memref<1x64xf32, #tpu.memory_space<vmem>>, %arg14: memref<64x4xf32, #tpu.memory_space<vmem>>, %arg15: memref<1x4xf32, #tpu.memory_space<vmem>>, %arg16: memref<32x64xf32, #tpu.memory_space<vmem>>, %arg17: memref<1x64xf32, #tpu.memory_space<vmem>>, %arg18: memref<64x4xf32, #tpu.memory_space<vmem>>, %arg19: memref<1x4xf32, #tpu.memory_space<vmem>>, %arg20: memref<2xf32, #tpu.memory_space<smem>>, %arg21: memref<4x4xf32, #tpu.memory_space<vmem>>, %arg22: memref<1x4xf32, #tpu.memory_space<vmem>>, %arg23: memref<2x4xf32, #tpu.memory_space<vmem>>, %arg24: memref<4x2x256xf32, #tpu.memory_space<vmem>>) attributes {dimension_semantics = [], scalar_prefetch = 0 : i64, scratch_operands = 1 : i64, tpu.core_type = #tpu.core_type<tc>} {
    %c0 = arith.constant 0 : index
    %c0_0 = arith.constant 0 : index
    %0 = vector.load %arg0[%c0, %c0_0] : memref<8x8xf32, #tpu.memory_space<vmem>>, vector<8x8xf32>
    %1 = vector.extract_strided_slice %0 {offsets = [0, 0], sizes = [8, 3], strides = [1, 1]} : vector<8x8xf32> to vector<8x3xf32>
    %2 = vector.extract_strided_slice %0 {offsets = [0, 3], sizes = [8, 3], strides = [1, 1]} : vector<8x8xf32> to vector<8x3xf32>
    %c0_1 = arith.constant 0 : index
    %c0_2 = arith.constant 0 : index
    %3 = vector.load %arg2[%c0_1, %c0_2] : memref<1x512xf32, #tpu.memory_space<vmem>>, vector<1x512xf32>
    %4 = vector.extract_strided_slice %1 {offsets = [0, 0], sizes = [8, 1], strides = [1, 1]} : vector<8x3xf32> to vector<8x1xf32>
    %c0_3 = arith.constant 0 : index
    %c0_4 = arith.constant 0 : index
    %5 = vector.load %arg1[%c0_3, %c0_4] : memref<3x512xf32, #tpu.memory_space<vmem>>, vector<1x512xf32>
    %6 = vector.broadcast %4 : vector<8x1xf32> to vector<8x512xf32>
    %7 = vector.broadcast %5 : vector<1x512xf32> to vector<8x512xf32>
    %8 = arith.mulf %6, %7 : vector<8x512xf32>
    %9 = vector.broadcast %3 : vector<1x512xf32> to vector<8x512xf32>
    %10 = arith.addf %9, %8 : vector<8x512xf32>
    %11 = vector.extract_strided_slice %1 {offsets = [0, 1], sizes = [8, 1], strides = [1, 1]} : vector<8x3xf32> to vector<8x1xf32>
    %c1 = arith.constant 1 : index
    %c0_5 = arith.constant 0 : index
    %12 = vector.load %arg1[%c1, %c0_5] : memref<3x512xf32, #tpu.memory_space<vmem>>, vector<1x512xf32>
    %13 = vector.broadcast %11 : vector<8x1xf32> to vector<8x512xf32>
    %14 = vector.broadcast %12 : vector<1x512xf32> to vector<8x512xf32>
    %15 = arith.mulf %13, %14 : vector<8x512xf32>
    %16 = arith.addf %10, %15 : vector<8x512xf32>
    %17 = vector.extract_strided_slice %1 {offsets = [0, 2], sizes = [8, 1], strides = [1, 1]} : vector<8x3xf32> to vector<8x1xf32>
    %c2 = arith.constant 2 : index
    %c0_6 = arith.constant 0 : index
    %18 = vector.load %arg1[%c2, %c0_6] : memref<3x512xf32, #tpu.memory_space<vmem>>, vector<1x512xf32>
    %19 = vector.broadcast %17 : vector<8x1xf32> to vector<8x512xf32>
    %20 = vector.broadcast %18 : vector<1x512xf32> to vector<8x512xf32>
    %21 = arith.mulf %19, %20 : vector<8x512xf32>
    %22 = arith.addf %16, %21 : vector<8x512xf32>
    %cst = arith.constant 0.000000e+00 : f32
    %23 = vector.broadcast %cst : f32 to vector<8x512xf32>
    %24 = arith.maximumf %22, %23 : vector<8x512xf32>
    %c0_7 = arith.constant 0 : index
    %c0_8 = arith.constant 0 : index
    %25 = vector.load %arg3[%c0_7, %c0_8] : memref<512x256xf32, #tpu.memory_space<vmem>>, vector<512x256xf32>
    %cst_9 = arith.constant dense<0.000000e+00> : vector<8x256xf32>
    %26 = tpu.matmul %24, %25, %cst_9 {dimension_numbers = #tpu.dot_dimension_numbers<[1], [0], [0], [1], [0, 0, 1, 1], [], []>} : vector<8x512xf32>, vector<512x256xf32>, vector<8x256xf32> -> vector<8x256xf32>
    %c0_10 = arith.constant 0 : index
    %c0_11 = arith.constant 0 : index
    %27 = vector.load %arg4[%c0_10, %c0_11] : memref<1x256xf32, #tpu.memory_space<vmem>>, vector<1x256xf32>
    %28 = vector.broadcast %27 : vector<1x256xf32> to vector<8x256xf32>
    %29 = arith.addf %26, %28 : vector<8x256xf32>
    %c0_12 = arith.constant 0 : index
    %c0_13 = arith.constant 0 : index
    %30 = vector.load %arg6[%c0_12, %c0_13] : memref<1x512xf32, #tpu.memory_space<vmem>>, vector<1x512xf32>
    %31 = vector.extract_strided_slice %2 {offsets = [0, 0], sizes = [8, 1], strides = [1, 1]} : vector<8x3xf32> to vector<8x1xf32>
    %c0_14 = arith.constant 0 : index
    %c0_15 = arith.constant 0 : index
    %32 = vector.load %arg5[%c0_14, %c0_15] : memref<3x512xf32, #tpu.memory_space<vmem>>, vector<1x512xf32>
    %33 = vector.broadcast %31 : vector<8x1xf32> to vector<8x512xf32>
    %34 = vector.broadcast %32 : vector<1x512xf32> to vector<8x512xf32>
    %35 = arith.mulf %33, %34 : vector<8x512xf32>
    %36 = vector.broadcast %30 : vector<1x512xf32> to vector<8x512xf32>
    %37 = arith.addf %36, %35 : vector<8x512xf32>
    %38 = vector.extract_strided_slice %2 {offsets = [0, 1], sizes = [8, 1], strides = [1, 1]} : vector<8x3xf32> to vector<8x1xf32>
    %c1_16 = arith.constant 1 : index
    %c0_17 = arith.constant 0 : index
    %39 = vector.load %arg5[%c1_16, %c0_17] : memref<3x512xf32, #tpu.memory_space<vmem>>, vector<1x512xf32>
    %40 = vector.broadcast %38 : vector<8x1xf32> to vector<8x512xf32>
    %41 = vector.broadcast %39 : vector<1x512xf32> to vector<8x512xf32>
    %42 = arith.mulf %40, %41 : vector<8x512xf32>
    %43 = arith.addf %37, %42 : vector<8x512xf32>
    %44 = vector.extract_strided_slice %2 {offsets = [0, 2], sizes = [8, 1], strides = [1, 1]} : vector<8x3xf32> to vector<8x1xf32>
    %c2_18 = arith.constant 2 : index
    %c0_19 = arith.constant 0 : index
    %45 = vector.load %arg5[%c2_18, %c0_19] : memref<3x512xf32, #tpu.memory_space<vmem>>, vector<1x512xf32>
    %46 = vector.broadcast %44 : vector<8x1xf32> to vector<8x512xf32>
    %47 = vector.broadcast %45 : vector<1x512xf32> to vector<8x512xf32>
    %48 = arith.mulf %46, %47 : vector<8x512xf32>
    %49 = arith.addf %43, %48 : vector<8x512xf32>
    %cst_20 = arith.constant 0.000000e+00 : f32
    %50 = vector.broadcast %cst_20 : f32 to vector<8x512xf32>
    %51 = arith.maximumf %49, %50 : vector<8x512xf32>
    %c0_21 = arith.constant 0 : index
    %c0_22 = arith.constant 0 : index
    %52 = vector.load %arg7[%c0_21, %c0_22] : memref<512x256xf32, #tpu.memory_space<vmem>>, vector<512x256xf32>
    %cst_23 = arith.constant dense<0.000000e+00> : vector<8x256xf32>
    %53 = tpu.matmul %51, %52, %cst_23 {dimension_numbers = #tpu.dot_dimension_numbers<[1], [0], [0], [1], [0, 0, 1, 1], [], []>} : vector<8x512xf32>, vector<512x256xf32>, vector<8x256xf32> -> vector<8x256xf32>
    %c0_24 = arith.constant 0 : index
    %c0_25 = arith.constant 0 : index
    %54 = vector.load %arg8[%c0_24, %c0_25] : memref<1x256xf32, #tpu.memory_space<vmem>>, vector<1x256xf32>
    %55 = vector.broadcast %54 : vector<1x256xf32> to vector<8x256xf32>
    %56 = arith.addf %53, %55 : vector<8x256xf32>
    %57 = tpu.concatenate %29, %56 in 1 : vector<8x256xf32>, vector<8x256xf32> -> vector<8x512xf32>
    %c0_26 = arith.constant 0 : index
    %c0_27 = arith.constant 0 : index
    %58 = vector.load %arg9[%c0_26, %c0_27] : memref<512x256xf32, #tpu.memory_space<vmem>>, vector<512x256xf32>
    %cst_28 = arith.constant dense<0.000000e+00> : vector<8x256xf32>
    %59 = tpu.matmul %57, %58, %cst_28 {dimension_numbers = #tpu.dot_dimension_numbers<[1], [0], [0], [1], [0, 0, 1, 1], [], []>} : vector<8x512xf32>, vector<512x256xf32>, vector<8x256xf32> -> vector<8x256xf32>
    %c0_29 = arith.constant 0 : index
    %c0_30 = arith.constant 0 : index
    %60 = vector.load %arg10[%c0_29, %c0_30] : memref<1x256xf32, #tpu.memory_space<vmem>>, vector<1x256xf32>
    %61 = vector.broadcast %60 : vector<1x256xf32> to vector<8x256xf32>
    %62 = arith.addf %59, %61 : vector<8x256xf32>
    %63 = vector.extract_strided_slice %62 {offsets = [0, 0], sizes = [2, 256], strides = [1, 1]} : vector<8x256xf32> to vector<2x256xf32>
    %c0_31 = arith.constant 0 : index
    %c0_32 = arith.constant 0 : index
    %c0_33 = arith.constant 0 : index
    %64 = vector.load %arg24[%c0_31, %c0_32, %c0_33] : memref<4x2x256xf32, #tpu.memory_space<vmem>>, vector<1x2x256xf32>
    %65 = vector.shape_cast %64 : vector<1x2x256xf32> to vector<2x256xf32>
    %66 = vector.shape_cast %63 : vector<2x256xf32> to vector<1x2x256xf32>
    tpu.vector_store %arg24[%c0_31, %c0_32, %c0_33], %66 {strides = array<i32>} : memref<4x2x256xf32, #tpu.memory_space<vmem>>, vector<1x2x256xf32>,
    %67 = vector.extract_strided_slice %62 {offsets = [2, 0], sizes = [2, 256], strides = [1, 1]} : vector<8x256xf32> to vector<2x256xf32>
    %c1_34 = arith.constant 1 : index
    %c0_35 = arith.constant 0 : index
    %c0_36 = arith.constant 0 : index
    %68 = vector.load %arg24[%c1_34, %c0_35, %c0_36] : memref<4x2x256xf32, #tpu.memory_space<vmem>>, vector<1x2x256xf32>
    %69 = vector.shape_cast %68 : vector<1x2x256xf32> to vector<2x256xf32>
    %70 = vector.shape_cast %67 : vector<2x256xf32> to vector<1x2x256xf32>
    tpu.vector_store %arg24[%c1_34, %c0_35, %c0_36], %70 {strides = array<i32>} : memref<4x2x256xf32, #tpu.memory_space<vmem>>, vector<1x2x256xf32>,
    %71 = vector.extract_strided_slice %62 {offsets = [4, 0], sizes = [2, 256], strides = [1, 1]} : vector<8x256xf32> to vector<2x256xf32>
    %c2_37 = arith.constant 2 : index
    %c0_38 = arith.constant 0 : index
    %c0_39 = arith.constant 0 : index
    %72 = vector.load %arg24[%c2_37, %c0_38, %c0_39] : memref<4x2x256xf32, #tpu.memory_space<vmem>>, vector<1x2x256xf32>
    %73 = vector.shape_cast %72 : vector<1x2x256xf32> to vector<2x256xf32>
    %74 = vector.shape_cast %71 : vector<2x256xf32> to vector<1x2x256xf32>
    tpu.vector_store %arg24[%c2_37, %c0_38, %c0_39], %74 {strides = array<i32>} : memref<4x2x256xf32, #tpu.memory_space<vmem>>, vector<1x2x256xf32>,
    %75 = vector.extract_strided_slice %62 {offsets = [6, 0], sizes = [2, 256], strides = [1, 1]} : vector<8x256xf32> to vector<2x256xf32>
    %c3 = arith.constant 3 : index
    %c0_40 = arith.constant 0 : index
    %c0_41 = arith.constant 0 : index
    %76 = vector.load %arg24[%c3, %c0_40, %c0_41] : memref<4x2x256xf32, #tpu.memory_space<vmem>>, vector<1x2x256xf32>
    %77 = vector.shape_cast %76 : vector<1x2x256xf32> to vector<2x256xf32>
    %78 = vector.shape_cast %75 : vector<2x256xf32> to vector<1x2x256xf32>
    tpu.vector_store %arg24[%c3, %c0_40, %c0_41], %78 {strides = array<i32>} : memref<4x2x256xf32, #tpu.memory_space<vmem>>, vector<1x2x256xf32>,
    %c0_42 = arith.constant 0 : index
    %c0_43 = arith.constant 0 : index
    %79 = vector.load %arg11[%c0_42, %c0_43] : memref<64x256xf32, #tpu.memory_space<vmem>>, vector<64x256xf32>
    %80 = tpu.iota {dimensions = array<i32: 1>} : vector<1x64xi32>
    %c32_i32 = arith.constant 32 : i32
    %81 = vector.broadcast %c32_i32 : i32 to vector<1x64xi32>
    %82 = arith.cmpi sge, %80, %81 : vector<1x64xi32>
    %83 = arith.extui %82 : vector<1x64xi1> to vector<1x64xi32>
    %84 = arith.sitofp %83 : vector<1x64xi32> to vector<1x64xf32>
    %cst_44 = arith.constant 0.000000e+00 : f32
    %85 = vector.broadcast %cst_44 : f32 to vector<2x64xf32>
    %c0_i32 = arith.constant 0 : i32
    %86 = arith.index_cast %c0_i32 : i32 to index
    %c0_45 = arith.constant 0 : index
    %c0_46 = arith.constant 0 : index
    %87 = vector.load %arg24[%86, %c0_45, %c0_46] : memref<4x2x256xf32, #tpu.memory_space<vmem>>, vector<1x2x256xf32>
    %88 = vector.shape_cast %87 : vector<1x2x256xf32> to vector<2x256xf32>
    %cst_47 = arith.constant dense<0.000000e+00> : vector<2x256xf32>
    %89 = tpu.matmul %85, %79, %cst_47 {dimension_numbers = #tpu.dot_dimension_numbers<[1], [0], [0], [1], [0, 0, 1, 1], [], []>} : vector<2x64xf32>, vector<64x256xf32>, vector<2x256xf32> -> vector<2x256xf32>
    %90 = arith.addf %88, %89 : vector<2x256xf32>
    %91 = vector.extract_strided_slice %90 {offsets = [0, 0], sizes = [2, 64], strides = [1, 1]} : vector<2x256xf32> to vector<2x64xf32>
    %92 = arith.negf %91 : vector<2x64xf32>
    %93 = math.exp %92 : vector<2x64xf32>
    %cst_48 = arith.constant 1.000000e+00 : f32
    %94 = vector.broadcast %cst_48 : f32 to vector<2x64xf32>
    %95 = arith.addf %94, %93 : vector<2x64xf32>
    %96 = arith.divf %94, %95 : vector<2x64xf32>
    %97 = vector.extract_strided_slice %90 {offsets = [0, 64], sizes = [2, 64], strides = [1, 1]} : vector<2x256xf32> to vector<2x64xf32>
    %98 = arith.negf %97 : vector<2x64xf32>
    %99 = math.exp %98 : vector<2x64xf32>
    %cst_49 = arith.constant 1.000000e+00 : f32
    %100 = vector.broadcast %cst_49 : f32 to vector<2x64xf32>
    %101 = arith.addf %100, %99 : vector<2x64xf32>
    %102 = arith.divf %100, %101 : vector<2x64xf32>
    %103 = vector.extract_strided_slice %90 {offsets = [0, 128], sizes = [2, 64], strides = [1, 1]} : vector<2x256xf32> to vector<2x64xf32>
    %104 = math.tanh %103 : vector<2x64xf32>
    %105 = vector.extract_strided_slice %90 {offsets = [0, 192], sizes = [2, 64], strides = [1, 1]} : vector<2x256xf32> to vector<2x64xf32>
    %106 = arith.negf %105 : vector<2x64xf32>
    %107 = math.exp %106 : vector<2x64xf32>
    %cst_50 = arith.constant 1.000000e+00 : f32
    %108 = vector.broadcast %cst_50 : f32 to vector<2x64xf32>
    %109 = arith.addf %108, %107 : vector<2x64xf32>
    %110 = arith.divf %108, %109 : vector<2x64xf32>
    %111 = arith.mulf %102, %85 : vector<2x64xf32>
    %112 = arith.mulf %96, %104 : vector<2x64xf32>
    %113 = arith.addf %111, %112 : vector<2x64xf32>
    %114 = math.tanh %113 : vector<2x64xf32>
    %115 = arith.mulf %110, %114 : vector<2x64xf32>
    %c0_i32_51 = arith.constant 0 : i32
    %116 = arith.cmpi sgt, %c0_i32, %c0_i32_51 : i32
    %117 = vector.broadcast %84 : vector<1x64xf32> to vector<2x64xf32>
    %118 = arith.mulf %115, %117 : vector<2x64xf32>
    %119 = arith.select %116, %115, %118 : vector<2x64xf32>
    %c0_i32_52 = arith.constant 0 : i32
    %120 = arith.cmpi sgt, %c0_i32, %c0_i32_52 : i32
    %121 = vector.broadcast %84 : vector<1x64xf32> to vector<2x64xf32>
    %122 = arith.mulf %113, %121 : vector<2x64xf32>
    %123 = arith.select %120, %113, %122 : vector<2x64xf32>
    %c1_i32 = arith.constant 1 : i32
    %124 = arith.index_cast %c1_i32 : i32 to index
    %c0_53 = arith.constant 0 : index
    %c0_54 = arith.constant 0 : index
    %125 = vector.load %arg24[%124, %c0_53, %c0_54] : memref<4x2x256xf32, #tpu.memory_space<vmem>>, vector<1x2x256xf32>
    %126 = vector.shape_cast %125 : vector<1x2x256xf32> to vector<2x256xf32>
    %cst_55 = arith.constant dense<0.000000e+00> : vector<2x256xf32>
    %127 = tpu.matmul %119, %79, %cst_55 {dimension_numbers = #tpu.dot_dimension_numbers<[1], [0], [0], [1], [0, 0, 1, 1], [], []>} : vector<2x64xf32>, vector<64x256xf32>, vector<2x256xf32> -> vector<2x256xf32>
    %128 = arith.addf %126, %127 : vector<2x256xf32>
    %129 = vector.extract_strided_slice %128 {offsets = [0, 0], sizes = [2, 64], strides = [1, 1]} : vector<2x256xf32> to vector<2x64xf32>
    %130 = arith.negf %129 : vector<2x64xf32>
    %131 = math.exp %130 : vector<2x64xf32>
    %cst_56 = arith.constant 1.000000e+00 : f32
    %132 = vector.broadcast %cst_56 : f32 to vector<2x64xf32>
    %133 = arith.addf %132, %131 : vector<2x64xf32>
    %134 = arith.divf %132, %133 : vector<2x64xf32>
    %135 = vector.extract_strided_slice %128 {offsets = [0, 64], sizes = [2, 64], strides = [1, 1]} : vector<2x256xf32> to vector<2x64xf32>
    %136 = arith.negf %135 : vector<2x64xf32>
    %137 = math.exp %136 : vector<2x64xf32>
    %cst_57 = arith.constant 1.000000e+00 : f32
    %138 = vector.broadcast %cst_57 : f32 to vector<2x64xf32>
    %139 = arith.addf %138, %137 : vector<2x64xf32>
    %140 = arith.divf %138, %139 : vector<2x64xf32>
    %141 = vector.extract_strided_slice %128 {offsets = [0, 128], sizes = [2, 64], strides = [1, 1]} : vector<2x256xf32> to vector<2x64xf32>
    %142 = math.tanh %141 : vector<2x64xf32>
    %143 = vector.extract_strided_slice %128 {offsets = [0, 192], sizes = [2, 64], strides = [1, 1]} : vector<2x256xf32> to vector<2x64xf32>
    %144 = arith.negf %143 : vector<2x64xf32>
    %145 = math.exp %144 : vector<2x64xf32>
    %cst_58 = arith.constant 1.000000e+00 : f32
    %146 = vector.broadcast %cst_58 : f32 to vector<2x64xf32>
    %147 = arith.addf %146, %145 : vector<2x64xf32>
    %148 = arith.divf %146, %147 : vector<2x64xf32>
    %149 = arith.mulf %140, %123 : vector<2x64xf32>
    %150 = arith.mulf %134, %142 : vector<2x64xf32>
    %151 = arith.addf %149, %150 : vector<2x64xf32>
    %152 = math.tanh %151 : vector<2x64xf32>
    %153 = arith.mulf %148, %152 : vector<2x64xf32>
    %c0_i32_59 = arith.constant 0 : i32
    %154 = arith.cmpi sgt, %c1_i32, %c0_i32_59 : i32
    %155 = vector.broadcast %84 : vector<1x64xf32> to vector<2x64xf32>
    %156 = arith.mulf %153, %155 : vector<2x64xf32>
    %157 = arith.select %154, %153, %156 : vector<2x64xf32>
    %c0_i32_60 = arith.constant 0 : i32
    %158 = arith.cmpi sgt, %c1_i32, %c0_i32_60 : i32
    %159 = vector.broadcast %84 : vector<1x64xf32> to vector<2x64xf32>
    %160 = arith.mulf %151, %159 : vector<2x64xf32>
    %161 = arith.select %158, %151, %160 : vector<2x64xf32>
    %c2_i32 = arith.constant 2 : i32
    %162 = arith.index_cast %c2_i32 : i32 to index
    %c0_61 = arith.constant 0 : index
    %c0_62 = arith.constant 0 : index
    %163 = vector.load %arg24[%162, %c0_61, %c0_62] : memref<4x2x256xf32, #tpu.memory_space<vmem>>, vector<1x2x256xf32>
    %164 = vector.shape_cast %163 : vector<1x2x256xf32> to vector<2x256xf32>
    %cst_63 = arith.constant dense<0.000000e+00> : vector<2x256xf32>
    %165 = tpu.matmul %157, %79, %cst_63 {dimension_numbers = #tpu.dot_dimension_numbers<[1], [0], [0], [1], [0, 0, 1, 1], [], []>} : vector<2x64xf32>, vector<64x256xf32>, vector<2x256xf32> -> vector<2x256xf32>
    %166 = arith.addf %164, %165 : vector<2x256xf32>
    %167 = vector.extract_strided_slice %166 {offsets = [0, 0], sizes = [2, 64], strides = [1, 1]} : vector<2x256xf32> to vector<2x64xf32>
    %168 = arith.negf %167 : vector<2x64xf32>
    %169 = math.exp %168 : vector<2x64xf32>
    %cst_64 = arith.constant 1.000000e+00 : f32
    %170 = vector.broadcast %cst_64 : f32 to vector<2x64xf32>
    %171 = arith.addf %170, %169 : vector<2x64xf32>
    %172 = arith.divf %170, %171 : vector<2x64xf32>
    %173 = vector.extract_strided_slice %166 {offsets = [0, 64], sizes = [2, 64], strides = [1, 1]} : vector<2x256xf32> to vector<2x64xf32>
    %174 = arith.negf %173 : vector<2x64xf32>
    %175 = math.exp %174 : vector<2x64xf32>
    %cst_65 = arith.constant 1.000000e+00 : f32
    %176 = vector.broadcast %cst_65 : f32 to vector<2x64xf32>
    %177 = arith.addf %176, %175 : vector<2x64xf32>
    %178 = arith.divf %176, %177 : vector<2x64xf32>
    %179 = vector.extract_strided_slice %166 {offsets = [0, 128], sizes = [2, 64], strides = [1, 1]} : vector<2x256xf32> to vector<2x64xf32>
    %180 = math.tanh %179 : vector<2x64xf32>
    %181 = vector.extract_strided_slice %166 {offsets = [0, 192], sizes = [2, 64], strides = [1, 1]} : vector<2x256xf32> to vector<2x64xf32>
    %182 = arith.negf %181 : vector<2x64xf32>
    %183 = math.exp %182 : vector<2x64xf32>
    %cst_66 = arith.constant 1.000000e+00 : f32
    %184 = vector.broadcast %cst_66 : f32 to vector<2x64xf32>
    %185 = arith.addf %184, %183 : vector<2x64xf32>
    %186 = arith.divf %184, %185 : vector<2x64xf32>
    %187 = arith.mulf %178, %161 : vector<2x64xf32>
    %188 = arith.mulf %172, %180 : vector<2x64xf32>
    %189 = arith.addf %187, %188 : vector<2x64xf32>
    %190 = math.tanh %189 : vector<2x64xf32>
    %191 = arith.mulf %186, %190 : vector<2x64xf32>
    %c0_i32_67 = arith.constant 0 : i32
    %192 = arith.cmpi sgt, %c2_i32, %c0_i32_67 : i32
    %193 = vector.broadcast %84 : vector<1x64xf32> to vector<2x64xf32>
    %194 = arith.mulf %191, %193 : vector<2x64xf32>
    %195 = arith.select %192, %191, %194 : vector<2x64xf32>
    %c0_i32_68 = arith.constant 0 : i32
    %196 = arith.cmpi sgt, %c2_i32, %c0_i32_68 : i32
    %197 = vector.broadcast %84 : vector<1x64xf32> to vector<2x64xf32>
    %198 = arith.mulf %189, %197 : vector<2x64xf32>
    %199 = arith.select %196, %189, %198 : vector<2x64xf32>
    %c3_i32 = arith.constant 3 : i32
    %200 = arith.index_cast %c3_i32 : i32 to index
    %c0_69 = arith.constant 0 : index
    %c0_70 = arith.constant 0 : index
    %201 = vector.load %arg24[%200, %c0_69, %c0_70] : memref<4x2x256xf32, #tpu.memory_space<vmem>>, vector<1x2x256xf32>
    %202 = vector.shape_cast %201 : vector<1x2x256xf32> to vector<2x256xf32>
    %cst_71 = arith.constant dense<0.000000e+00> : vector<2x256xf32>
    %203 = tpu.matmul %195, %79, %cst_71 {dimension_numbers = #tpu.dot_dimension_numbers<[1], [0], [0], [1], [0, 0, 1, 1], [], []>} : vector<2x64xf32>, vector<64x256xf32>, vector<2x256xf32> -> vector<2x256xf32>
    %204 = arith.addf %202, %203 : vector<2x256xf32>
    %205 = vector.extract_strided_slice %204 {offsets = [0, 0], sizes = [2, 64], strides = [1, 1]} : vector<2x256xf32> to vector<2x64xf32>
    %206 = arith.negf %205 : vector<2x64xf32>
    %207 = math.exp %206 : vector<2x64xf32>
    %cst_72 = arith.constant 1.000000e+00 : f32
    %208 = vector.broadcast %cst_72 : f32 to vector<2x64xf32>
    %209 = arith.addf %208, %207 : vector<2x64xf32>
    %210 = arith.divf %208, %209 : vector<2x64xf32>
    %211 = vector.extract_strided_slice %204 {offsets = [0, 64], sizes = [2, 64], strides = [1, 1]} : vector<2x256xf32> to vector<2x64xf32>
    %212 = arith.negf %211 : vector<2x64xf32>
    %213 = math.exp %212 : vector<2x64xf32>
    %cst_73 = arith.constant 1.000000e+00 : f32
    %214 = vector.broadcast %cst_73 : f32 to vector<2x64xf32>
    %215 = arith.addf %214, %213 : vector<2x64xf32>
    %216 = arith.divf %214, %215 : vector<2x64xf32>
    %217 = vector.extract_strided_slice %204 {offsets = [0, 128], sizes = [2, 64], strides = [1, 1]} : vector<2x256xf32> to vector<2x64xf32>
    %218 = math.tanh %217 : vector<2x64xf32>
    %219 = vector.extract_strided_slice %204 {offsets = [0, 192], sizes = [2, 64], strides = [1, 1]} : vector<2x256xf32> to vector<2x64xf32>
    %220 = arith.negf %219 : vector<2x64xf32>
    %221 = math.exp %220 : vector<2x64xf32>
    %cst_74 = arith.constant 1.000000e+00 : f32
    %222 = vector.broadcast %cst_74 : f32 to vector<2x64xf32>
    %223 = arith.addf %222, %221 : vector<2x64xf32>
    %224 = arith.divf %222, %223 : vector<2x64xf32>
    %225 = arith.mulf %216, %199 : vector<2x64xf32>
    %226 = arith.mulf %210, %218 : vector<2x64xf32>
    %227 = arith.addf %225, %226 : vector<2x64xf32>
    %228 = math.tanh %227 : vector<2x64xf32>
    %229 = arith.mulf %224, %228 : vector<2x64xf32>
    %c0_i32_75 = arith.constant 0 : i32
    %230 = arith.cmpi sgt, %c3_i32, %c0_i32_75 : i32
    %231 = vector.broadcast %84 : vector<1x64xf32> to vector<2x64xf32>
    %232 = arith.mulf %229, %231 : vector<2x64xf32>
    %233 = arith.select %230, %229, %232 : vector<2x64xf32>
    %c0_i32_76 = arith.constant 0 : i32
    %234 = arith.cmpi sgt, %c3_i32, %c0_i32_76 : i32
    %235 = vector.broadcast %84 : vector<1x64xf32> to vector<2x64xf32>
    %236 = arith.mulf %227, %235 : vector<2x64xf32>
    %237 = arith.select %234, %227, %236 : vector<2x64xf32>
    %c4_i32 = arith.constant 4 : i32
    %238 = vector.extract_strided_slice %233 {offsets = [0, 0], sizes = [2, 32], strides = [1, 1]} : vector<2x64xf32> to vector<2x32xf32>
    %239 = vector.extract_strided_slice %233 {offsets = [0, 32], sizes = [2, 32], strides = [1, 1]} : vector<2x64xf32> to vector<2x32xf32>
    %c0_77 = arith.constant 0 : index
    %c0_78 = arith.constant 0 : index
    %240 = vector.load %arg12[%c0_77, %c0_78] : memref<32x64xf32, #tpu.memory_space<vmem>>, vector<32x64xf32>
    %cst_79 = arith.constant dense<0.000000e+00> : vector<2x64xf32>
    %241 = tpu.matmul %238, %240, %cst_79 {dimension_numbers = #tpu.dot_dimension_numbers<[1], [0], [0], [1], [0, 0, 1, 1], [], []>} : vector<2x32xf32>, vector<32x64xf32>, vector<2x64xf32> -> vector<2x64xf32>
    %c0_80 = arith.constant 0 : index
    %c0_81 = arith.constant 0 : index
    %242 = vector.load %arg13[%c0_80, %c0_81] : memref<1x64xf32, #tpu.memory_space<vmem>>, vector<1x64xf32>
    %243 = vector.broadcast %242 : vector<1x64xf32> to vector<2x64xf32>
    %244 = arith.addf %241, %243 : vector<2x64xf32>
    %245 = arith.negf %244 : vector<2x64xf32>
    %246 = math.exp %245 : vector<2x64xf32>
    %cst_82 = arith.constant 1.000000e+00 : f32
    %247 = vector.broadcast %cst_82 : f32 to vector<2x64xf32>
    %248 = arith.addf %247, %246 : vector<2x64xf32>
    %249 = arith.divf %247, %248 : vector<2x64xf32>
    %c0_83 = arith.constant 0 : index
    %c0_84 = arith.constant 0 : index
    %250 = vector.load %arg14[%c0_83, %c0_84] : memref<64x4xf32, #tpu.memory_space<vmem>>, vector<64x4xf32>
    %cst_85 = arith.constant dense<0.000000e+00> : vector<2x4xf32>
    %251 = tpu.matmul %249, %250, %cst_85 {dimension_numbers = #tpu.dot_dimension_numbers<[1], [0], [0], [1], [0, 0, 1, 1], [], []>} : vector<2x64xf32>, vector<64x4xf32>, vector<2x4xf32> -> vector<2x4xf32>
    %c0_86 = arith.constant 0 : index
    %c0_87 = arith.constant 0 : index
    %252 = vector.load %arg15[%c0_86, %c0_87] : memref<1x4xf32, #tpu.memory_space<vmem>>, vector<1x4xf32>
    %253 = vector.broadcast %252 : vector<1x4xf32> to vector<2x4xf32>
    %254 = arith.addf %251, %253 : vector<2x4xf32>
    %c0_88 = arith.constant 0 : index
    %c0_89 = arith.constant 0 : index
    %255 = vector.load %arg16[%c0_88, %c0_89] : memref<32x64xf32, #tpu.memory_space<vmem>>, vector<32x64xf32>
    %cst_90 = arith.constant dense<0.000000e+00> : vector<2x64xf32>
    %256 = tpu.matmul %239, %255, %cst_90 {dimension_numbers = #tpu.dot_dimension_numbers<[1], [0], [0], [1], [0, 0, 1, 1], [], []>} : vector<2x32xf32>, vector<32x64xf32>, vector<2x64xf32> -> vector<2x64xf32>
    %c0_91 = arith.constant 0 : index
    %c0_92 = arith.constant 0 : index
    %257 = vector.load %arg17[%c0_91, %c0_92] : memref<1x64xf32, #tpu.memory_space<vmem>>, vector<1x64xf32>
    %258 = vector.broadcast %257 : vector<1x64xf32> to vector<2x64xf32>
    %259 = arith.addf %256, %258 : vector<2x64xf32>
    %260 = arith.negf %259 : vector<2x64xf32>
    %261 = math.exp %260 : vector<2x64xf32>
    %cst_93 = arith.constant 1.000000e+00 : f32
    %262 = vector.broadcast %cst_93 : f32 to vector<2x64xf32>
    %263 = arith.addf %262, %261 : vector<2x64xf32>
    %264 = arith.divf %262, %263 : vector<2x64xf32>
    %c0_94 = arith.constant 0 : index
    %c0_95 = arith.constant 0 : index
    %265 = vector.load %arg18[%c0_94, %c0_95] : memref<64x4xf32, #tpu.memory_space<vmem>>, vector<64x4xf32>
    %cst_96 = arith.constant dense<0.000000e+00> : vector<2x4xf32>
    %266 = tpu.matmul %264, %265, %cst_96 {dimension_numbers = #tpu.dot_dimension_numbers<[1], [0], [0], [1], [0, 0, 1, 1], [], []>} : vector<2x64xf32>, vector<64x4xf32>, vector<2x4xf32> -> vector<2x4xf32>
    %c0_97 = arith.constant 0 : index
    %c0_98 = arith.constant 0 : index
    %267 = vector.load %arg19[%c0_97, %c0_98] : memref<1x4xf32, #tpu.memory_space<vmem>>, vector<1x4xf32>
    %268 = vector.broadcast %267 : vector<1x4xf32> to vector<2x4xf32>
    %269 = arith.addf %266, %268 : vector<2x4xf32>
    %c0_99 = arith.constant 0 : index
    %270 = memref.load %arg20[%c0_99] : memref<2xf32, #tpu.memory_space<smem>>
    %cst_100 = arith.constant 0.000000e+00 : f32
    %271 = arith.maximumf %270, %cst_100 : f32
    %c1_101 = arith.constant 1 : index
    %272 = memref.load %arg20[%c1_101] : memref<2xf32, #tpu.memory_space<smem>>
    %cst_102 = arith.constant 0.000000e+00 : f32
    %273 = arith.maximumf %272, %cst_102 : f32
    %274 = arith.addf %271, %273 : f32
    %cst_103 = arith.constant 9.99999974E-5 : f32
    %275 = arith.addf %274, %cst_103 : f32
    %cst_104 = arith.constant 1.000000e+00 : f32
    %276 = arith.divf %cst_104, %275 : f32
    %277 = arith.mulf %271, %276 : f32
    %278 = vector.broadcast %277 : f32 to vector<2x4xf32>
    %279 = arith.mulf %278, %254 : vector<2x4xf32>
    %280 = arith.mulf %273, %276 : f32
    %281 = vector.broadcast %280 : f32 to vector<2x4xf32>
    %282 = arith.mulf %281, %269 : vector<2x4xf32>
    %283 = arith.addf %279, %282 : vector<2x4xf32>
    %284 = arith.negf %283 : vector<2x4xf32>
    %285 = math.exp %284 : vector<2x4xf32>
    %cst_105 = arith.constant 1.000000e+00 : f32
    %286 = vector.broadcast %cst_105 : f32 to vector<2x4xf32>
    %287 = arith.addf %286, %285 : vector<2x4xf32>
    %288 = arith.divf %286, %287 : vector<2x4xf32>
    %289 = arith.mulf %283, %288 : vector<2x4xf32>
    %c0_106 = arith.constant 0 : index
    %c0_107 = arith.constant 0 : index
    %290 = vector.load %arg21[%c0_106, %c0_107] : memref<4x4xf32, #tpu.memory_space<vmem>>, vector<4x4xf32>
    %cst_108 = arith.constant dense<0.000000e+00> : vector<2x4xf32>
    %291 = tpu.matmul %289, %290, %cst_108 {dimension_numbers = #tpu.dot_dimension_numbers<[1], [0], [0], [1], [0, 0, 1, 1], [], []>} : vector<2x4xf32>, vector<4x4xf32>, vector<2x4xf32> -> vector<2x4xf32>
    %c0_109 = arith.constant 0 : index
    %c0_110 = arith.constant 0 : index
    %292 = vector.load %arg22[%c0_109, %c0_110] : memref<1x4xf32, #tpu.memory_space<vmem>>, vector<1x4xf32>
    %293 = vector.broadcast %292 : vector<1x4xf32> to vector<2x4xf32>
    %294 = arith.addf %291, %293 : vector<2x4xf32>
    %c0_111 = arith.constant 0 : index
    %c0_112 = arith.constant 0 : index
    %295 = vector.load %arg23[%c0_111, %c0_112] : memref<2x4xf32, #tpu.memory_space<vmem>>, vector<2x4xf32>
    tpu.vector_store %arg23[%c0_111, %c0_112], %294 {strides = array<i32>} : memref<2x4xf32, #tpu.memory_space<vmem>>, vector<2x4xf32>,
    return
  }
}

</mosaic_0001>

<bundles_post_ra>
// kernel: wind_model_e2e.2
= control target key start
LH: loop header
LB: loop body
LE: loop exit
PB: predicated region body
PF: predicated region fallthrough
CT: control target
= control target key end

     0   :  { %s671_s9 = smov 0   ;;  %s673_s10 = smov 0   ;;  %s767_s0 = inlined_call_operand.vmem [shape: f32[2,4,3,2,128], index: 0, kind: input, shape index: {}]   ;;  %s768_s1 = inlined_call_operand.vmem [shape: bf16[2,3,4,2,128], index: 1, kind: output, shape index: {0}]   ;;  %s769_s2 = inlined_call_operand.vmem [shape: f32[2,8,4], index: 2, kind: output, shape index: {1}]  }
   0x1   :  { %s675_s11 = smov 0   ;;  %s677_s12 = smov 0  }
   0x2   :  { %s679_s13 = smov 0  }
   0x3 LB: > { %s28_s14 = sadd.s32 1, %s643_s11  ;;  %s32_s15 = sadd.s32 1, %s647_s12  ;;  %s651_s13 = sphi %s679_s13, %s13_s13   ;;  %s647_s12 = sphi %s677_s12, %s773_s12   ;;  %s643_s11 = sphi %s675_s11, %s772_s11   ;;  %s639_s10 = sphi %s673_s10, %s771_s10   ;;  %s635_s9 = sphi %s671_s9, %s770_s9  }
   0x4   : > { %p30_p0 = scmp.ge.s32.totalorder %s28_s14, 4  ;;  %p535_p1 = scmp.ge.s32.totalorder %s651_s13, 1 }
   0x5   : > { %p155_p2 = scmp.lt.s32.totalorder %s651_s13, 9 }
   0x6   : > { %s775_s14 = smov (%p30_p0, %s28_s14), 0  ;;  %s777_s15 = smov (!%p30_p0, %s32_s15), %s647_s12 }
   0x7   : > { %p156_p3 = pnand %p535_p1, %p155_p2  ;;  %p34_p4 = scmp.ge.s32.totalorder %s777_s15, 2 }
   0x8   : > { %p197_p5 = scmp.lt.s32.totalorder (!%p156_p3), %s639_s10, 1  ;;  %p199_p6 = scmp.lt.s32.totalorder (!%p156_p3), %s635_s9, 3 }
   0x9   : > { %s779_s15 = smov (%p34_p4, %s777_s15), 0  ;;  %159 = sbr.rel (%p156_p3) target bundleno = 252 (0xfc), region = 24 }
   0xa   : > { %s537_s16 = sadd.s32 (!%p156_p3), 4294967295, %s635_s9  ;;  %p235_p7 = scmp.eq.s32.totalorder (!%p156_p3), %s635_s9, 0 }
   0xb   : > { %p210_p8 = scmp.gt.s32.totalorder (!%p156_p3), %s537_s16, 0  ;;  %p538_p9 = scmp.lt.s32.totalorder (!%p156_p3), %s537_s16, 2 }
   0xe   : > { %s781_s10 = smov (!%p197_p5, %s639_s10), 1  ;;  %s783_s16 = smov (!%p210_p8, %s537_s16), 0  ;;  %vm241_vm0 = vcmask (%p235_p7), 31744   ;;  %v653_v3 = vmov (%p235_p7), 0.0  }
   0xf   : > { %s200_s17 = scalar_select %p199_p6, %s635_s9, 3 }
  0x10   : > { %s559_s18 = smul.u32 12, %s781_s10  ;;  %s544_s21 = sshll.u32 %s781_s10, 3 }
  0x11   : > { %s558_s19 = smul.u32 3, %s200_s17  ;;  %s710_s25 = scalar_lea.vmem %s769_s2, %s544_s21 }
  0x12   : > { %s785_s16 = smov (!%p538_p9, %s783_s16), 2  ;;  %240 = sbr.rel (!%p235_p7) target bundleno = 23 (0x17), region = 28  ;;  %242 = vst.msk [vmem:[%s710_s25] sm:$0xff] (%p235_p7), %vm241_vm0, %v653_v3 }
  0x13   : > { %s206_s20 = sadd.s32 %s559_s18, %s558_s19  ;;  %s543_s29 = sshll.u32 %s785_s16, 2 }
  0x14   : > { %s536_s22 = sshll.u32 %s206_s20, 1  ;;  %s221_s30 = sadd.s32 %s559_s18, %s543_s29 }
  0x15   : > { %s208_s28 = scalar_lea.vmem %s767_s0, %s536_s22  ;;  %s722_s5 = scalar_lea.vmem %s768_s1, %s221_s30 }
  0x16   : > { %v715_v0 = vld [vmem:[%s208_s28] sm:$0x3]  ;;  %v717_v1 = vld [vmem:[%s208_s28 + $0x2] sm:$0x3]  ;;  %v234_v2 = vld [vmem:[%s208_s28 + $0x4] sm:$0x3] }
  0x17 PF: > { %vm248_vm1 = vcmask 1041408   ;;  %v654_v4 = vmov 0.0   ;;  %p546_p10 = scmp.ne.s32.totalorder %s635_s9, 0 }
  0x18   : > { %246 = vst [vmem:[#allocation3] sm:$0xff] %v654_v4  ;;  %v249_v5 = vsel %vm248_vm1, %v715_v0, 0.0  ;;  %v259_v6 = vsel %vm248_vm1, %v717_v1, 0.0  ;;  %v269_v7 = vsel %vm248_vm1, %v234_v2, 0.0 }
  0x19   : > { %v250_v8 = vrot.slane %v249_v5, 4  ;;  %v260_v9 = vrot.slane %v259_v6, 4  ;;  %v270_v10 = vrot.slane %v269_v7, 4 }
  0x1b   : > { %v251_v11 = vadd.f32 %v250_v8, %v249_v5  ;;  %v261_v12 = vadd.f32 %v260_v9, %v259_v6  ;;  %v271_v13 = vadd.f32 %v270_v10, %v269_v7 }
  0x1d   : > { %v252_v14 = vrot.slane %v251_v11, 2  ;;  %v262_v15 = vrot.slane %v261_v12, 2  ;;  %v272_v16 = vrot.slane %v271_v13, 2 }
  0x1f   : > { %v253_v17 = vadd.f32 %v252_v14, %v251_v11  ;;  %v263_v18 = vadd.f32 %v262_v15, %v261_v12  ;;  %v273_v19 = vadd.f32 %v272_v16, %v271_v13  ;;  %v247_v23 = vld [vmem:[#allocation3 + $0x3] sm:$0x1]  ;;  %v258_v24 = vld [vmem:[#allocation3 + $0x4] sm:$0x1]  ;;  %v268_v25 = vld [vmem:[#allocation3 + $0x5] sm:$0x1] }
  0x21   : > { %v254_v20 = vrot.slane %v253_v17, 1  ;;  %v264_v21 = vrot.slane %v263_v18, 1  ;;  %v274_v22 = vrot.slane %v273_v19, 1 }
  0x23   : > { %v255_v26 = vadd.f32 %v254_v20, %v253_v17  ;;  %v265_v27 = vadd.f32 %v264_v21, %v263_v18  ;;  %v275_v28 = vadd.f32 %v274_v22, %v273_v19 }
  0x24   : > { %280 = sbr.rel (%p546_p10) target bundleno = 44 (0x2c), region = 36 }
  0x25   : > { %v256_v29 = vadd.f32 %v255_v26, %v247_v23  ;;  %v266_v30 = vadd.f32 %v265_v27, %v258_v24  ;;  %v276_v31 = vadd.f32 %v275_v28, %v268_v25 }
  0x27   : > { %257 = vst [vmem:[#allocation3 + $0x3] sm:$0x1] %v256_v29  ;;  %267 = vst [vmem:[#allocation3 + $0x4] sm:$0x1] %v266_v30 }
  0x28   : > { %277 = vst [vmem:[#allocation3 + $0x5] sm:$0x1] %v276_v31 }
  0x29   : > { %v655_v32 = vmov 0  }
  0x2a   : > { %281 = vst [vmem:[%s722_s5] sm:$0x1] %v655_v32  ;;  %282 = vst [vmem:[%s722_s5 + $0x1] sm:$0x1] %v655_v32 }
  0x2b   : > { %283 = vst [vmem:[%s722_s5 + $0x2] sm:$0x1] %v655_v32  ;;  %284 = vst [vmem:[%s722_s5 + $0x3] sm:$0x1] %v655_v32 }
  0x2c PF: > { %p547_p11 = scmp.le.s32.totalorder %s635_s9, 0 }
  0x2e   : > { %288 = sbr.rel (%p547_p11) target bundleno = 103 (0x67), region = 40 }
  0x33   : > { %v290_v33 = vld [vmem:[#allocation2] sm:$0x3]  ;;  %v291_v34 = vld [vmem:[#allocation2 + $0x2] sm:$0x3]  ;;  %v318_v8 = vld [vmem:[#allocation3] sm:$0x1] }
  0x34   : > { %v292_v35 = vsub.f32 %v715_v0, %v290_v33  ;;  %v293_v36 = vsub.f32 %v717_v1, %v291_v34  ;;  %v328_v18 = vld [vmem:[#allocation3 + $0x1] sm:$0x1]  ;;  %v344_v21 = vld [vmem:[#allocation3 + $0x2] sm:$0x1] }
  0x36   : > { %v294_v37 = vpack.c.bf16 %v292_v35, %v292_v35  ;;  %v307_v38 = vmul.f32 %v292_v35, %v292_v35  ;;  %v551_v39 = vmul.f32 -1.442695, %v292_v35  ;;  %v296_v40 = vpack.c.bf16 %v293_v36, %v293_v36 }
  0x37   : > { %v308_v41 = vmul.f32 %v293_v36, %v293_v36  ;;  %v552_v42 = vmul.f32 -1.442695, %v293_v36  ;;  %v299_v43 = vsub.f32 0.0, %v292_v35  ;;  %v303_v44 = vsub.f32 0.0, %v293_v36 }
  0x38   : > { %295 = vst [vmem:[%s722_s5] sm:$0x1] %v294_v37  ;;  %548 = vst [vmem:[%s722_s5 + $0x1] sm:$0x1] %v296_v40  ;;  %603 = vpow2.f32 %v551_v39 }
  0x39   : > { %v309_v45 = vadd.f32 %v308_v41, %v307_v38  ;;  %v300_v46 = vpack.c.bf16 %v299_v43, %v299_v43  ;;  %v304_v47 = vpack.c.bf16 %v303_v44, %v303_v44  ;;  %605 = vpow2.f32 %v552_v42 }
  0x3b   : > { %v310_v48 = vadd.f32 1e-08, %v309_v45  ;;  %549 = vst [vmem:[%s722_s5 + $0x2] sm:$0x1] %v300_v46  ;;  %550 = vst [vmem:[%s722_s5 + $0x3] sm:$0x1] %v304_v47 }
  0x3d   : > { %607 = vrsqrt.f32 %v310_v48  ;;  %vm313_vm2 = vcmp.eq.f32.partialorder %v310_v48, inf  ;;  %v316_v54 = vand.u32 2147483648, %v310_v48  ;;  %vm315_vm3 = vcmp.eq.f32.partialorder %v310_v48, 0.0 }
  0x45   : > { %v604_v49 = vpop.eup %603 }
  0x46   : > { %v606_v50 = vpop.eup %605  ;;  %v332_v51 = vadd.f32 1.0, %v604_v49 }
  0x47   : > { %v348_v52 = vadd.f32 1.0, %v606_v50 }
  0x48   : > { %609 = vrcp.f32 %v332_v51 }
  0x49   : > { %611 = vrcp.f32 %v348_v52 }
  0x4a   : > { %v608_v53 = vpop.eup %607 }
  0x4b   : > { %v312_v55 = vmul.f32 %v608_v53, %v310_v48 }
  0x4d   : > { %v314_v56 = vsel %vm313_vm2, %v310_v48, %v312_v55 }
  0x4e   : > { %v317_v57 = vsel %vm315_vm3, %v316_v54, %v314_v56 }
  0x4f   : > { %v319_v58 = vsel %vm248_vm1, %v317_v57, 0.0 }
  0x50   : > { %v320_v59 = vrot.slane %v319_v58, 4 }
  0x52   : > { %v321_v60 = vadd.f32 %v320_v59, %v319_v58 }
  0x54   : > { %v322_v61 = vrot.slane %v321_v60, 2 }
  0x55   : > { %v610_v62 = vpop.eup %609 }
  0x56   : > { %v612_v63 = vpop.eup %611  ;;  %v323_v2 = vadd.f32 %v322_v61, %v321_v60  ;;  %v335_v3 = vsel %vm248_vm1, %v610_v62, 0.0 }
  0x57   : > { %v336_v4 = vrot.slane %v335_v3, 4  ;;  %v351_v5 = vsel %vm248_vm1, %v612_v63, 0.0 }
  0x58   : > { %v324_v6 = vrot.slane %v323_v2, 1  ;;  %v352_v7 = vrot.slane %v351_v5, 4 }
  0x59   : > { %v337_v9 = vadd.f32 %v336_v4, %v335_v3 }
  0x5a   : > { %v325_v10 = vadd.f32 %v324_v6, %v323_v2  ;;  %v353_v11 = vadd.f32 %v352_v7, %v351_v5 }
  0x5b   : > { %v338_v12 = vrot.slane %v337_v9, 2 }
  0x5c   : > { %v326_v13 = vadd.f32 %v325_v10, %v318_v8  ;;  %v354_v14 = vrot.slane %v353_v11, 2 }
  0x5d   : > { %v339_v15 = vadd.f32 %v338_v12, %v337_v9 }
  0x5e   : > { %327 = vst [vmem:[#allocation3] sm:$0x1] %v326_v13  ;;  %v355_v16 = vadd.f32 %v354_v14, %v353_v11 }
  0x5f   : > { %v340_v17 = vrot.slane %v339_v15, 1 }
  0x60   : > { %v356_v19 = vrot.slane %v355_v16, 1 }
  0x61   : > { %v341_v20 = vadd.f32 %v340_v17, %v339_v15 }
  0x62   : > { %v357_v22 = vadd.f32 %v356_v19, %v355_v16 }
  0x63   : > { %v342_v23 = vadd.f32 %v341_v20, %v328_v18 }
  0x64   : > { %v358_v24 = vadd.f32 %v357_v22, %v344_v21 }
  0x65   : > { %343 = vst [vmem:[#allocation3 + $0x1] sm:$0x1] %v342_v23 }
  0x66   : > { %359 = vst [vmem:[#allocation3 + $0x2] sm:$0x1] %v358_v24 }
  0x67 PF: > { %361 = vst [vmem:[#allocation2] sm:$0x3] %v715_v0  ;;  %362 = vst [vmem:[#allocation2 + $0x2] sm:$0x3] %v717_v1  ;;  %v371_v26 = vlaneseq  ;;  %v373_v28 = vstv %s635_s9  ;;  %v375_v30 = vld [vmem:[%s710_s25] sm:$0xff]  ;;  %vm377_vm5 = vcmask 31744  }
  0x69   : > { %v372_v27 = vand.u32 127, %v371_v26 }
  0x6b   : > { %vm374_vm4 = vcmp.eq.s32.totalorder %v372_v27, %v373_v28 }
  0x6d   : > { %v367_v25 = vld [vmem:[#allocation3] sm:$0xff] }
  0x6e   : > { %368 = vadd.xlane.f32.xlu0 %v367_v25 }
  0xf7   : > { %v369_v29 = vpop.xlane.xlu0 %368 }
  0xf8   : > { %v370_v31 = vmul.f32 0.00390625, %v369_v29 }
  0xfa   : > { %v376_v32 = vsel %vm374_vm4, %v370_v31, %v375_v30 }
  0xfb   : > { %378 = vst.msk [vmem:[%s710_s25] sm:$0xff] %vm377_vm5, %v376_v32 }
  0xfc PF: > { %s13_s13 = sadd.s32 1, %s651_s13   ;;  %s770_s9 = smov %s643_s11 }
  0xfd   : > { %p10_p12 = scmp.ge.s32.totalorder %s13_s13, 10   ;;  %s771_s10 = smov %s647_s12 }
  0xfe   : > { %s772_s11 = smov %s775_s14  ;;  %s773_s12 = smov %s779_s15 }
  0xff   :  { %12 = sbr.rel (!%p10_p12) target bundleno = 3 (0x3), region = 91 }

// kernel: wind_model_e2e.3
= control target key start
LH: loop header
LB: loop body
LE: loop exit
PB: predicated region body
PF: predicated region fallthrough
CT: control target
= control target key end

     0   :  { %s4207_s0 = inlined_call_operand.vmem [shape: f32[8,8], index: 0, kind: input, shape index: {}]   ;;  %s4208_s1 = inlined_call_operand.vmem [shape: f32[3,512], index: 1, kind: input, shape index: {}]   ;;  %s4209_s2 = inlined_call_operand.vmem [shape: f32[1,512], index: 2, kind: input, shape index: {}]   ;;  %s4210_s3 = inlined_call_operand.vmem [shape: f32[512,256], index: 3, kind: input, shape index: {}]   ;;  %s4211_s4 = inlined_call_operand.vmem [shape: f32[1,256], index: 4, kind: input, shape index: {}]   ;;  %s4212_s5 = inlined_call_operand.vmem [shape: f32[3,512], index: 5, kind: input, shape index: {}]   ;;  %s4213_s6 = inlined_call_operand.vmem [shape: f32[1,512], index: 6, kind: input, shape index: {}]   ;;  %s4214_s7 = inlined_call_operand.vmem [shape: f32[512,256], index: 7, kind: input, shape index: {}]   ;;  %s4215_s8 = inlined_call_operand.vmem [shape: f32[1,256], index: 8, kind: input, shape index: {}]   ;;  %s4216_s9 = inlined_call_operand.vmem [shape: f32[512,256], index: 9, kind: input, shape index: {}]   ;;  %s4217_s10 = inlined_call_operand.vmem [shape: f32[1,256], index: 10, kind: input, shape index: {}]   ;;  %s4218_s11 = inlined_call_operand.vmem [shape: f32[64,256], index: 11, kind: input, shape index: {}]   ;;  %s4219_s12 = inlined_call_operand.vmem [shape: f32[32,64], index: 12, kind: input, shape index: {}]   ;;  %s4220_s13 = inlined_call_operand.vmem [shape: f32[1,64], index: 13, kind: input, shape index: {}]   ;;  %s4221_s14 = inlined_call_operand.vmem [shape: f32[64,4], index: 14, kind: input, shape index: {}]   ;;  %s4222_s15 = inlined_call_operand.vmem [shape: f32[1,4], index: 15, kind: input, shape index: {}]   ;;  %s4223_s16 = inlined_call_operand.vmem [shape: f32[32,64], index: 16, kind: input, shape index: {}]   ;;  %s4224_s17 = inlined_call_operand.vmem [shape: f32[1,64], index: 17, kind: input, shape index: {}]   ;;  %s4225_s18 = inlined_call_operand.vmem [shape: f32[64,4], index: 18, kind: input, shape index: {}]   ;;  %s4226_s19 = inlined_call_operand.vmem [shape: f32[1,4], index: 19, kind: input, shape index: {}]   ;;  %s4227_s20 = inlined_call_operand.vmem [shape: f32[2], index: 20, kind: input, shape index: {}]   ;;  %s4228_s21 = inlined_call_operand.vmem [shape: f32[4,4], index: 21, kind: input, shape index: {}]   ;;  %s4229_s22 = inlined_call_operand.vmem [shape: f32[1,4], index: 22, kind: input, shape index: {}]   ;;  %s4230_s23 = inlined_call_operand.hbm [shape: f32[2,4], index: 23, kind: output, shape index: {}]  }
   0x1   :  { %4235 = sst [smem:[#allocation9_spill]] %s4207_s0 }
   0x2   :  { %4236 = sst [smem:[#allocation10_spill]] %s4208_s1 }
   0x3   :  { %4237 = sst [smem:[#allocation11_spill]] %s4209_s2 }
   0x4   :  { %4238 = sst [smem:[#allocation12_spill]] %s4210_s3 }
   0x5   :  { %4239 = sst [smem:[#allocation13_spill]] %s4211_s4 }
   0x6   :  { %4240 = sst [smem:[#allocation14_spill]] %s4212_s5 }
   0x7   :  { %4241 = sst [smem:[#allocation15_spill]] %s4213_s6 }
   0x8   :  { %4242 = sst [smem:[#allocation16_spill]] %s4214_s7 }
   0x9   :  { %28 = vsyncpa [#allocation5], 0 }
   0xa   :  { %29 = vsyncpa [#allocation4], 0  ;;  %s76_s24 = sshll.u32 %s4227_s20, 4  ;;  %s77_s24 = int_to_ptr.vmem [resolvable:$true] %s76_s24 }
   0xb   :  { %s2445_s25 = scalar_lea.vmem %s77_s24, 16  ;;  %p2450_p1 = scmp.lt.s32.totalorder %s77_s24, %s77_s24 }
   0xc   :  { %p2446_p0 = scmp.ne.s32.totalorder %s77_s24, %s2445_s25  ;;  %p2451_p2 = scmp.lt.s32.totalorder %s2445_s25, %s2445_s25 }
   0xe   :  { %p2452_p3 = por %p2451_p2, %p2450_p1 }
  0x10   :  { %p2453_p4 = pnand %p2452_p3, %p2446_p0 }
  0x12   :  { %2456 = shalt.err (!%p2453_p4)
}
  0x13   :  { %s2481_s5 = smov [#allocation3]  }
  0x14   :  { %79 = dma.vmem_to_smem %s77_s24, 16, %s2481_s5, [#allocation5]  }
  0x15   :  { %2477 = dma.done.wait [#allocation5], 16  }
  0x16   :  { %2478 = vsyncadd [#allocation5], 4294967280 }
  0x17   :  { %87 = sfence }
  0x18   :  { %s4243_s2 = sld [smem:[#allocation9_spill]]  ;;  %v2482_v2 = vmov 0   ;;  %v2483_v3 = vmov 2   ;;  %v2484_v11 = vmov 1   ;;  %v2485_v12 = vmov 3   ;;  %s2493_s7 = smov 0.0  }
  0x19   :  { %s4244_s20 = sld [smem:[#allocation12_spill]]  ;;  %2377 = vset.pattern.permute.xlu0 %v2482_v2  ;;  %2379 = vset.pattern.permute.xlu1 %v2483_v3  ;;  %v2486_v19 = vmov 4   ;;  %v2487_v20 = vmov 5   ;;  %vm1249_vm1 = vcmask 523264   ;;  %vm2491_vm2 = vmmov 0  }
  0x1a   :  { %s4245_s28 = sld [smem:[#allocation16_spill]]  ;;  %vm1753_vm3 = vcmask 261120   ;;  %vm2142_vm4 = vcmask 1043456   ;;  %vm2138_vm5 = vcmask 31744   ;;  %vm2216_vm6 = vcmask 25600  }
  0x1b   :  { %s4246_s4 = sld [smem:[#allocation10_spill]] }
  0x1c   :  { %s4247_s25 = sld [smem:[#allocation11_spill]] }
  0x1d   :  { %s4248_s5 = sld [smem:[#allocation14_spill]] }
  0x1e   :  { %v88_v0 = vld [vmem:[%s4243_s2] sm:$0xff]  ;;  %s4249_s27 = sld [smem:[#allocation15_spill]] }
  0x1f   :  { %v251_v1 = vld [vmem:[%s4244_s20 + $0xf8] sm:$0xff]  ;;  %v250_v5 = vld [vmem:[%s4244_s20 + $0xf0] sm:$0xff]  ;;  %93 = vperm.xlu0 %2377, %v88_v0   ;;  %184 = vperm.xlu1 %2379, %v88_v0   ;;  %v249_v7 = vld [vmem:[%s4244_s20 + $0xe8] sm:$0xff]  ;;  %s4250_s2 = sld [smem:[#allocation13_spill]] }
  0x20   :  { %v315_v4 = vld [vmem:[%s4244_s20 + $0x2f8] sm:$0xff]  ;;  %v314_v6 = vld [vmem:[%s4244_s20 + $0x2f0] sm:$0xff]  ;;  %v313_v8 = vld [vmem:[%s4244_s20 + $0x2e8] sm:$0xff]  ;;  %360 = vmatprep.subr.mxu0 %v251_v1  ;;  %s2107_s6 = sld [smem:[#allocation3]] }
  0x21   :  { %431 = vmatprep.subr.mxu1 %v315_v4  ;;  %361 = vmatpush1.msra.mxu0 %v250_v5  ;;  %v248_v9 = vld [vmem:[%s4244_s20 + $0xe0] sm:$0xff]  ;;  %v247_v13 = vld [vmem:[%s4244_s20 + $0xd8] sm:$0xff]  ;;  %v246_v15 = vld [vmem:[%s4244_s20 + $0xd0] sm:$0xff] }
  0x22   :  { %432 = vmatpush1.msra.mxu1 %v314_v6  ;;  %362 = vmatprep.subr.mxu0 %v249_v7  ;;  %v312_v10 = vld [vmem:[%s4244_s20 + $0x2e0] sm:$0xff]  ;;  %v311_v14 = vld [vmem:[%s4244_s20 + $0x2d8] sm:$0xff]  ;;  %v310_v16 = vld [vmem:[%s4244_s20 + $0x2d0] sm:$0xff] }
  0x23   :  { %433 = vmatprep.subr.mxu1 %v313_v8  ;;  %2378 = vset.pattern.permute.xlu0 %v2484_v11  ;;  %v245_v17 = vld [vmem:[%s4244_s20 + $0xc8] sm:$0xff]  ;;  %v244_v21 = vld [vmem:[%s4244_s20 + $0xc0] sm:$0xff]  ;;  %v243_v23 = vld [vmem:[%s4244_s20 + $0xb8] sm:$0xff] }
  0x24   :  { %2380 = vset.pattern.permute.xlu1 %v2485_v12  ;;  %149 = vperm.xlu0 %2378, %v88_v0   ;;  %v309_v18 = vld [vmem:[%s4244_s20 + $0x2c8] sm:$0xff]  ;;  %v308_v22 = vld [vmem:[%s4244_s20 + $0x2c0] sm:$0xff]  ;;  %v307_v24 = vld [vmem:[%s4244_s20 + $0x2b8] sm:$0xff] }
  0x25   :  { %505 = vperm.xlu1 %2380, %v88_v0   ;;  %363 = vmatpush1.msra.mxu0 %v248_v9  ;;  %v242_v25 = vld [vmem:[%s4244_s20 + $0xb0] sm:$0xff]  ;;  %v241_v27 = vld [vmem:[%s4244_s20 + $0xa8] sm:$0xff]  ;;  %v240_v29 = vld [vmem:[%s4244_s20 + $0xa0] sm:$0xff] }
  0x26   :  { %434 = vmatpush1.msra.mxu1 %v312_v10  ;;  %364 = vmatprep.subr.mxu0 %v247_v13  ;;  %v306_v26 = vld [vmem:[%s4244_s20 + $0x2b0] sm:$0xff]  ;;  %v305_v28 = vld [vmem:[%s4244_s20 + $0x2a8] sm:$0xff]  ;;  %v304_v30 = vld [vmem:[%s4244_s20 + $0x2a0] sm:$0xff]  ;;  %s4177_s29 = smax.f32 %s2493_s7, %s2107_s6 }
  0x27   :  { %435 = vmatprep.subr.mxu1 %v311_v14  ;;  %365 = vmatpush1.msra.mxu0 %v246_v15  ;;  %v239_v31 = vld [vmem:[%s4244_s20 + $0x98] sm:$0xff]  ;;  %v238_v33 = vld [vmem:[%s4244_s20 + $0x90] sm:$0xff]  ;;  %v237_v35 = vld [vmem:[%s4244_s20 + $0x88] sm:$0xff] }
  0x28   :  { %436 = vmatpush1.msra.mxu1 %v310_v16  ;;  %2382 = vset.pattern.permute.xlu0 %v2487_v20  ;;  %v303_v32 = vld [vmem:[%s4244_s20 + $0x298] sm:$0xff]  ;;  %v302_v34 = vld [vmem:[%s4244_s20 + $0x290] sm:$0xff]  ;;  %v301_v36 = vld [vmem:[%s4244_s20 + $0x288] sm:$0xff] }
  0x29   :  { %2381 = vset.pattern.permute.xlu1 %v2486_v19  ;;  %596 = vperm.xlu0 %2382, %v88_v0   ;;  %v236_v37 = vld [vmem:[%s4244_s20 + $0x80] sm:$0xff]  ;;  %v235_v39 = vld [vmem:[%s4244_s20 + $0x78] sm:$0xff]  ;;  %v234_v41 = vld [vmem:[%s4244_s20 + $0x70] sm:$0xff] }
  0x2a   :  { %561 = vperm.xlu1 %2381, %v88_v0   ;;  %366 = vmatprep.subr.mxu0 %v245_v17  ;;  %v300_v38 = vld [vmem:[%s4244_s20 + $0x280] sm:$0xff]  ;;  %v299_v40 = vld [vmem:[%s4244_s20 + $0x278] sm:$0xff]  ;;  %v298_v42 = vld [vmem:[%s4244_s20 + $0x270] sm:$0xff] }
  0x2b   :  { %437 = vmatprep.subr.mxu1 %v309_v18  ;;  %367 = vmatpush1.msra.mxu0 %v244_v21  ;;  %v233_v43 = vld [vmem:[%s4244_s20 + $0x68] sm:$0xff]  ;;  %v232_v45 = vld [vmem:[%s4244_s20 + $0x60] sm:$0xff]  ;;  %v231_v47 = vld [vmem:[%s4244_s20 + $0x58] sm:$0xff] }
  0x2c   :  { %438 = vmatpush1.msra.mxu1 %v308_v22  ;;  %368 = vmatprep.subr.mxu0 %v243_v23  ;;  %v297_v44 = vld [vmem:[%s4244_s20 + $0x268] sm:$0xff]  ;;  %v296_v46 = vld [vmem:[%s4244_s20 + $0x260] sm:$0xff]  ;;  %v295_v48 = vld [vmem:[%s4244_s20 + $0x258] sm:$0xff] }
  0x2d   :  { %439 = vmatprep.subr.mxu1 %v307_v24  ;;  %369 = vmatpush1.msra.mxu0 %v242_v25  ;;  %v230_v49 = vld [vmem:[%s4244_s20 + $0x50] sm:$0xff]  ;;  %v229_v51 = vld [vmem:[%s4244_s20 + $0x48] sm:$0xff]  ;;  %v228_v53 = vld [vmem:[%s4244_s20 + $0x40] sm:$0xff] }
  0x2e   :  { %440 = vmatpush1.msra.mxu1 %v306_v26  ;;  %370 = vmatprep.subr.mxu0 %v241_v27  ;;  %v294_v50 = vld [vmem:[%s4244_s20 + $0x250] sm:$0xff]  ;;  %v293_v52 = vld [vmem:[%s4244_s20 + $0x248] sm:$0xff]  ;;  %v292_v54 = vld [vmem:[%s4244_s20 + $0x240] sm:$0xff] }
  0x2f   :  { %441 = vmatprep.subr.mxu1 %v305_v28  ;;  %371 = vmatpush1.msra.mxu0 %v240_v29  ;;  %v227_v55 = vld [vmem:[%s4244_s20 + $0x38] sm:$0xff]  ;;  %v226_v57 = vld [vmem:[%s4244_s20 + $0x30] sm:$0xff]  ;;  %v225_v59 = vld [vmem:[%s4244_s20 + $0x28] sm:$0xff] }
  0x30   :  { %442 = vmatpush1.msra.mxu1 %v304_v30  ;;  %372 = vmatprep.subr.mxu0 %v239_v31  ;;  %v291_v56 = vld [vmem:[%s4244_s20 + $0x238] sm:$0xff]  ;;  %v290_v58 = vld [vmem:[%s4244_s20 + $0x230] sm:$0xff]  ;;  %v289_v60 = vld [vmem:[%s4244_s20 + $0x228] sm:$0xff] }
  0x31   :  { %443 = vmatprep.subr.mxu1 %v303_v32  ;;  %373 = vmatpush1.msra.mxu0 %v238_v33  ;;  %v224_v61 = vld [vmem:[%s4244_s20 + $0x20] sm:$0xff]  ;;  %v223_v63 = vld [vmem:[%s4244_s20 + $0x18] sm:$0xff]  ;;  %v222_v1 = vld [vmem:[%s4244_s20 + $0x10] sm:$0xff] }
  0x32   :  { %444 = vmatpush1.msra.mxu1 %v302_v34  ;;  %374 = vmatprep.subr.mxu0 %v237_v35  ;;  %v288_v62 = vld [vmem:[%s4244_s20 + $0x220] sm:$0xff]  ;;  %v287_v0 = vld [vmem:[%s4244_s20 + $0x218] sm:$0xff]  ;;  %v286_v2 = vld [vmem:[%s4244_s20 + $0x210] sm:$0xff] }
  0x33   :  { %445 = vmatprep.subr.mxu1 %v301_v36  ;;  %375 = vmatpush1.msra.mxu0 %v236_v37  ;;  %v221_v3 = vld [vmem:[%s4244_s20 + $0x8] sm:$0xff]  ;;  %v220_v5 = vld [vmem:[%s4244_s20] sm:$0xff]  ;;  %v283_v7 = vld [vmem:[%s4244_s20 + $0x1f8] sm:$0xff] }
  0x34   :  { %446 = vmatpush1.msra.mxu1 %v300_v38  ;;  %376 = vmatprep.subr.mxu0 %v235_v39  ;;  %v285_v4 = vld [vmem:[%s4244_s20 + $0x208] sm:$0xff]  ;;  %v284_v6 = vld [vmem:[%s4244_s20 + $0x200] sm:$0xff]  ;;  %v347_v8 = vld [vmem:[%s4244_s20 + $0x3f8] sm:$0xff] }
  0x35   :  { %447 = vmatprep.subr.mxu1 %v299_v40  ;;  %377 = vmatpush1.msra.mxu0 %v234_v41  ;;  %v282_v9 = vld [vmem:[%s4244_s20 + $0x1f0] sm:$0xff]  ;;  %v281_v11 = vld [vmem:[%s4244_s20 + $0x1e8] sm:$0xff]  ;;  %v280_v13 = vld [vmem:[%s4244_s20 + $0x1e0] sm:$0xff] }
  0x36   :  { %448 = vmatpush1.msra.mxu1 %v298_v42  ;;  %378 = vmatprep.subr.mxu0 %v233_v43  ;;  %v346_v10 = vld [vmem:[%s4244_s20 + $0x3f0] sm:$0xff]  ;;  %v345_v12 = vld [vmem:[%s4244_s20 + $0x3e8] sm:$0xff]  ;;  %v344_v14 = vld [vmem:[%s4244_s20 + $0x3e0] sm:$0xff] }
  0x37   :  { %449 = vmatprep.subr.mxu1 %v297_v44  ;;  %379 = vmatpush1.msra.mxu0 %v232_v45  ;;  %v279_v15 = vld [vmem:[%s4244_s20 + $0x1d8] sm:$0xff]  ;;  %v278_v17 = vld [vmem:[%s4244_s20 + $0x1d0] sm:$0xff]  ;;  %v277_v19 = vld [vmem:[%s4244_s20 + $0x1c8] sm:$0xff] }
  0x38   :  { %450 = vmatpush1.msra.mxu1 %v296_v46  ;;  %380 = vmatprep.subr.mxu0 %v231_v47  ;;  %v343_v16 = vld [vmem:[%s4244_s20 + $0x3d8] sm:$0xff]  ;;  %v342_v18 = vld [vmem:[%s4244_s20 + $0x3d0] sm:$0xff]  ;;  %v341_v20 = vld [vmem:[%s4244_s20 + $0x3c8] sm:$0xff] }
  0x39   :  { %451 = vmatprep.subr.mxu1 %v295_v48  ;;  %381 = vmatpush1.msra.mxu0 %v230_v49  ;;  %v276_v21 = vld [vmem:[%s4244_s20 + $0x1c0] sm:$0xff]  ;;  %v275_v23 = vld [vmem:[%s4244_s20 + $0x1b8] sm:$0xff]  ;;  %v274_v25 = vld [vmem:[%s4244_s20 + $0x1b0] sm:$0xff] }
  0x3a   :  { %452 = vmatpush1.msra.mxu1 %v294_v50  ;;  %382 = vmatprep.subr.mxu0 %v229_v51  ;;  %v340_v22 = vld [vmem:[%s4244_s20 + $0x3c0] sm:$0xff]  ;;  %v339_v24 = vld [vmem:[%s4244_s20 + $0x3b8] sm:$0xff]  ;;  %v338_v26 = vld [vmem:[%s4244_s20 + $0x3b0] sm:$0xff] }
  0x3b   :  { %453 = vmatprep.subr.mxu1 %v293_v52  ;;  %383 = vmatpush1.msra.mxu0 %v228_v53  ;;  %v273_v27 = vld [vmem:[%s4244_s20 + $0x1a8] sm:$0xff]  ;;  %v272_v29 = vld [vmem:[%s4244_s20 + $0x1a0] sm:$0xff]  ;;  %v271_v31 = vld [vmem:[%s4244_s20 + $0x198] sm:$0xff] }
  0x3c   :  { %454 = vmatpush1.msra.mxu1 %v292_v54  ;;  %384 = vmatprep.subr.mxu0 %v227_v55  ;;  %v337_v28 = vld [vmem:[%s4244_s20 + $0x3a8] sm:$0xff]  ;;  %v336_v30 = vld [vmem:[%s4244_s20 + $0x3a0] sm:$0xff]  ;;  %v335_v32 = vld [vmem:[%s4244_s20 + $0x398] sm:$0xff] }
  0x3d   :  { %455 = vmatprep.subr.mxu1 %v291_v56  ;;  %385 = vmatpush1.msra.mxu0 %v226_v57  ;;  %v270_v33 = vld [vmem:[%s4244_s20 + $0x190] sm:$0xff]  ;;  %v269_v35 = vld [vmem:[%s4244_s20 + $0x188] sm:$0xff]  ;;  %v268_v37 = vld [vmem:[%s4244_s20 + $0x180] sm:$0xff] }
  0x3e   :  { %456 = vmatpush1.msra.mxu1 %v290_v58  ;;  %386 = vmatprep.subr.mxu0 %v225_v59  ;;  %v334_v34 = vld [vmem:[%s4244_s20 + $0x390] sm:$0xff]  ;;  %v333_v36 = vld [vmem:[%s4244_s20 + $0x388] sm:$0xff]  ;;  %v332_v38 = vld [vmem:[%s4244_s20 + $0x380] sm:$0xff] }
  0x3f   :  { %457 = vmatprep.subr.mxu1 %v289_v60  ;;  %387 = vmatpush1.msra.mxu0 %v224_v61  ;;  %v267_v39 = vld [vmem:[%s4244_s20 + $0x178] sm:$0xff]  ;;  %v266_v41 = vld [vmem:[%s4244_s20 + $0x170] sm:$0xff]  ;;  %v265_v43 = vld [vmem:[%s4244_s20 + $0x168] sm:$0xff] }
  0x40   :  { %458 = vmatpush1.msra.mxu1 %v288_v62  ;;  %388 = vmatprep.subr.mxu0 %v223_v63  ;;  %v331_v40 = vld [vmem:[%s4244_s20 + $0x378] sm:$0xff]  ;;  %v330_v42 = vld [vmem:[%s4244_s20 + $0x370] sm:$0xff]  ;;  %v329_v44 = vld [vmem:[%s4244_s20 + $0x368] sm:$0xff] }
  0x41   :  { %459 = vmatprep.subr.mxu1 %v287_v0  ;;  %389 = vmatpush1.msra.mxu0 %v222_v1  ;;  %v264_v45 = vld [vmem:[%s4244_s20 + $0x160] sm:$0xff]  ;;  %v263_v47 = vld [vmem:[%s4244_s20 + $0x158] sm:$0xff]  ;;  %v262_v49 = vld [vmem:[%s4244_s20 + $0x150] sm:$0xff] }
  0x42   :  { %460 = vmatpush1.msra.mxu1 %v286_v2  ;;  %390 = vmatprep.subr.mxu0 %v221_v3  ;;  %v328_v46 = vld [vmem:[%s4244_s20 + $0x360] sm:$0xff]  ;;  %v327_v48 = vld [vmem:[%s4244_s20 + $0x358] sm:$0xff]  ;;  %v326_v50 = vld [vmem:[%s4244_s20 + $0x350] sm:$0xff] }
  0x43   :  { %461 = vmatprep.subr.mxu1 %v285_v4  ;;  %391 = vmatpush1.msra.mxu0 %v220_v5  ;;  %v261_v51 = vld [vmem:[%s4244_s20 + $0x148] sm:$0xff]  ;;  %v260_v53 = vld [vmem:[%s4244_s20 + $0x140] sm:$0xff]  ;;  %v259_v55 = vld [vmem:[%s4244_s20 + $0x138] sm:$0xff] }
  0x44   :  { %462 = vmatpush1.msra.mxu1 %v284_v6  ;;  %392 = vmatprep.subr.mxu0 %v283_v7  ;;  %v325_v52 = vld [vmem:[%s4244_s20 + $0x348] sm:$0xff]  ;;  %v324_v54 = vld [vmem:[%s4244_s20 + $0x340] sm:$0xff]  ;;  %v323_v56 = vld [vmem:[%s4244_s20 + $0x338] sm:$0xff] }
  0x45   :  { %463 = vmatprep.subr.mxu1 %v347_v8  ;;  %393 = vmatpush2.msra.mxu0 %v282_v9  ;;  %v258_v57 = vld [vmem:[%s4244_s20 + $0x130] sm:$0xff]  ;;  %v257_v59 = vld [vmem:[%s4244_s20 + $0x128] sm:$0xff]  ;;  %v256_v61 = vld [vmem:[%s4244_s20 + $0x120] sm:$0xff]  ;;  %v97_v9 = vlaneseq }
  0x46   :  { %464 = vmatpush2.msra.mxu1 %v346_v10  ;;  %394 = vmatprep.subr.mxu0 %v281_v11  ;;  %v322_v58 = vld [vmem:[%s4244_s20 + $0x330] sm:$0xff]  ;;  %v321_v60 = vld [vmem:[%s4244_s20 + $0x328] sm:$0xff]  ;;  %v320_v62 = vld [vmem:[%s4244_s20 + $0x320] sm:$0xff] }
  0x47   :  { %465 = vmatprep.subr.mxu1 %v345_v12  ;;  %395 = vmatpush2.msra.mxu0 %v280_v13  ;;  %v255_v63 = vld [vmem:[%s4244_s20 + $0x118] sm:$0xff]  ;;  %v254_v1 = vld [vmem:[%s4244_s20 + $0x110] sm:$0xff]  ;;  %v253_v3 = vld [vmem:[%s4244_s20 + $0x108] sm:$0xff]  ;;  %v3012_v10 = vshrl.u32 %v97_v9, 7 }
  0x48   :  { %466 = vmatpush2.msra.mxu1 %v344_v14  ;;  %396 = vmatprep.subr.mxu0 %v279_v15  ;;  %v319_v0 = vld [vmem:[%s4244_s20 + $0x318] sm:$0xff]  ;;  %v318_v2 = vld [vmem:[%s4244_s20 + $0x310] sm:$0xff]  ;;  %v317_v4 = vld [vmem:[%s4244_s20 + $0x308] sm:$0xff] }
  0x49   :  { %467 = vmatprep.subr.mxu1 %v343_v16  ;;  %397 = vmatpush2.msra.mxu0 %v278_v17  ;;  %v252_v5 = vld [vmem:[%s4244_s20 + $0x100] sm:$0xff]  ;;  %v663_v7 = vld [vmem:[%s4245_s28 + $0xf8] sm:$0xff]  ;;  %v3015_v11 = vsub.s32 0, %v3012_v10  ;;  %v3018_v12 = vsub.s32 1, %v3012_v10  ;;  %v3021_v13 = vsub.s32 2, %v3012_v10  ;;  %v3024_v14 = vsub.s32 3, %v3012_v10 }
  0x4a   :  { %468 = vmatpush2.msra.mxu1 %v342_v18  ;;  %398 = vmatprep.subr.mxu0 %v277_v19  ;;  %v316_v6 = vld [vmem:[%s4244_s20 + $0x300] sm:$0xff]  ;;  %v727_v8 = vld [vmem:[%s4245_s28 + $0x2f8] sm:$0xff] }
  0x4b   :  { %469 = vmatprep.subr.mxu1 %v341_v20  ;;  %399 = vmatpush2.msra.mxu0 %v276_v21  ;;  %v90_v15 = vld [vmem:[%s4246_s4] ss:$4 sm:$0xf]  ;;  %v2234_v21 = vld [vmem:[%s4246_s4 + $0x2] ss:$4 sm:$0xf] }
  0x4c   :  { %470 = vmatpush2.msra.mxu1 %v340_v22  ;;  %400 = vmatprep.subr.mxu0 %v275_v23  ;;  %v89_v16 = vld [vmem:[%s4247_s25] sm:$0xf]  ;;  %v100_v17 = vrot.slane %v90_v15, %v3015_v11  ;;  %v104_v18 = vrot.slane %v90_v15, %v3018_v12  ;;  %v108_v19 = vrot.slane %v90_v15, %v3021_v13 }
  0x4d   :  { %471 = vmatprep.subr.mxu1 %v339_v24  ;;  %401 = vmatpush2.msra.mxu0 %v274_v25  ;;  %v112_v20 = vrot.slane %v90_v15, %v3024_v14  ;;  %v125_v22 = vrot.slane %v89_v16, %v3015_v11  ;;  %v133_v23 = vrot.slane %v89_v16, %v3021_v13  ;;  %v2233_v24 = vld [vmem:[%s4246_s4 + $0x1] ss:$4 sm:$0xf]  ;;  %v723_v15 = vld [vmem:[%s4245_s28 + $0x2d8] sm:$0xff] }
  0x4e   :  { %472 = vmatpush2.msra.mxu1 %v338_v26  ;;  %402 = vmatprep.subr.mxu0 %v273_v27  ;;  %v129_v25 = vrot.slane %v89_v16, %v3018_v12  ;;  %v137_v26 = vrot.slane %v89_v16, %v3024_v14  ;;  %v658_v16 = vld [vmem:[%s4245_s28 + $0xd0] sm:$0xff] }
  0x4f   :  { %473 = vmatprep.subr.mxu1 %v337_v28  ;;  %403 = vmatpush2.msra.mxu0 %v272_v29  ;;  %v191_v28 = vrot.slane %v2234_v21, %v3015_v11  ;;  %v199_v29 = vrot.slane %v2234_v21, %v3021_v13 }
  0x50   :  { %474 = vmatpush2.msra.mxu1 %v336_v30  ;;  %404 = vmatprep.subr.mxu0 %v271_v31  ;;  %v195_v30 = vrot.slane %v2234_v21, %v3018_v12  ;;  %v203_v31 = vrot.slane %v2234_v21, %v3024_v14  ;;  %v720_v21 = vld [vmem:[%s4245_s28 + $0x2c0] sm:$0xff] }
  0x51   :  { %475 = vmatprep.subr.mxu1 %v335_v32  ;;  %405 = vmatpush2.msra.mxu0 %v270_v33 }
  0x52   :  { %476 = vmatpush2.msra.mxu1 %v334_v34  ;;  %406 = vmatprep.subr.mxu0 %v269_v35 }
  0x53   :  { %477 = vmatprep.subr.mxu1 %v333_v36  ;;  %407 = vmatpush2.msra.mxu0 %v268_v37  ;;  %v156_v37 = vrot.slane %v2233_v24, %v3015_v11 }
  0x54   :  { %478 = vmatpush2.msra.mxu1 %v332_v38  ;;  %408 = vmatprep.subr.mxu0 %v267_v39  ;;  %v164_v38 = vrot.slane %v2233_v24, %v3021_v13  ;;  %v160_v39 = vrot.slane %v2233_v24, %v3018_v12 }
  0x55   :  { %479 = vmatprep.subr.mxu1 %v331_v40  ;;  %409 = vmatpush2.msra.mxu0 %v266_v41  ;;  %v168_v40 = vrot.slane %v2233_v24, %v3024_v14  ;;  %v654_v24 = vld [vmem:[%s4245_s28 + $0xb0] sm:$0xff] }
  0x56   :  { %480 = vmatpush2.msra.mxu1 %v330_v42  ;;  %410 = vmatprep.subr.mxu0 %v265_v43 }
  0x57   :  { %481 = vmatprep.subr.mxu1 %v329_v44  ;;  %411 = vmatpush2.msra.mxu0 %v264_v45 }
  0x58   :  { %482 = vmatpush2.msra.mxu1 %v328_v46  ;;  %412 = vmatprep.subr.mxu0 %v263_v47 }
  0x59   :  { %483 = vmatprep.subr.mxu1 %v327_v48  ;;  %413 = vmatpush2.msra.mxu0 %v262_v49 }
  0x5a   :  { %484 = vmatpush2.msra.mxu1 %v326_v50  ;;  %414 = vmatprep.subr.mxu0 %v261_v51 }
  0x5b   :  { %485 = vmatprep.subr.mxu1 %v325_v52  ;;  %415 = vmatpush2.msra.mxu0 %v260_v53 }
  0x5c   :  { %486 = vmatpush2.msra.mxu1 %v324_v54  ;;  %416 = vmatprep.subr.mxu0 %v259_v55 }
  0x5d   :  { %487 = vmatprep.subr.mxu1 %v323_v56  ;;  %417 = vmatpush2.msra.mxu0 %v258_v57 }
  0x5e   :  { %488 = vmatpush2.msra.mxu1 %v322_v58  ;;  %418 = vmatprep.subr.mxu0 %v257_v59 }
  0x5f   :  { %489 = vmatprep.subr.mxu1 %v321_v60  ;;  %419 = vmatpush2.msra.mxu0 %v256_v61 }
  0x60   :  { %490 = vmatpush2.msra.mxu1 %v320_v62  ;;  %420 = vmatprep.subr.mxu0 %v255_v63 }
  0x61   :  { %491 = vmatprep.subr.mxu1 %v319_v0  ;;  %421 = vmatpush2.msra.mxu0 %v254_v1 }
  0x62   :  { %492 = vmatpush2.msra.mxu1 %v318_v2  ;;  %422 = vmatprep.subr.mxu0 %v253_v3  ;;  %v662_v2 = vld [vmem:[%s4245_s28 + $0xf0] sm:$0xff] }
  0x63   :  { %493 = vmatprep.subr.mxu1 %v317_v4  ;;  %423 = vmatpush2.msra.mxu0 %v252_v5  ;;  %v726_v3 = vld [vmem:[%s4245_s28 + $0x2f0] sm:$0xff]  ;;  %v661_v4 = vld [vmem:[%s4245_s28 + $0xe8] sm:$0xff] }
  0x64   :  { %494 = vmatpush2.msra.mxu1 %v316_v6  ;;  %772 = vmatprep.subr.mxu0 %v663_v7  ;;  %v725_v5 = vld [vmem:[%s4245_s28 + $0x2e8] sm:$0xff]  ;;  %v660_v6 = vld [vmem:[%s4245_s28 + $0xe0] sm:$0xff] }
  0x65   :  { %843 = vmatprep.subr.mxu1 %v727_v8  ;;  %v724_v7 = vld [vmem:[%s4245_s28 + $0x2e0] sm:$0xff]  ;;  %v659_v8 = vld [vmem:[%s4245_s28 + $0xd8] sm:$0xff] }
  0x9a   :  { %v94_v27 = vpop.permute.xlu0 %93  ;;  %v185_v36 = vpop.permute.xlu1 %184 }
  0x9b   :  { %v117_v32 = vmul.f32 %v100_v17, %v94_v27  ;;  %v118_v33 = vmul.f32 %v104_v18, %v94_v27  ;;  %v119_v34 = vmul.f32 %v108_v19, %v94_v27  ;;  %v120_v35 = vmul.f32 %v112_v20, %v94_v27  ;;  %v722_v17 = vld [vmem:[%s4245_s28 + $0x2d0] sm:$0xff]  ;;  %v657_v18 = vld [vmem:[%s4245_s28 + $0xc8] sm:$0xff]  ;;  %v656_v20 = vld [vmem:[%s4245_s28 + $0xc0] sm:$0xff] }
  0x9c   :  { %v208_v41 = vmul.f32 %v191_v28, %v185_v36  ;;  %v210_v42 = vmul.f32 %v199_v29, %v185_v36  ;;  %v209_v43 = vmul.f32 %v195_v30, %v185_v36  ;;  %v211_v44 = vmul.f32 %v203_v31, %v185_v36  ;;  %v721_v19 = vld [vmem:[%s4245_s28 + $0x2c8] sm:$0xff]  ;;  %v652_v28 = vld [vmem:[%s4245_s28 + $0xa0] sm:$0xff]  ;;  %v651_v30 = vld [vmem:[%s4245_s28 + $0x98] sm:$0xff] }
  0x9d   :  { %v142_v45 = vadd.f32 %v125_v22, %v117_v32  ;;  %v144_v46 = vadd.f32 %v133_v23, %v119_v34  ;;  %v143_v48 = vadd.f32 %v129_v25, %v118_v33  ;;  %v145_v49 = vadd.f32 %v137_v26, %v120_v35  ;;  %v655_v22 = vld [vmem:[%s4245_s28 + $0xb8] sm:$0xff]  ;;  %v718_v25 = vld [vmem:[%s4245_s28 + $0x2b0] sm:$0xff]  ;;  %v653_v26 = vld [vmem:[%s4245_s28 + $0xa8] sm:$0xff] }
  0x9e   :  { %v719_v23 = vld [vmem:[%s4245_s28 + $0x2b8] sm:$0xff]  ;;  %v717_v27 = vld [vmem:[%s4245_s28 + $0x2a8] sm:$0xff]  ;;  %v716_v29 = vld [vmem:[%s4245_s28 + $0x2a0] sm:$0xff] }
  0x9f   :  { %v150_v47 = vpop.permute.xlu0 %149  ;;  %v715_v31 = vld [vmem:[%s4245_s28 + $0x298] sm:$0xff]  ;;  %v650_v32 = vld [vmem:[%s4245_s28 + $0x90] sm:$0xff]  ;;  %v649_v34 = vld [vmem:[%s4245_s28 + $0x88] sm:$0xff] }
  0xa0   :  { %v173_v50 = vmul.f32 %v156_v37, %v150_v47  ;;  %v175_v51 = vmul.f32 %v164_v38, %v150_v47  ;;  %v174_v52 = vmul.f32 %v160_v39, %v150_v47  ;;  %v176_v53 = vmul.f32 %v168_v40, %v150_v47  ;;  %v714_v33 = vld [vmem:[%s4245_s28 + $0x290] sm:$0xff]  ;;  %v713_v35 = vld [vmem:[%s4245_s28 + $0x288] sm:$0xff]  ;;  %v648_v36 = vld [vmem:[%s4245_s28 + $0x80] sm:$0xff] }
  0xa1   :  { %v712_v37 = vld [vmem:[%s4245_s28 + $0x280] sm:$0xff]  ;;  %v647_v38 = vld [vmem:[%s4245_s28 + $0x78] sm:$0xff]  ;;  %v646_v40 = vld [vmem:[%s4245_s28 + $0x70] sm:$0xff] }
  0xa2   :  { %v178_v54 = vadd.f32 %v174_v52, %v143_v48  ;;  %v180_v55 = vadd.f32 %v176_v53, %v145_v49  ;;  %v177_v56 = vadd.f32 %v173_v50, %v142_v45  ;;  %v179_v57 = vadd.f32 %v175_v51, %v144_v46  ;;  %v711_v39 = vld [vmem:[%s4245_s28 + $0x278] sm:$0xff]  ;;  %v708_v45 = vld [vmem:[%s4245_s28 + $0x260] sm:$0xff]  ;;  %v642_v48 = vld [vmem:[%s4245_s28 + $0x50] sm:$0xff] }
  0xa3   :  { %v643_v46 = vld [vmem:[%s4245_s28 + $0x58] sm:$0xff]  ;;  %v706_v49 = vld [vmem:[%s4245_s28 + $0x250] sm:$0xff]  ;;  %v641_v50 = vld [vmem:[%s4245_s28 + $0x48] sm:$0xff] }
  0xa4   :  { %v213_v58 = vadd.f32 %v209_v43, %v178_v54  ;;  %v215_v59 = vadd.f32 %v211_v44, %v180_v55  ;;  %v212_v60 = vadd.f32 %v208_v41, %v177_v56  ;;  %v214_v61 = vadd.f32 %v210_v42, %v179_v57  ;;  %v710_v41 = vld [vmem:[%s4245_s28 + $0x270] sm:$0xff]  ;;  %v645_v42 = vld [vmem:[%s4245_s28 + $0x68] sm:$0xff]  ;;  %v644_v44 = vld [vmem:[%s4245_s28 + $0x60] sm:$0xff] }
  0xa5   :  { %v709_v43 = vld [vmem:[%s4245_s28 + $0x268] sm:$0xff]  ;;  %v707_v47 = vld [vmem:[%s4245_s28 + $0x258] sm:$0xff]  ;;  %v640_v52 = vld [vmem:[%s4245_s28 + $0x40] sm:$0xff] }
  0xa6   :  { %v217_v62 = vmax.f32 %v213_v58, 0.0  ;;  %v219_v63 = vmax.f32 %v215_v59, 0.0  ;;  %v216_v0 = vmax.f32 %v212_v60, 0.0  ;;  %v218_v1 = vmax.f32 %v214_v61, 0.0  ;;  %v705_v51 = vld [vmem:[%s4245_s28 + $0x248] sm:$0xff]  ;;  %v704_v53 = vld [vmem:[%s4245_s28 + $0x240] sm:$0xff] }
  0xa7   :  { %v639_v54 = vld [vmem:[%s4245_s28 + $0x38] sm:$0xff]  ;;  %v638_v56 = vld [vmem:[%s4245_s28 + $0x30] sm:$0xff]  ;;  %v637_v58 = vld [vmem:[%s4245_s28 + $0x28] sm:$0xff] }
  0xa8   :  { %424 = vmatprep.mubr.f32.mxu0 %v217_v62  ;;  %495 = vmatprep.mubr.f32.mxu1 %v219_v63  ;;  %v703_v55 = vld [vmem:[%s4245_s28 + $0x238] sm:$0xff]  ;;  %v702_v57 = vld [vmem:[%s4245_s28 + $0x230] sm:$0xff]  ;;  %v701_v59 = vld [vmem:[%s4245_s28 + $0x228] sm:$0xff] }
  0xa9   :  { %425 = vmatmul.mubr.f32.vlgmr.msra.gmra.mxu0 %v216_v0  ;;  %496 = vmatmul.mubr.f32.vlgmr.msra.gmra.mxu1 %v218_v1  ;;  %v636_v60 = vld [vmem:[%s4245_s28 + $0x20] sm:$0xff]  ;;  %v635_v62 = vld [vmem:[%s4245_s28 + $0x18] sm:$0xff]  ;;  %v634_v0 = vld [vmem:[%s4245_s28 + $0x10] sm:$0xff] }
  0xaa   :  { %773 = vmatpush1.msra.mxu0 %v662_v2  ;;  %844 = vmatpush1.msra.mxu1 %v726_v3  ;;  %v700_v61 = vld [vmem:[%s4245_s28 + $0x220] sm:$0xff]  ;;  %v699_v63 = vld [vmem:[%s4245_s28 + $0x218] sm:$0xff]  ;;  %v698_v1 = vld [vmem:[%s4245_s28 + $0x210] sm:$0xff] }
  0xab   :  { %774 = vmatprep.subr.mxu0 %v661_v4  ;;  %845 = vmatprep.subr.mxu1 %v725_v5  ;;  %v633_v2 = vld [vmem:[%s4245_s28 + $0x8] sm:$0xff]  ;;  %v632_v4 = vld [vmem:[%s4245_s28] sm:$0xff] }
  0xac   :  { %775 = vmatpush1.msra.mxu0 %v660_v6  ;;  %846 = vmatpush1.msra.mxu1 %v724_v7  ;;  %v697_v3 = vld [vmem:[%s4245_s28 + $0x208] sm:$0xff]  ;;  %v696_v5 = vld [vmem:[%s4245_s28 + $0x200] sm:$0xff]  ;;  %v695_v6 = vld [vmem:[%s4245_s28 + $0x1f8] sm:$0xff] }
  0xad   :  { %776 = vmatprep.subr.mxu0 %v659_v8  ;;  %847 = vmatprep.subr.mxu1 %v723_v15  ;;  %v759_v7 = vld [vmem:[%s4245_s28 + $0x3f8] sm:$0xff]  ;;  %v694_v8 = vld [vmem:[%s4245_s28 + $0x1f0] sm:$0xff] }
  0xae   :  { %777 = vmatpush1.msra.mxu0 %v658_v16  ;;  %848 = vmatpush1.msra.mxu1 %v722_v17  ;;  %v758_v15 = vld [vmem:[%s4245_s28 + $0x3f0] sm:$0xff]  ;;  %v693_v16 = vld [vmem:[%s4245_s28 + $0x1e8] sm:$0xff] }
  0xaf   :  { %778 = vmatprep.subr.mxu0 %v657_v18  ;;  %849 = vmatprep.subr.mxu1 %v721_v19  ;;  %v757_v17 = vld [vmem:[%s4245_s28 + $0x3e8] sm:$0xff]  ;;  %v692_v18 = vld [vmem:[%s4245_s28 + $0x1e0] sm:$0xff] }
  0xb0   :  { %779 = vmatpush1.msra.mxu0 %v656_v20  ;;  %850 = vmatpush1.msra.mxu1 %v720_v21  ;;  %v756_v19 = vld [vmem:[%s4245_s28 + $0x3e0] sm:$0xff]  ;;  %v691_v20 = vld [vmem:[%s4245_s28 + $0x1d8] sm:$0xff] }
  0xb1   :  { %780 = vmatprep.subr.mxu0 %v655_v22  ;;  %851 = vmatprep.subr.mxu1 %v719_v23  ;;  %v755_v21 = vld [vmem:[%s4245_s28 + $0x3d8] sm:$0xff]  ;;  %v3273_v22 = vld [vmem:[%s4248_s5] ss:$4 sm:$0xf]  ;;  %v690_v23 = vld [vmem:[%s4245_s28 + $0x1d0] sm:$0xff] }
  0xb2   :  { %781 = vmatpush1.msra.mxu0 %v654_v24  ;;  %852 = vmatpush1.msra.mxu1 %v718_v25  ;;  %v754_v24 = vld [vmem:[%s4245_s28 + $0x3d0] sm:$0xff]  ;;  %v689_v25 = vld [vmem:[%s4245_s28 + $0x1c8] sm:$0xff] }
  0xb3   :  { %782 = vmatprep.subr.mxu0 %v653_v26  ;;  %853 = vmatprep.subr.mxu1 %v717_v27  ;;  %v753_v26 = vld [vmem:[%s4245_s28 + $0x3c8] sm:$0xff]  ;;  %v3287_v27 = vpop.permute.xlu1 %505 }
  0xb4   :  { %783 = vmatpush1.msra.mxu0 %v652_v28  ;;  %854 = vmatpush1.msra.mxu1 %v716_v29  ;;  %v688_v28 = vld [vmem:[%s4245_s28 + $0x1c0] sm:$0xff] }
  0xb5   :  { %784 = vmatprep.subr.mxu0 %v651_v30  ;;  %855 = vmatprep.subr.mxu1 %v715_v31  ;;  %v752_v29 = vld [vmem:[%s4245_s28 + $0x3c0] sm:$0xff]  ;;  %v687_v30 = vld [vmem:[%s4245_s28 + $0x1b8] sm:$0xff]  ;;  %v516_v31 = vrot.slane %v3273_v22, %v3018_v12 }
  0xb6   :  { %785 = vmatpush1.msra.mxu0 %v650_v32  ;;  %856 = vmatpush1.msra.mxu1 %v714_v33  ;;  %v751_v32 = vld [vmem:[%s4245_s28 + $0x3b8] sm:$0xff]  ;;  %v3306_v33 = vld [vmem:[%s4249_s27] sm:$0xf]  ;;  %s2261_s27 = sld [smem:[#allocation3 + $0x1]] }
  0xb7   :  { %786 = vmatprep.subr.mxu0 %v649_v34  ;;  %857 = vmatprep.subr.mxu1 %v713_v35  ;;  %v524_v34 = vrot.slane %v3273_v22, %v3024_v14  ;;  %v3313_v35 = vld [vmem:[%s4248_s5 + $0x1] ss:$4 sm:$0xf] }
  0xb8   :  { %787 = vmatpush1.msra.mxu0 %v648_v36  ;;  %858 = vmatpush1.msra.mxu1 %v712_v37  ;;  %v686_v36 = vld [vmem:[%s4245_s28 + $0x1b0] sm:$0xff] }
  0xb9   :  { %788 = vmatprep.subr.mxu0 %v647_v38  ;;  %859 = vmatprep.subr.mxu1 %v711_v39  ;;  %v750_v37 = vld [vmem:[%s4245_s28 + $0x3b0] sm:$0xff]  ;;  %v685_v38 = vld [vmem:[%s4245_s28 + $0x1a8] sm:$0xff] }
  0xba   :  { %789 = vmatpush1.msra.mxu0 %v646_v40  ;;  %860 = vmatpush1.msra.mxu1 %v710_v41  ;;  %v749_v39 = vld [vmem:[%s4245_s28 + $0x3a8] sm:$0xff]  ;;  %v684_v40 = vld [vmem:[%s4245_s28 + $0x1a0] sm:$0xff] }
  0xbb   :  { %790 = vmatprep.subr.mxu0 %v645_v42  ;;  %861 = vmatprep.subr.mxu1 %v709_v43  ;;  %v748_v41 = vld [vmem:[%s4245_s28 + $0x3a0] sm:$0xff]  ;;  %v541_v42 = vrot.slane %v3306_v33, %v3018_v12  ;;  %v530_v43 = vmul.f32 %v516_v31, %v3287_v27  ;;  %v738_v31 = vld [vmem:[%s4245_s28 + $0x350] sm:$0xff] }
  0xbc   :  { %791 = vmatpush1.msra.mxu0 %v644_v44  ;;  %862 = vmatpush1.msra.mxu1 %v708_v45  ;;  %v572_v44 = vrot.slane %v3313_v35, %v3018_v12  ;;  %v683_v45 = vld [vmem:[%s4245_s28 + $0x198] sm:$0xff]  ;;  %s4179_s3 = smax.f32 %s2493_s7, %s2261_s27 }
  0xbd   :  { %792 = vmatprep.subr.mxu0 %v643_v46  ;;  %863 = vmatprep.subr.mxu1 %v707_v47  ;;  %v747_v46 = vld [vmem:[%s4245_s28 + $0x398] sm:$0xff]  ;;  %v549_v47 = vrot.slane %v3306_v33, %v3024_v14  ;;  %s2111_s20 = sadd.f32 %s4179_s3, %s4177_s29 }
  0xbe   :  { %793 = vmatpush1.msra.mxu0 %v642_v48  ;;  %864 = vmatpush1.msra.mxu1 %v706_v49  ;;  %v532_v48 = vmul.f32 %v524_v34, %v3287_v27  ;;  %v580_v49 = vrot.slane %v3313_v35, %v3024_v14 }
  0xbf   :  { %794 = vmatprep.subr.mxu0 %v641_v50  ;;  %865 = vmatprep.subr.mxu1 %v705_v51  ;;  %v562_v50 = vpop.permute.xlu1 %561  ;;  %v3352_v51 = vld [vmem:[%s4248_s5 + $0x2] ss:$4 sm:$0xf]  ;;  %s2112_s0 = sadd.f32 0.0001, %s2111_s20 }
  0xc0   :  { %795 = vmatpush1.msra.mxu0 %v640_v52  ;;  %866 = vmatpush1.msra.mxu1 %v704_v53  ;;  %v682_v52 = vld [vmem:[%s4245_s28 + $0x190] sm:$0xff] }
  0xc1   :  { %796 = vmatprep.subr.mxu0 %v639_v54  ;;  %867 = vmatprep.subr.mxu1 %v703_v55  ;;  %v746_v53 = vld [vmem:[%s4245_s28 + $0x390] sm:$0xff]  ;;  %v512_v54 = vrot.slane %v3273_v22, %v3015_v11  ;;  %v681_v55 = vld [vmem:[%s4245_s28 + $0x188] sm:$0xff] }
  0xc2   :  { %797 = vmatpush1.msra.mxu0 %v638_v56  ;;  %868 = vmatpush1.msra.mxu1 %v702_v57  ;;  %v745_v56 = vld [vmem:[%s4245_s28 + $0x388] sm:$0xff]  ;;  %v520_v57 = vrot.slane %v3273_v22, %v3021_v13 }
  0xc3   :  { %798 = vmatprep.subr.mxu0 %v637_v58  ;;  %869 = vmatprep.subr.mxu1 %v701_v59  ;;  %v555_v58 = vadd.f32 %v541_v42, %v530_v43  ;;  %v680_v59 = vld [vmem:[%s4245_s28 + $0x180] sm:$0xff] }
  0xc4   :  { %799 = vmatpush1.msra.mxu0 %v636_v60  ;;  %870 = vmatpush1.msra.mxu1 %v700_v61  ;;  %v744_v60 = vld [vmem:[%s4245_s28 + $0x380] sm:$0xff]  ;;  %v586_v61 = vmul.f32 %v572_v44, %v562_v50  ;;  %v670_v44 = vld [vmem:[%s4245_s28 + $0x130] sm:$0xff] }
  0xc5   :  { %800 = vmatprep.subr.mxu0 %v635_v62  ;;  %871 = vmatprep.subr.mxu1 %v699_v63  ;;  %v607_v62 = vrot.slane %v3352_v51, %v3018_v12  ;;  %v557_v63 = vadd.f32 %v549_v47, %v532_v48 }
  0xc6   :  { %801 = vmatpush1.msra.mxu0 %v634_v0  ;;  %872 = vmatpush1.msra.mxu1 %v698_v1  ;;  %v679_v0 = vld [vmem:[%s4245_s28 + $0x178] sm:$0xff] }
  0xc7   :  { %802 = vmatprep.subr.mxu0 %v633_v2  ;;  %873 = vmatprep.subr.mxu1 %v697_v3  ;;  %v743_v1 = vld [vmem:[%s4245_s28 + $0x378] sm:$0xff]  ;;  %v588_v2 = vmul.f32 %v580_v49, %v562_v50  ;;  %v615_v3 = vrot.slane %v3352_v51, %v3024_v14  ;;  %v545_v14 = vrot.slane %v3306_v33, %v3021_v13  ;;  %v669_v49 = vld [vmem:[%s4245_s28 + $0x128] sm:$0xff] }
  0xc8   :  { %803 = vmatpush1.msra.mxu0 %v632_v4  ;;  %874 = vmatpush1.msra.mxu1 %v696_v5  ;;  %v597_v4 = vpop.permute.xlu0 %596  ;;  %v537_v5 = vrot.slane %v3306_v33, %v3015_v11 }
  0xc9   :  { %804 = vmatprep.subr.mxu0 %v695_v6  ;;  %875 = vmatprep.subr.mxu1 %v759_v7  ;;  %v529_v6 = vmul.f32 %v512_v54, %v3287_v27  ;;  %v678_v7 = vld [vmem:[%s4245_s28 + $0x170] sm:$0xff]  ;;  %v621_v22 = vmul.f32 %v607_v62, %v597_v4  ;;  %v667_v54 = vld [vmem:[%s4245_s28 + $0x118] sm:$0xff]  ;;  %v729_v62 = vld [vmem:[%s4245_s28 + $0x308] sm:$0xff] }
  0xca   :  { %805 = vmatpush2.msra.mxu0 %v694_v8  ;;  %876 = vmatpush2.msra.mxu1 %v758_v15  ;;  %v742_v8 = vld [vmem:[%s4245_s28 + $0x370] sm:$0xff]  ;;  %v568_v15 = vrot.slane %v3313_v35, %v3015_v11 }
  0xcb   :  { %806 = vmatprep.subr.mxu0 %v693_v16  ;;  %877 = vmatprep.subr.mxu1 %v757_v17  ;;  %v531_v16 = vmul.f32 %v520_v57, %v3287_v27  ;;  %v677_v17 = vld [vmem:[%s4245_s28 + $0x168] sm:$0xff]  ;;  %v592_v27 = vadd.f32 %v588_v2, %v557_v63  ;;  %v664_v63 = vld [vmem:[%s4245_s28 + $0x100] sm:$0xff] }
  0xcc   :  { %807 = vmatpush2.msra.mxu0 %v692_v18  ;;  %878 = vmatpush2.msra.mxu1 %v756_v19  ;;  %v741_v18 = vld [vmem:[%s4245_s28 + $0x368] sm:$0xff]  ;;  %v576_v19 = vrot.slane %v3313_v35, %v3021_v13  ;;  %v611_v35 = vrot.slane %v3352_v51, %v3021_v13  ;;  %v671_v13 = vld [vmem:[%s4245_s28 + $0x138] sm:$0xff] }
  0xcd   :  { %808 = vmatprep.subr.mxu0 %v691_v20  ;;  %879 = vmatprep.subr.mxu1 %v755_v21  ;;  %v676_v20 = vld [vmem:[%s4245_s28 + $0x160] sm:$0xff]  ;;  %v556_v33 = vadd.f32 %v545_v14, %v531_v16  ;;  %v937_v16 = vld [vmem:[%s4216_s9 + $0xb8] sm:$0xff] }
  0xce   :  { %809 = vmatpush2.msra.mxu0 %v690_v23  ;;  %880 = vmatpush2.msra.mxu1 %v754_v24  ;;  %v740_v21 = vld [vmem:[%s4245_s28 + $0x360] sm:$0xff]  ;;  %v590_v23 = vadd.f32 %v586_v61, %v555_v58  ;;  %v675_v24 = vld [vmem:[%s4245_s28 + $0x158] sm:$0xff]  ;;  %v587_v34 = vmul.f32 %v576_v19, %v562_v50  ;;  %v622_v48 = vmul.f32 %v611_v35, %v597_v4  ;;  %v665_v61 = vld [vmem:[%s4245_s28 + $0x108] sm:$0xff] }
  0xcf   :  { %810 = vmatprep.subr.mxu0 %v689_v25  ;;  %881 = vmatprep.subr.mxu1 %v753_v26  ;;  %v739_v25 = vld [vmem:[%s4245_s28 + $0x358] sm:$0xff]  ;;  %v623_v26 = vmul.f32 %v615_v3, %v597_v4  ;;  %v938_v14 = vld [vmem:[%s4216_s9 + $0xc0] sm:$0xff]  ;;  %v1008_v19 = vld [vmem:[%s4216_s9 + $0x2f0] sm:$0xff] }
  0xd0   :  { %811 = vmatpush2.msra.mxu0 %v688_v28  ;;  %882 = vmatpush2.msra.mxu1 %v752_v29  ;;  %v554_v28 = vadd.f32 %v537_v5, %v529_v6  ;;  %v585_v29 = vmul.f32 %v568_v15, %v562_v50  ;;  %v733_v50 = vld [vmem:[%s4245_s28 + $0x328] sm:$0xff]  ;;  %v945_v3 = vld [vmem:[%s4216_s9 + $0xf8] sm:$0xff]  ;;  %v942_v6 = vld [vmem:[%s4216_s9 + $0xe0] sm:$0xff] }
  0xd1   :  { %812 = vmatprep.subr.mxu0 %v687_v30  ;;  %883 = vmatprep.subr.mxu1 %v751_v32  ;;  %v674_v30 = vld [vmem:[%s4245_s28 + $0x150] sm:$0xff]  ;;  %v603_v32 = vrot.slane %v3352_v51, %v3015_v11  ;;  %v627_v42 = vadd.f32 %v623_v26, %v592_v27  ;;  %v668_v51 = vld [vmem:[%s4245_s28 + $0x120] sm:$0xff]  ;;  %v943_v5 = vld [vmem:[%s4216_s9 + $0xe8] sm:$0xff] }
  0xd2   :  { %813 = vmatpush2.msra.mxu0 %v686_v36  ;;  %884 = vmatpush2.msra.mxu1 %v750_v37  ;;  %v673_v36 = vld [vmem:[%s4245_s28 + $0x148] sm:$0xff]  ;;  %v589_v43 = vadd.f32 %v585_v29, %v554_v28  ;;  %v933_v26 = vld [vmem:[%s4216_s9 + $0x98] sm:$0xff]  ;;  %v932_v28 = vld [vmem:[%s4216_s9 + $0x90] sm:$0xff] }
  0xd3   :  { %814 = vmatprep.subr.mxu0 %v685_v38  ;;  %885 = vmatprep.subr.mxu1 %v749_v39  ;;  %v737_v37 = vld [vmem:[%s4245_s28 + $0x348] sm:$0xff]  ;;  %v672_v38 = vld [vmem:[%s4245_s28 + $0x140] sm:$0xff]  ;;  %v620_v47 = vmul.f32 %v603_v32, %v597_v4  ;;  %v944_v4 = vld [vmem:[%s4216_s9 + $0xf0] sm:$0xff] }
  0xd4   :  { %815 = vmatpush2.msra.mxu0 %v684_v40  ;;  %886 = vmatpush2.msra.mxu1 %v748_v41  ;;  %v736_v39 = vld [vmem:[%s4245_s28 + $0x340] sm:$0xff]  ;;  %v625_v40 = vadd.f32 %v621_v22, %v590_v23  ;;  %v735_v41 = vld [vmem:[%s4245_s28 + $0x338] sm:$0xff]  ;;  %v939_v15 = vld [vmem:[%s4216_s9 + $0xc8] sm:$0xff] }
  0xd5   :  { %816 = vmatprep.subr.mxu0 %v683_v45  ;;  %887 = vmatprep.subr.mxu1 %v747_v46  ;;  %v734_v45 = vld [vmem:[%s4245_s28 + $0x330] sm:$0xff]  ;;  %v591_v46 = vadd.f32 %v587_v34, %v556_v33  ;;  %v624_v57 = vadd.f32 %v620_v47, %v589_v43  ;;  %v935_v22 = vld [vmem:[%s4216_s9 + $0xa8] sm:$0xff]  ;;  %v1005_v23 = vld [vmem:[%s4216_s9 + $0x2d8] sm:$0xff] }
  0xd6   :  { %817 = vmatpush2.msra.mxu0 %v682_v52  ;;  %888 = vmatpush2.msra.mxu1 %v746_v53  ;;  %v732_v52 = vld [vmem:[%s4245_s28 + $0x320] sm:$0xff]  ;;  %v629_v53 = vmax.f32 %v625_v40, 0.0  ;;  %v1003_v27 = vld [vmem:[%s4216_s9 + $0x2c8] sm:$0xff]  ;;  %v1000_v33 = vld [vmem:[%s4216_s9 + $0x2b0] sm:$0xff] }
  0xd7   :  { %818 = vmatprep.subr.mxu0 %v681_v55  ;;  %889 = vmatprep.subr.mxu1 %v745_v56  ;;  %v631_v55 = vmax.f32 %v627_v42, 0.0  ;;  %v731_v56 = vld [vmem:[%s4245_s28 + $0x318] sm:$0xff]  ;;  %v626_v58 = vadd.f32 %v622_v48, %v591_v46  ;;  %v1002_v29 = vld [vmem:[%s4216_s9 + $0x2c0] sm:$0xff]  ;;  %v999_v35 = vld [vmem:[%s4216_s9 + $0x2a8] sm:$0xff] }
  0xd8   :  { %819 = vmatpush2.msra.mxu0 %v680_v59  ;;  %890 = vmatpush2.msra.mxu1 %v744_v60  ;;  %v666_v59 = vld [vmem:[%s4245_s28 + $0x110] sm:$0xff]  ;;  %v930_v32 = vld [vmem:[%s4216_s9 + $0x80] sm:$0xff]  ;;  %v929_v34 = vld [vmem:[%s4216_s9 + $0x78] sm:$0xff] }
  0xd9   :  { %820 = vmatprep.subr.mxu0 %v679_v0  ;;  %891 = vmatprep.subr.mxu1 %v743_v1  ;;  %v730_v60 = vld [vmem:[%s4245_s28 + $0x310] sm:$0xff]  ;;  %v728_v0 = vld [vmem:[%s4245_s28 + $0x300] sm:$0xff]  ;;  %v628_v1 = vmax.f32 %v624_v57, 0.0  ;;  %v630_v2 = vmax.f32 %v626_v58, 0.0  ;;  %v995_v42 = vld [vmem:[%s4216_s9 + $0x288] sm:$0xff] }
  0xda   :  { %821 = vmatpush2.msra.mxu0 %v678_v7  ;;  %892 = vmatpush2.msra.mxu1 %v742_v8  ;;  %v941_v7 = vld [vmem:[%s4216_s9 + $0xd8] sm:$0xff]  ;;  %v940_v8 = vld [vmem:[%s4216_s9 + $0xd0] sm:$0xff]  ;;  %v926_v40 = vld [vmem:[%s4216_s9 + $0x60] sm:$0xff] }
  0xdb   :  { %822 = vmatprep.subr.mxu0 %v677_v17  ;;  %893 = vmatprep.subr.mxu1 %v741_v18  ;;  %v936_v17 = vld [vmem:[%s4216_s9 + $0xb0] sm:$0xff]  ;;  %v1009_v18 = vld [vmem:[%s4216_s9 + $0x2f8] sm:$0xff]  ;;  %v922_v47 = vld [vmem:[%s4216_s9 + $0x40] sm:$0xff] }
  0xdc   :  { %823 = vmatpush2.msra.mxu0 %v676_v20  ;;  %894 = vmatpush2.msra.mxu1 %v740_v21  ;;  %v1007_v20 = vld [vmem:[%s4216_s9 + $0x2e8] sm:$0xff]  ;;  %v1006_v21 = vld [vmem:[%s4216_s9 + $0x2e0] sm:$0xff]  ;;  %v924_v43 = vld [vmem:[%s4216_s9 + $0x50] sm:$0xff] }
  0xdd   :  { %824 = vmatprep.subr.mxu0 %v675_v24  ;;  %895 = vmatprep.subr.mxu1 %v739_v25  ;;  %v934_v24 = vld [vmem:[%s4216_s9 + $0xa0] sm:$0xff]  ;;  %v1004_v25 = vld [vmem:[%s4216_s9 + $0x2d0] sm:$0xff]  ;;  %v993_v46 = vld [vmem:[%s4216_s9 + $0x278] sm:$0xff] }
  0xde   :  { %825 = vmatpush2.msra.mxu0 %v674_v30  ;;  %896 = vmatpush2.msra.mxu1 %v738_v31  ;;  %v931_v30 = vld [vmem:[%s4216_s9 + $0x88] sm:$0xff]  ;;  %v1001_v31 = vld [vmem:[%s4216_s9 + $0x2b8] sm:$0xff]  ;;  %v992_v48 = vld [vmem:[%s4216_s9 + $0x270] sm:$0xff] }
  0xdf   :  { %826 = vmatprep.subr.mxu0 %v673_v36  ;;  %897 = vmatprep.subr.mxu1 %v737_v37  ;;  %v928_v36 = vld [vmem:[%s4216_s9 + $0x70] sm:$0xff]  ;;  %v998_v37 = vld [vmem:[%s4216_s9 + $0x2a0] sm:$0xff]  ;;  %v917_v57 = vld [vmem:[%s4216_s9 + $0x18] sm:$0xff] }
  0xe0   :  { %827 = vmatpush2.msra.mxu0 %v672_v38  ;;  %898 = vmatpush2.msra.mxu1 %v736_v39  ;;  %v927_v38 = vld [vmem:[%s4216_s9 + $0x68] sm:$0xff]  ;;  %v997_v39 = vld [vmem:[%s4216_s9 + $0x298] sm:$0xff] }
  0xe1   :  { %828 = vmatprep.subr.mxu0 %v671_v13  ;;  %899 = vmatprep.subr.mxu1 %v735_v41  ;;  %v996_v13 = vld [vmem:[%s4216_s9 + $0x290] sm:$0xff]  ;;  %v925_v41 = vld [vmem:[%s4216_s9 + $0x58] sm:$0xff]  ;;  %v987_v58 = vld [vmem:[%s4216_s9 + $0x248] sm:$0xff] }
  0xe2   :  { %829 = vmatpush2.msra.mxu0 %v670_v44  ;;  %900 = vmatpush2.msra.mxu1 %v734_v45  ;;  %v994_v44 = vld [vmem:[%s4216_s9 + $0x280] sm:$0xff]  ;;  %v923_v45 = vld [vmem:[%s4216_s9 + $0x48] sm:$0xff] }
  0xe3   :  { %830 = vmatprep.subr.mxu0 %v669_v49  ;;  %901 = vmatprep.subr.mxu1 %v733_v50  ;;  %v921_v49 = vld [vmem:[%s4216_s9 + $0x38] sm:$0xff]  ;;  %v991_v50 = vld [vmem:[%s4216_s9 + $0x268] sm:$0xff] }
  0xe4   :  { %831 = vmatpush2.msra.mxu0 %v668_v51  ;;  %902 = vmatpush2.msra.mxu1 %v732_v52  ;;  %v920_v51 = vld [vmem:[%s4216_s9 + $0x30] sm:$0xff]  ;;  %v990_v52 = vld [vmem:[%s4216_s9 + $0x260] sm:$0xff] }
  0xe5   :  { %832 = vmatprep.subr.mxu0 %v667_v54  ;;  %836 = vmatprep.mubr.f32.mxu0 %v629_v53  ;;  %v919_v53 = vld [vmem:[%s4216_s9 + $0x28] sm:$0xff]  ;;  %v989_v54 = vld [vmem:[%s4216_s9 + $0x258] sm:$0xff] }
  0xe6   :  { %903 = vmatprep.subr.mxu1 %v731_v56  ;;  %907 = vmatprep.mubr.f32.mxu1 %v631_v55  ;;  %v918_v55 = vld [vmem:[%s4216_s9 + $0x20] sm:$0xff]  ;;  %v988_v56 = vld [vmem:[%s4216_s9 + $0x250] sm:$0xff] }
  0xe7   :  { %833 = vmatpush2.msra.mxu0 %v666_v59  ;;  %904 = vmatpush2.msra.mxu1 %v730_v60  ;;  %v916_v59 = vld [vmem:[%s4216_s9 + $0x10] sm:$0xff]  ;;  %v986_v60 = vld [vmem:[%s4216_s9 + $0x240] sm:$0xff] }
  0xe8   :  { %834 = vmatprep.subr.mxu0 %v665_v61  ;;  %905 = vmatprep.subr.mxu1 %v729_v62  ;;  %v915_v61 = vld [vmem:[%s4216_s9 + $0x8] sm:$0xff]  ;;  %v985_v62 = vld [vmem:[%s4216_s9 + $0x238] sm:$0xff] }
  0xe9   :  { %835 = vmatpush2.msra.mxu0 %v664_v63  ;;  %906 = vmatpush2.msra.mxu1 %v728_v0  ;;  %v914_v63 = vld [vmem:[%s4216_s9] sm:$0xff]  ;;  %v984_v0 = vld [vmem:[%s4216_s9 + $0x230] sm:$0xff] }
  0xea   :  { %837 = vmatmul.mubr.f32.vlgmr.msra.gmra.mxu0 %v628_v1  ;;  %908 = vmatmul.mubr.f32.vlgmr.msra.gmra.mxu1 %v630_v2  ;;  %v977_v1 = vld [vmem:[%s4216_s9 + $0x1f8] sm:$0xff]  ;;  %v983_v2 = vld [vmem:[%s4216_s9 + $0x228] sm:$0xff] }
  0xeb   :  { %1054 = vmatprep.subr.mxu0 %v945_v3  ;;  %1125 = vmatprep.subr.mxu1 %v1009_v18  ;;  %v976_v3 = vld [vmem:[%s4216_s9 + $0x1f0] sm:$0xff]  ;;  %v971_v18 = vld [vmem:[%s4216_s9 + $0x1c8] sm:$0xff] }
  0xec   :  { %1055 = vmatpush1.msra.mxu0 %v944_v4  ;;  %1126 = vmatpush1.msra.mxu1 %v1008_v19  ;;  %v982_v4 = vld [vmem:[%s4216_s9 + $0x220] sm:$0xff]  ;;  %v1041_v19 = vld [vmem:[%s4216_s9 + $0x3f8] sm:$0xff] }
  0xed   :  { %1056 = vmatprep.subr.mxu0 %v943_v5  ;;  %1127 = vmatprep.subr.mxu1 %v1007_v20  ;;  %v975_v5 = vld [vmem:[%s4216_s9 + $0x1e8] sm:$0xff]  ;;  %v970_v20 = vld [vmem:[%s4216_s9 + $0x1c0] sm:$0xff] }
  0xee   :  { %1057 = vmatpush1.msra.mxu0 %v942_v6  ;;  %1128 = vmatpush1.msra.mxu1 %v1006_v21  ;;  %v981_v6 = vld [vmem:[%s4216_s9 + $0x218] sm:$0xff]  ;;  %v1040_v21 = vld [vmem:[%s4216_s9 + $0x3f0] sm:$0xff] }
  0xef   :  { %1058 = vmatprep.subr.mxu0 %v941_v7  ;;  %1129 = vmatprep.subr.mxu1 %v1005_v23  ;;  %v974_v7 = vld [vmem:[%s4216_s9 + $0x1e0] sm:$0xff]  ;;  %v1039_v23 = vld [vmem:[%s4216_s9 + $0x3e8] sm:$0xff] }
  0xf0   :  { %1059 = vmatpush1.msra.mxu0 %v940_v8  ;;  %1130 = vmatpush1.msra.mxu1 %v1004_v25  ;;  %v980_v8 = vld [vmem:[%s4216_s9 + $0x210] sm:$0xff]  ;;  %v1038_v25 = vld [vmem:[%s4216_s9 + $0x3e0] sm:$0xff] }
  0xf1   :  { %1060 = vmatprep.subr.mxu0 %v939_v15  ;;  %1131 = vmatprep.subr.mxu1 %v1003_v27  ;;  %v973_v15 = vld [vmem:[%s4216_s9 + $0x1d8] sm:$0xff] }
  0xf2   :  { %1061 = vmatpush1.msra.mxu0 %v938_v14  ;;  %1132 = vmatpush1.msra.mxu1 %v1002_v29  ;;  %v979_v14 = vld [vmem:[%s4216_s9 + $0x208] sm:$0xff]  ;;  %v1037_v27 = vld [vmem:[%s4216_s9 + $0x3d8] sm:$0xff]  ;;  %v1036_v29 = vld [vmem:[%s4216_s9 + $0x3d0] sm:$0xff] }
  0xf3   :  { %1062 = vmatprep.subr.mxu0 %v937_v16  ;;  %1133 = vmatprep.subr.mxu1 %v1001_v31  ;;  %v972_v16 = vld [vmem:[%s4216_s9 + $0x1d0] sm:$0xff]  ;;  %v1035_v31 = vld [vmem:[%s4216_s9 + $0x3c8] sm:$0xff] }
  0xf4   :  { %1063 = vmatpush1.msra.mxu0 %v936_v17  ;;  %1134 = vmatpush1.msra.mxu1 %v1000_v33  ;;  %v978_v17 = vld [vmem:[%s4216_s9 + $0x200] sm:$0xff] }
  0xf5   :  { %1064 = vmatprep.subr.mxu0 %v935_v22  ;;  %1135 = vmatprep.subr.mxu1 %v999_v35  ;;  %v969_v22 = vld [vmem:[%s4216_s9 + $0x1b8] sm:$0xff]  ;;  %v1034_v33 = vld [vmem:[%s4216_s9 + $0x3c0] sm:$0xff] }
  0xf6   :  { %1065 = vmatpush1.msra.mxu0 %v934_v24  ;;  %1136 = vmatpush1.msra.mxu1 %v998_v37  ;;  %v968_v24 = vld [vmem:[%s4216_s9 + $0x1b0] sm:$0xff]  ;;  %v1033_v35 = vld [vmem:[%s4216_s9 + $0x3b8] sm:$0xff] }
  0xf7   :  { %1066 = vmatprep.subr.mxu0 %v933_v26  ;;  %1137 = vmatprep.subr.mxu1 %v997_v39  ;;  %v967_v26 = vld [vmem:[%s4216_s9 + $0x1a8] sm:$0xff]  ;;  %v1032_v37 = vld [vmem:[%s4216_s9 + $0x3b0] sm:$0xff] }
  0xf8   :  { %1067 = vmatpush1.msra.mxu0 %v932_v28  ;;  %1138 = vmatpush1.msra.mxu1 %v996_v13  ;;  %v966_v28 = vld [vmem:[%s4216_s9 + $0x1a0] sm:$0xff]  ;;  %v1031_v39 = vld [vmem:[%s4216_s9 + $0x3a8] sm:$0xff] }
  0xf9   :  { %1068 = vmatprep.subr.mxu0 %v931_v30  ;;  %1139 = vmatprep.subr.mxu1 %v995_v42  ;;  %v965_v30 = vld [vmem:[%s4216_s9 + $0x198] sm:$0xff]  ;;  %v1030_v13 = vld [vmem:[%s4216_s9 + $0x3a0] sm:$0xff] }
  0xfa   :  { %1069 = vmatpush1.msra.mxu0 %v930_v32  ;;  %1140 = vmatpush1.msra.mxu1 %v994_v44  ;;  %v964_v32 = vld [vmem:[%s4216_s9 + $0x190] sm:$0xff]  ;;  %v1029_v42 = vld [vmem:[%s4216_s9 + $0x398] sm:$0xff] }
  0xfb   :  { %1070 = vmatprep.subr.mxu0 %v929_v34  ;;  %1141 = vmatprep.subr.mxu1 %v993_v46  ;;  %v963_v34 = vld [vmem:[%s4216_s9 + $0x188] sm:$0xff]  ;;  %v1028_v44 = vld [vmem:[%s4216_s9 + $0x390] sm:$0xff] }
  0xfc   :  { %1071 = vmatpush1.msra.mxu0 %v928_v36  ;;  %1142 = vmatpush1.msra.mxu1 %v992_v48  ;;  %v962_v36 = vld [vmem:[%s4216_s9 + $0x180] sm:$0xff]  ;;  %v1027_v46 = vld [vmem:[%s4216_s9 + $0x388] sm:$0xff] }
  0xfd   :  { %1072 = vmatprep.subr.mxu0 %v927_v38  ;;  %1143 = vmatprep.subr.mxu1 %v991_v50  ;;  %v961_v38 = vld [vmem:[%s4216_s9 + $0x178] sm:$0xff]  ;;  %v1026_v48 = vld [vmem:[%s4216_s9 + $0x380] sm:$0xff] }
  0xfe   :  { %1073 = vmatpush1.msra.mxu0 %v926_v40  ;;  %1144 = vmatpush1.msra.mxu1 %v990_v52  ;;  %v960_v40 = vld [vmem:[%s4216_s9 + $0x170] sm:$0xff]  ;;  %v1025_v50 = vld [vmem:[%s4216_s9 + $0x378] sm:$0xff] }
  0xff   :  { %1074 = vmatprep.subr.mxu0 %v925_v41  ;;  %1145 = vmatprep.subr.mxu1 %v989_v54  ;;  %v959_v41 = vld [vmem:[%s4216_s9 + $0x168] sm:$0xff]  ;;  %v1024_v52 = vld [vmem:[%s4216_s9 + $0x370] sm:$0xff] }
 0x100   :  { %1075 = vmatpush1.msra.mxu0 %v924_v43  ;;  %1146 = vmatpush1.msra.mxu1 %v988_v56  ;;  %v958_v43 = vld [vmem:[%s4216_s9 + $0x160] sm:$0xff]  ;;  %v1023_v54 = vld [vmem:[%s4216_s9 + $0x368] sm:$0xff] }
 0x101   :  { %1076 = vmatprep.subr.mxu0 %v923_v45  ;;  %1147 = vmatprep.subr.mxu1 %v987_v58  ;;  %v957_v45 = vld [vmem:[%s4216_s9 + $0x158] sm:$0xff]  ;;  %v1022_v56 = vld [vmem:[%s4216_s9 + $0x360] sm:$0xff] }
 0x102   :  { %1077 = vmatpush1.msra.mxu0 %v922_v47  ;;  %1148 = vmatpush1.msra.mxu1 %v986_v60  ;;  %v956_v47 = vld [vmem:[%s4216_s9 + $0x150] sm:$0xff]  ;;  %v1021_v58 = vld [vmem:[%s4216_s9 + $0x358] sm:$0xff] }
 0x103   :  { %1078 = vmatprep.subr.mxu0 %v921_v49  ;;  %1149 = vmatprep.subr.mxu1 %v985_v62  ;;  %v955_v49 = vld [vmem:[%s4216_s9 + $0x148] sm:$0xff]  ;;  %v1020_v60 = vld [vmem:[%s4216_s9 + $0x350] sm:$0xff] }
 0x104   :  { %1079 = vmatpush1.msra.mxu0 %v920_v51  ;;  %1150 = vmatpush1.msra.mxu1 %v984_v0  ;;  %v954_v51 = vld [vmem:[%s4216_s9 + $0x140] sm:$0xff]  ;;  %v1019_v62 = vld [vmem:[%s4216_s9 + $0x348] sm:$0xff] }
 0x105   :  { %1080 = vmatprep.subr.mxu0 %v919_v53  ;;  %1151 = vmatprep.subr.mxu1 %v983_v2  ;;  %v953_v53 = vld [vmem:[%s4216_s9 + $0x138] sm:$0xff]  ;;  %v1018_v0 = vld [vmem:[%s4216_s9 + $0x340] sm:$0xff] }
 0x106   :  { %1081 = vmatpush1.msra.mxu0 %v918_v55  ;;  %1152 = vmatpush1.msra.mxu1 %v982_v4  ;;  %v952_v55 = vld [vmem:[%s4216_s9 + $0x130] sm:$0xff]  ;;  %v946_v2 = vld [vmem:[%s4216_s9 + $0x100] sm:$0xff]  ;;  %v1017_v4 = vld [vmem:[%s4216_s9 + $0x338] sm:$0xff] }
 0x107   :  { %1082 = vmatprep.subr.mxu0 %v917_v57  ;;  %1153 = vmatprep.subr.mxu1 %v981_v6  ;;  %v951_v57 = vld [vmem:[%s4216_s9 + $0x128] sm:$0xff] }
 0x108   :  { %1083 = vmatpush1.msra.mxu0 %v916_v59  ;;  %1154 = vmatpush1.msra.mxu1 %v980_v8  ;;  %v950_v59 = vld [vmem:[%s4216_s9 + $0x120] sm:$0xff]  ;;  %v1015_v6 = vld [vmem:[%s4216_s9 + $0x328] sm:$0xff]  ;;  %v1013_v8 = vld [vmem:[%s4216_s9 + $0x318] sm:$0xff] }
 0x109   :  { %1084 = vmatprep.subr.mxu0 %v915_v61  ;;  %1155 = vmatprep.subr.mxu1 %v979_v14  ;;  %v949_v61 = vld [vmem:[%s4216_s9 + $0x118] sm:$0xff]  ;;  %v1011_v14 = vld [vmem:[%s4216_s9 + $0x308] sm:$0xff] }
 0x10a   :  { %1085 = vmatpush1.msra.mxu0 %v914_v63  ;;  %1156 = vmatpush1.msra.mxu1 %v978_v17  ;;  %v948_v63 = vld [vmem:[%s4216_s9 + $0x110] sm:$0xff]  ;;  %v348_v17 = vld [vmem:[%s4250_s2] sm:$0x3] }
 0x10b   :  { %1086 = vmatprep.subr.mxu0 %v977_v1  ;;  %1157 = vmatprep.subr.mxu1 %v1041_v19  ;;  %v947_v1 = vld [vmem:[%s4216_s9 + $0x108] sm:$0xff]  ;;  %v357_v19 = vrot.slane %v348_v17, %v3018_v12 }
 0x10c   :  { %1087 = vmatpush2.msra.mxu0 %v976_v3  ;;  %1158 = vmatpush2.msra.mxu1 %v1040_v21  ;;  %v3853_v3 = vld [vmem:[%s4218_s11 + $0x78] sm:$0xff] }
 0x10d   :  { %1088 = vmatprep.subr.mxu0 %v975_v5  ;;  %1159 = vmatprep.subr.mxu1 %v1039_v23  ;;  %v1016_v5 = vld [vmem:[%s4216_s9 + $0x330] sm:$0xff] }
 0x10e   :  { %1089 = vmatpush2.msra.mxu0 %v974_v7  ;;  %1160 = vmatpush2.msra.mxu1 %v1038_v25  ;;  %v1014_v7 = vld [vmem:[%s4216_s9 + $0x320] sm:$0xff] }
 0x10f   :  { %1090 = vmatprep.subr.mxu0 %v973_v15  ;;  %1161 = vmatprep.subr.mxu1 %v1037_v27  ;;  %v1012_v15 = vld [vmem:[%s4216_s9 + $0x310] sm:$0xff] }
 0x110   :  { %1091 = vmatpush2.msra.mxu0 %v972_v16  ;;  %1162 = vmatpush2.msra.mxu1 %v1036_v29  ;;  %v1010_v16 = vld [vmem:[%s4216_s9 + $0x300] sm:$0xff]  ;;  %v3894_v29 = vld [vmem:[%s4218_s11 + $0x68] sm:$0xff] }
 0x111   :  { %1092 = vmatprep.subr.mxu0 %v971_v18  ;;  %1163 = vmatprep.subr.mxu1 %v1035_v31  ;;  %v353_v18 = vrot.slane %v348_v17, %v3015_v11  ;;  %v3905_v31 = vld [vmem:[%s4218_s11 + $0x58] sm:$0xff] }
 0x112   :  { %1093 = vmatpush2.msra.mxu0 %v970_v20  ;;  %1164 = vmatpush2.msra.mxu1 %v1034_v33  ;;  %v3912_v33 = vld [vmem:[%s4218_s11 + $0x50] sm:$0xff] }
 0x113   :  { %1094 = vmatprep.subr.mxu0 %v969_v22  ;;  %1165 = vmatprep.subr.mxu1 %v1033_v35  ;;  %v3924_v35 = vld [vmem:[%s4218_s11 + $0x40] sm:$0xff] }
 0x114   :  { %1095 = vmatpush2.msra.mxu0 %v968_v24  ;;  %1166 = vmatpush2.msra.mxu1 %v1032_v37  ;;  %v3936_v37 = vld [vmem:[%s4218_s11 + $0x30] sm:$0xff] }
 0x115   :  { %1096 = vmatprep.subr.mxu0 %v967_v26  ;;  %1167 = vmatprep.subr.mxu1 %v1031_v39  ;;  %v3948_v39 = vld [vmem:[%s4218_s11 + $0x20] sm:$0xff] }
 0x116   :  { %1097 = vmatpush2.msra.mxu0 %v966_v28  ;;  %1168 = vmatpush2.msra.mxu1 %v1030_v13  ;;  %v3889_v28 = vld [vmem:[%s4218_s11 + $0x70] sm:$0xff] }
 0x117   :  { %1098 = vmatprep.subr.mxu0 %v965_v30  ;;  %1169 = vmatprep.subr.mxu1 %v1029_v42  ;;  %v3899_v30 = vld [vmem:[%s4218_s11 + $0x60] sm:$0xff]  ;;  %v3960_v13 = vld [vmem:[%s4218_s11 + $0x10] sm:$0xff] }
 0x118   :  { %1099 = vmatpush2.msra.mxu0 %v964_v32  ;;  %1170 = vmatpush2.msra.mxu1 %v1028_v44  ;;  %v2488_v32 = vmov 0.0   ;;  %v3972_v42 = vld [vmem:[%s4218_s11] sm:$0xff] }
 0x119   :  { %1100 = vmatprep.subr.mxu0 %v963_v34  ;;  %1171 = vmatprep.subr.mxu1 %v1027_v46  ;;  %v3918_v34 = vld [vmem:[%s4218_s11 + $0x48] sm:$0xff] }
 0x11a   :  { %1101 = vmatpush2.msra.mxu0 %v962_v36  ;;  %1172 = vmatpush2.msra.mxu1 %v1026_v48  ;;  %v3930_v36 = vld [vmem:[%s4218_s11 + $0x38] sm:$0xff] }
 0x11b   :  { %1102 = vmatprep.subr.mxu0 %v961_v38  ;;  %1173 = vmatprep.subr.mxu1 %v1025_v50  ;;  %v3942_v38 = vld [vmem:[%s4218_s11 + $0x28] sm:$0xff] }
 0x11c   :  { %1103 = vmatpush2.msra.mxu0 %v960_v40  ;;  %1174 = vmatpush2.msra.mxu1 %v1024_v52  ;;  %v3954_v40 = vld [vmem:[%s4218_s11 + $0x18] sm:$0xff] }
 0x11d   :  { %1104 = vmatprep.subr.mxu0 %v959_v41  ;;  %1175 = vmatprep.subr.mxu1 %v1023_v54  ;;  %v3966_v41 = vld [vmem:[%s4218_s11 + $0x8] sm:$0xff]  ;;  %v1042_v54 = vld [vmem:[%s4217_s10] sm:$0x3]  ;;  %s2490_s10 = smov 64  }
 0x11e   :  { %1105 = vmatpush2.msra.mxu0 %v958_v43  ;;  %1176 = vmatpush2.msra.mxu1 %v1022_v56  ;;  %v760_v43 = vld [vmem:[%s4215_s8] sm:$0x3]  ;;  %v2489_v56 = vmov 1983009808  }
 0x11f   :  { %1106 = vmatprep.subr.mxu0 %v957_v45  ;;  %1177 = vmatprep.subr.mxu1 %v1021_v58  ;;  %v765_v44 = vrot.slane %v760_v43, %v3015_v11  ;;  %v769_v45 = vrot.slane %v760_v43, %v3018_v12  ;;  %v1047_v58 = vrot.slane %v1042_v54, %v3015_v11 }
 0x120   :  { %1107 = vmatpush2.msra.mxu0 %v956_v47  ;;  %1178 = vmatpush2.msra.mxu1 %v1020_v60 }
 0x121   :  { %1108 = vmatprep.subr.mxu0 %v955_v49  ;;  %1179 = vmatprep.subr.mxu1 %v1019_v62 }
 0x122   :  { %1109 = vmatpush2.msra.mxu0 %v954_v51  ;;  %1180 = vmatpush2.msra.mxu1 %v1018_v0 }
 0x123   :  { %1110 = vmatprep.subr.mxu0 %v953_v53  ;;  %1181 = vmatprep.subr.mxu1 %v1017_v4 }
 0x124   :  { %1111 = vmatpush2.msra.mxu0 %v952_v55  ;;  %1182 = vmatpush2.msra.mxu1 %v1016_v5 }
 0x125   :  { %1112 = vmatprep.subr.mxu0 %v951_v57  ;;  %1183 = vmatprep.subr.mxu1 %v1015_v6  ;;  %v1200_v57 = vunpack.c.l.s4 %v2489_v56 }
 0x126   :  { %1113 = vmatpush2.msra.mxu0 %v950_v59  ;;  %1184 = vmatpush2.msra.mxu1 %v1014_v7  ;;  %v1051_v59 = vrot.slane %v1042_v54, %v3018_v12 }
 0x127   :  { %1114 = vmatprep.subr.mxu0 %v949_v61  ;;  %1185 = vmatprep.subr.mxu1 %v1013_v8  ;;  %v1201_v61 = vunpack.c.0.s8 %v1200_v57 }
 0x128   :  { %1115 = vmatpush2.msra.mxu0 %v948_v63  ;;  %1186 = vmatpush2.msra.mxu1 %v1012_v15 }
 0x129   :  { %1116 = vmatprep.subr.mxu0 %v947_v1  ;;  %1187 = vmatprep.subr.mxu1 %v1011_v14  ;;  %v4024_v5 = vsub.s32 %v1201_v61, %v3012_v10 }
 0x12a   :  { %1117 = vmatpush2.msra.mxu0 %v946_v2  ;;  %1188 = vmatpush2.msra.mxu1 %v1010_v16 }
 0x12b   :  { %1269 = vmatprep.subr.mxu0 %v3853_v3  ;;  %1402 = vmatprep.subr.mxu1 %v3853_v3 }
 0x169   :  { %v426_v20 = vpop.f32.mrf.mxu0  ;;  %v497_v21 = vpop.f32.mrf.mxu1 }
 0x16a   :  { %v427_v22 = vadd.f32 %v426_v20, %v353_v18 }
 0x16b   :  { %v428_v23 = vpop.f32.mrf.mxu0  ;;  %v499_v25 = vpop.f32.mrf.mxu1 }
 0x16c   :  { %v429_v24 = vadd.f32 %v428_v23, %v357_v19  ;;  %v498_v27 = vadd.f32 %v497_v21, %v427_v22  ;;  %v1244_v23 = vand.u32 127, %v97_v9 }
 0x16e   :  { %v500_v26 = vadd.f32 %v499_v25, %v429_v24  ;;  %vm1245_vm0 = vcmp.ge.s32.totalorder %v1244_v23, 32 }
 0x170   :  { %1118 = vmatprep.mubr.f32.mxu0 %v500_v26 }
 0x171   :  { %1119 = vmatmul.mubr.f32.vlgmr.msra.gmra.mxu0 %v498_v27  ;;  %v2239_v27 = vsel %vm1245_vm0, 1.0, %v2488_v32 }
 0x172   :  { %1270 = vmatpush1.msra.mxu0 %v3889_v28  ;;  %1317 = vmatprep.mubr.f32.mxu0 %v2488_v32  ;;  %v1377_v43 = vrot.slane %v2239_v27, %v4024_v5 }
 0x173   :  { %1271 = vmatprep.subr.mxu0 %v3894_v29 }
 0x174   :  { %1272 = vmatpush1.msra.mxu0 %v3899_v30 }
 0x175   :  { %1273 = vmatprep.subr.mxu0 %v3905_v31 }
 0x176   :  { %1274 = vmatpush1.msra.mxu0 %v3912_v33 }
 0x177   :  { %1275 = vmatprep.subr.mxu0 %v3918_v34 }
 0x178   :  { %1276 = vmatpush1.msra.mxu0 %v3924_v35 }
 0x179   :  { %1277 = vmatprep.subr.mxu0 %v3930_v36 }
 0x17a   :  { %1278 = vmatpush1.msra.mxu0 %v3936_v37 }
 0x17b   :  { %1279 = vmatprep.subr.mxu0 %v3942_v38 }
 0x17c   :  { %1280 = vmatpush1.msra.mxu0 %v3948_v39 }
 0x17d   :  { %1281 = vmatprep.subr.mxu0 %v3954_v40 }
 0x17e   :  { %1282 = vmatpush1.msra.mxu0 %v3960_v13 }
 0x17f   :  { %1283 = vmatprep.subr.mxu0 %v3966_v41 }
 0x180   :  { %1284 = vmatpush1.msra.mxu0 %v3972_v42 }
 0x181   :  { %1318 = vmatmul.mubr.f32.vlgmr.msra.gmra.mxu0 %v2488_v32  ;;  %1522 = vmatprep.subr.mxu0 %v3853_v3 }
 0x182   :  { %1523 = vmatpush1.msra.mxu0 %v3889_v28  ;;  %1570 = vmatprep.mubr.f32.mxu0 %v2488_v32 }
 0x183   :  { %1524 = vmatprep.subr.mxu0 %v3894_v29 }
 0x184   :  { %1525 = vmatpush1.msra.mxu0 %v3899_v30 }
 0x185   :  { %1526 = vmatprep.subr.mxu0 %v3905_v31 }
 0x186   :  { %1527 = vmatpush1.msra.mxu0 %v3912_v33 }
 0x187   :  { %1528 = vmatprep.subr.mxu0 %v3918_v34 }
 0x188   :  { %1529 = vmatpush1.msra.mxu0 %v3924_v35 }
 0x189   :  { %1530 = vmatprep.subr.mxu0 %v3930_v36 }
 0x18a   :  { %1531 = vmatpush1.msra.mxu0 %v3936_v37 }
 0x18b   :  { %1532 = vmatprep.subr.mxu0 %v3942_v38 }
 0x18c   :  { %1533 = vmatpush1.msra.mxu0 %v3948_v39 }
 0x18d   :  { %1534 = vmatprep.subr.mxu0 %v3954_v40 }
 0x18e   :  { %1535 = vmatpush1.msra.mxu0 %v3960_v13 }
 0x18f   :  { %1536 = vmatprep.subr.mxu0 %v3966_v41 }
 0x190   :  { %1537 = vmatpush1.msra.mxu0 %v3972_v42 }
 0x191   :  { %2326 = vmatprep.subr.mxu0 %v2488_v32 }
 0x1aa   :  { %v838_v46 = vpop.f32.mrf.mxu0  ;;  %v909_v47 = vpop.f32.mrf.mxu1 }
 0x1ab   :  { %v839_v48 = vadd.f32 %v838_v46, %v765_v44 }
 0x1ac   :  { %v840_v49 = vpop.f32.mrf.mxu0  ;;  %v911_v51 = vpop.f32.mrf.mxu1 }
 0x1ad   :  { %v841_v50 = vadd.f32 %v840_v49, %v769_v45  ;;  %v910_v53 = vadd.f32 %v909_v47, %v839_v48 }
 0x1af   :  { %v912_v52 = vadd.f32 %v911_v51, %v841_v50 }
 0x1b1   :  { %1189 = vmatprep.mubr.f32.mxu1 %v912_v52 }
 0x1b2   :  { %1190 = vmatmul.mubr.f32.vlgmr.msra.gmra.mxu1 %v910_v53 }
 0x1b3   :  { %1403 = vmatpush1.msra.mxu1 %v3889_v28  ;;  %1450 = vmatprep.mubr.f32.mxu1 %v2488_v32 }
 0x1b4   :  { %1404 = vmatprep.subr.mxu1 %v3894_v29 }
 0x1b5   :  { %1405 = vmatpush1.msra.mxu1 %v3899_v30 }
 0x1b6   :  { %1406 = vmatprep.subr.mxu1 %v3905_v31 }
 0x1b7   :  { %1407 = vmatpush1.msra.mxu1 %v3912_v33 }
 0x1b8   :  { %1408 = vmatprep.subr.mxu1 %v3918_v34 }
 0x1b9   :  { %1409 = vmatpush1.msra.mxu1 %v3924_v35 }
 0x1ba   :  { %1410 = vmatprep.subr.mxu1 %v3930_v36 }
 0x1bb   :  { %1411 = vmatpush1.msra.mxu1 %v3936_v37 }
 0x1bc   :  { %1412 = vmatprep.subr.mxu1 %v3942_v38 }
 0x1bd   :  { %1413 = vmatpush1.msra.mxu1 %v3948_v39 }
 0x1be   :  { %1414 = vmatprep.subr.mxu1 %v3954_v40 }
 0x1bf   :  { %1415 = vmatpush1.msra.mxu1 %v3960_v13 }
 0x1c0   :  { %1416 = vmatprep.subr.mxu1 %v3966_v41 }
 0x1c1   :  { %1417 = vmatpush1.msra.mxu1 %v3972_v42 }
 0x1c2   :  { %1642 = vmatprep.subr.mxu1 %v3853_v3 }
 0x231   :  { %v1120_v55 = vpop.f32.mrf.mxu0 }
 0x232   :  { %v1121_v63 = vadd.f32 %v1120_v55, %v1047_v58 }
 0x233   :  { %v1122_v60 = vpop.f32.mrf.mxu0 }
 0x234   :  { %v1123_v0 = vadd.f32 %v1122_v60, %v1051_v59 }
 0x241   :  { %v1319_v2 = vpop.f32.mrf.mxu0 }
 0x243   :  { %v1321_v8 = vpop.f32.mrf.mxu0 }
 0x244   :  { %v1326_v16 = vcombine.low %v1319_v2, %v1321_v8 }
 0x246   :  { %v1333_v17 = vrot.slane %v1326_v16, %v4024_v5 }
 0x272   :  { %v1191_v62 = vpop.f32.mrf.mxu1 }
 0x273   :  { %v1192_v4 = vadd.f32 %v1191_v62, %v1121_v63 }
 0x274   :  { %v1193_v1 = vpop.f32.mrf.mxu1 }
 0x275   :  { %v1194_v3 = vadd.f32 %v1193_v1, %v1123_v0 }
 0x277   :  { %v1198_v6 = vcombine.low %v1192_v4, %v1194_v3  ;;  %v1212_v7 = vcombine.high %v1192_v4, %v1194_v3 }
 0x279   :  { %v1205_v15 = vrot.slane %v1198_v6, %v4024_v5  ;;  %2237 = vst.sshfl [vmem:[#allocation2] sm:$0x33 pattern:$0x76325410] %v1198_v6  ;;  %v1219_v11 = vrot.slane %v1212_v7, %v4024_v5 }
 0x27a   :  { %2238 = vst.sshfl [vmem:[#allocation2 + $0x8] sm:$0x33 pattern:$0x76325410] %v1212_v7 }
 0x27b   :  { %v1208_v12 = vcombine.high %v1205_v15, %v1205_v15  ;;  %v1223_v14 = vcombine.high %v1219_v11, %v1219_v11 }
 0x27d   :  { %1211 = vst [vmem:[#allocation2 + $0x4] sm:$0xf] %v1208_v12  ;;  %1226 = vst [vmem:[#allocation2 + $0xc] sm:$0xf] %v1223_v14 }
 0x280   :  { %v1248_v18 = vld [vmem:[#allocation2] sm:$0xf] }
 0x281   :  { %v1335_v19 = vadd.f32 %v1333_v17, %v1248_v18  ;;  %v1502_v15 = vld [vmem:[#allocation2 + $0x8] sm:$0xf] }
 0x283   :  { %v2240_v10 = vmul.f32 -1.442695, %v1335_v19  ;;  %v1343_v20 = vrot.slane %v1335_v19, 2 }
 0x285   :  { %2383 = vpow2.f32 %v2240_v10 }
 0x286   :  { %2385 = vtanh.f32 %v1343_v20 }
 0x292   :  { %v2384_v21 = vpop.eup %2383 }
 0x293   :  { %v1339_v22 = vadd.f32 1.0, %v2384_v21  ;;  %v2386_v24 = vpop.eup %2385 }
 0x295   :  { %2387 = vrcp.f32 %v1339_v22 }
 0x2a2   :  { %v2388_v25 = vpop.eup %2387 }
 0x2a3   :  { %v1357_v26 = vmul.f32 %v2388_v25, %v2386_v24  ;;  %v1356_v44 = vmul.f32 0.0, %v2388_v25 }
 0x2a5   :  { %1359 = vrot.lane.b32.xlu1 %v1357_v26, %s2490_s10 }
 0x2a9   :  { %1346 = vrot.lane.b32.xlu1 %v1335_v19, %s2490_s10 }
 0x2ad   :  { %1378 = vrot.lane.b32.xlu1 %v1377_v43, %s2490_s10 }
 0x317   :  { %v1360_v45 = vpop.permute.xlu1 %1359 }
 0x318   :  { %v1362_v46 = vadd.f32 %v1360_v45, %v1356_v44 }
 0x31a   :  { %2389 = vtanh.f32 %v1362_v46 }
 0x31b   :  { %v1347_v47 = vpop.permute.xlu1 %1346 }
 0x31c   :  { %v1348_v48 = vrot.slane %v1347_v47, 2 }
 0x31e   :  { %v2241_v49 = vmul.f32 -1.442695, %v1348_v48 }
 0x320   :  { %2391 = vpow2.f32 %v2241_v49 }
 0x327   :  { %v2390_v9 = vpop.eup %2389 }
 0x328   :  { %1365 = vrot.lane.b32.xlu0 %v2390_v9, %s2490_s10 }
 0x32d   :  { %v2392_v50 = vpop.eup %2391 }
 0x32e   :  { %v1353_v51 = vadd.f32 1.0, %v2392_v50  ;;  %v1622_v50 = vld [vmem:[#allocation2 + $0xc] sm:$0xf] }
 0x330   :  { %2393 = vrcp.f32 %v1353_v51 }
 0x33d   :  { %v2394_v52 = vpop.eup %2393 }
 0x39a   :  { %v1366_v53 = vpop.permute.xlu0 %1365 }
 0x39b   :  { %v1368_v54 = vmul.f32 %v2394_v52, %v1366_v53 }
 0x39d   :  { %v1369_v55 = vmul.f32 %v2239_v27, %v1368_v54 }
 0x39f   :  { %2242 = vmatmul.mubr.msk.f32.vlgmr.msra.gmra.mxu1 %vm1249_vm1, %v1369_v55 }
 0x3a0   :  { %1643 = vmatpush1.msra.mxu1 %v3889_v28  ;;  %1690 = vmatprep.mubr.f32.mxu1 %v2488_v32 }
 0x3a1   :  { %1644 = vmatprep.subr.mxu1 %v3894_v29 }
 0x3a2   :  { %1645 = vmatpush1.msra.mxu1 %v3899_v30 }
 0x3a3   :  { %1646 = vmatprep.subr.mxu1 %v3905_v31 }
 0x3a4   :  { %1647 = vmatpush1.msra.mxu1 %v3912_v33  ;;  %v1382_v33 = vld [vmem:[#allocation2 + $0x4] sm:$0xf] }
 0x3a5   :  { %1648 = vmatprep.subr.mxu1 %v3918_v34 }
 0x3a6   :  { %1649 = vmatpush1.msra.mxu1 %v3924_v35 }
 0x3a7   :  { %1650 = vmatprep.subr.mxu1 %v3930_v36 }
 0x3a8   :  { %1651 = vmatpush1.msra.mxu1 %v3936_v37 }
 0x3a9   :  { %1652 = vmatprep.subr.mxu1 %v3942_v38 }
 0x3aa   :  { %1653 = vmatpush1.msra.mxu1 %v3948_v39  ;;  %v1379_v39 = vpop.permute.xlu1 %1378 }
 0x3ab   :  { %1654 = vmatprep.subr.mxu1 %v3954_v40 }
 0x3ac   :  { %1655 = vmatpush1.msra.mxu1 %v3960_v13  ;;  %v1381_v13 = vmul.f32 %v1379_v39, %v1362_v46  ;;  %v1924_v39 = vld [vmem:[%s4223_s16 + $0x18] sm:$0xff] }
 0x3ad   :  { %1656 = vmatprep.subr.mxu1 %v3966_v41 }
 0x3ae   :  { %1657 = vmatpush1.msra.mxu1 %v3972_v42 }
 0x3af   :  { %2296 = vmatprep.subr.mxu1 %v2488_v32 }
 0x45f   :  { %v1452_v28 = vpop.f32.mrf.mxu1 }
 0x461   :  { %v1454_v29 = vpop.f32.mrf.mxu1 }
 0x462   :  { %v1459_v30 = vcombine.low %v1452_v28, %v1454_v29 }
 0x464   :  { %v1466_v31 = vrot.slane %v1459_v30, %v4024_v5 }
 0x466   :  { %v1468_v34 = vadd.f32 %v1466_v31, %v1382_v33  ;;  %v1745_v31 = vld [vmem:[%s4219_s12 + $0x18] sm:$0xff]  ;;  %v1744_v33 = vld [vmem:[%s4219_s12 + $0x10] sm:$0xff] }
 0x468   :  { %1479 = vrot.lane.b32.xlu1 %v1468_v34, %s2490_s10  ;;  %v2243_v35 = vmul.f32 -1.442695, %v1468_v34  ;;  %v1476_v36 = vrot.slane %v1468_v34, 2  ;;  %v1743_v34 = vld [vmem:[%s4219_s12 + $0x8] sm:$0xff] }
 0x46a   :  { %2395 = vpow2.f32 %v2243_v35 }
 0x46b   :  { %2397 = vtanh.f32 %v1476_v36 }
 0x477   :  { %v2396_v37 = vpop.eup %2395 }
 0x478   :  { %v1472_v38 = vadd.f32 1.0, %v2396_v37  ;;  %v2398_v40 = vpop.eup %2397 }
 0x47a   :  { %2399 = vrcp.f32 %v1472_v38  ;;  %v1742_v38 = vld [vmem:[%s4219_s12] sm:$0xff] }
 0x487   :  { %v2400_v41 = vpop.eup %2399 }
 0x488   :  { %v1490_v42 = vmul.f32 %v2400_v41, %v2398_v40  ;;  %v1489_v56 = vmul.f32 %v2400_v41, %v1381_v13  ;;  %v1923_v40 = vld [vmem:[%s4223_s16 + $0x10] sm:$0xff]  ;;  %v1922_v13 = vld [vmem:[%s4223_s16 + $0x8] sm:$0xff]  ;;  %v1921_v41 = vld [vmem:[%s4223_s16] sm:$0xff]  ;;  %s2492_s16 = smov 96  }
 0x48a   :  { %1492 = vrot.lane.b32.xlu0 %v1490_v42, %s2490_s10 }
 0x4da   :  { %v1480_v60 = vpop.permute.xlu1 %1479 }
 0x4db   :  { %v1481_v61 = vrot.slane %v1480_v60, 2 }
 0x4dd   :  { %v2244_v62 = vmul.f32 -1.442695, %v1481_v61 }
 0x4fc   :  { %v1493_v57 = vpop.permute.xlu0 %1492 }
 0x4fd   :  { %v1495_v58 = vadd.f32 %v1493_v57, %v1489_v56 }
 0x4ff   :  { %2401 = vtanh.f32 %v1495_v58 }
 0x500   :  { %2403 = vpow2.f32 %v2244_v62 }
 0x50c   :  { %v2402_v59 = vpop.eup %2401 }
 0x50d   :  { %1498 = vrot.lane.b32.xlu0 %v2402_v59, %s2490_s10  ;;  %v2404_v63 = vpop.eup %2403 }
 0x50e   :  { %v1486_v0 = vadd.f32 1.0, %v2404_v63 }
 0x510   :  { %2405 = vrcp.f32 %v1486_v0 }
 0x51d   :  { %v2406_v1 = vpop.eup %2405 }
 0x57f   :  { %v1499_v2 = vpop.permute.xlu0 %1498 }
 0x580   :  { %v1501_v4 = vmul.f32 %v2406_v1, %v1499_v2  ;;  %v1840_v1 = vld [vmem:[%s4221_s14 + $0x38] sm:$0xff]  ;;  %v1839_v2 = vld [vmem:[%s4221_s14 + $0x30] sm:$0xff] }
 0x582   :  { %2245 = vmatmul.mubr.msk.f32.vlgmr.msra.gmra.mxu0 %vm1249_vm1, %v1501_v4  ;;  %v1837_v4 = vld [vmem:[%s4221_s14 + $0x20] sm:$0xff] }
 0x583   :  { %2334 = vmatprep.mubr.msk.f32.mxu0 %vm2491_vm2, %v2488_v32  ;;  %2327 = vmatpush3.msra.mxu0 %v1924_v39 }
 0x584   :  { %2328 = vmatprep.subr.mxu0 %v2488_v32 }
 0x585   :  { %2329 = vmatpush3.msra.mxu0 %v1923_v40 }
 0x586   :  { %2330 = vmatprep.subr.mxu0 %v2488_v32 }
 0x587   :  { %2331 = vmatpush3.msra.mxu0 %v1922_v13 }
 0x588   :  { %2332 = vmatprep.subr.mxu0 %v2488_v32 }
 0x589   :  { %2333 = vmatpush3.msra.mxu0 %v1921_v41 }
 0x58a   :  { %2337 = vmatprep.subr.mxu0 %v2488_v32 }
 0x642   :  { %v1572_v3 = vpop.f32.mrf.mxu0 }
 0x644   :  { %v1574_v6 = vpop.f32.mrf.mxu0 }
 0x645   :  { %v1579_v7 = vcombine.low %v1572_v3, %v1574_v6  ;;  %v1836_v3 = vld [vmem:[%s4221_s14 + $0x18] sm:$0xff]  ;;  %v1835_v6 = vld [vmem:[%s4221_s14 + $0x10] sm:$0xff] }
 0x647   :  { %v1586_v8 = vrot.slane %v1579_v7, %v4024_v5  ;;  %v1834_v7 = vld [vmem:[%s4221_s14 + $0x8] sm:$0xff] }
 0x649   :  { %v1588_v11 = vadd.f32 %v1586_v8, %v1502_v15  ;;  %v1833_v8 = vld [vmem:[%s4221_s14] sm:$0xff] }
 0x64b   :  { %1599 = vrot.lane.b32.xlu0 %v1588_v11, %s2490_s10  ;;  %v2246_v12 = vmul.f32 -1.442695, %v1588_v11  ;;  %v1596_v14 = vrot.slane %v1588_v11, 2  ;;  %v2251_v11 = vld [vmem:[%s4220_s13] ss:$0 sm:$0xff] }
 0x64d   :  { %2407 = vpow2.f32 %v2246_v12 }
 0x64e   :  { %2409 = vtanh.f32 %v1596_v14 }
 0x65a   :  { %v2408_v16 = vpop.eup %2407 }
 0x65b   :  { %v1592_v17 = vadd.f32 1.0, %v2408_v16  ;;  %v2410_v18 = vpop.eup %2409 }
 0x65d   :  { %2411 = vrcp.f32 %v1592_v17 }
 0x66a   :  { %v2412_v19 = vpop.eup %2411 }
 0x66b   :  { %v1610_v10 = vmul.f32 %v2412_v19, %v2410_v18  ;;  %v1609_v20 = vmul.f32 %v2412_v19, %v1495_v58  ;;  %v2026_v18 = vld [vmem:[%s4225_s18 + $0x38] sm:$0xff]  ;;  %v2025_v19 = vld [vmem:[%s4225_s18 + $0x30] sm:$0xff] }
 0x66d   :  { %1612 = vrot.lane.b32.xlu1 %v1610_v10, %s2490_s10  ;;  %v2024_v10 = vld [vmem:[%s4225_s18 + $0x28] sm:$0xff] }
 0x6bd   :  { %v1600_v24 = vpop.permute.xlu0 %1599 }
 0x6be   :  { %v1601_v25 = vrot.slane %v1600_v24, 2 }
 0x6c0   :  { %v2247_v26 = vmul.f32 -1.442695, %v1601_v25  ;;  %v2020_v25 = vld [vmem:[%s4225_s18 + $0x8] sm:$0xff] }
 0x6df   :  { %v1613_v21 = vpop.permute.xlu1 %1612 }
 0x6e0   :  { %v1615_v22 = vadd.f32 %v1613_v21, %v1609_v20  ;;  %v2023_v20 = vld [vmem:[%s4225_s18 + $0x20] sm:$0xff]  ;;  %v2022_v21 = vld [vmem:[%s4225_s18 + $0x18] sm:$0xff] }
 0x6e2   :  { %2413 = vtanh.f32 %v1615_v22 }
 0x6e3   :  { %2415 = vpow2.f32 %v2247_v26  ;;  %v2019_v26 = vld [vmem:[%s4225_s18] sm:$0xff] }
 0x6ef   :  { %v2414_v23 = vpop.eup %2413 }
 0x6f0   :  { %1618 = vrot.lane.b32.xlu1 %v2414_v23, %s2490_s10  ;;  %v2416_v27 = vpop.eup %2415 }
 0x6f1   :  { %v1606_v43 = vadd.f32 1.0, %v2416_v27 }
 0x6f3   :  { %2417 = vrcp.f32 %v1606_v43  ;;  %v2113_v43 = vstv %s2112_s0 }
 0x700   :  { %v2418_v44 = vpop.eup %2417 }
 0x762   :  { %v1619_v45 = vpop.permute.xlu1 %1618 }
 0x763   :  { %v1621_v46 = vmul.f32 %v2418_v44, %v1619_v45  ;;  %v2256_v45 = vld [vmem:[%s4224_s17] ss:$0 sm:$0xff] }
 0x765   :  { %2248 = vmatmul.mubr.msk.f32.vlgmr.msra.gmra.mxu1 %vm1249_vm1, %v1621_v46 }
 0x766   :  { %2297 = vmatpush3.msra.mxu1 %v1745_v31  ;;  %2304 = vmatprep.mubr.msk.f32.mxu1 %vm2491_vm2, %v2488_v32 }
 0x767   :  { %2298 = vmatprep.subr.mxu1 %v2488_v32 }
 0x768   :  { %2299 = vmatpush3.msra.mxu1 %v1744_v33 }
 0x769   :  { %2300 = vmatprep.subr.mxu1 %v2488_v32 }
 0x76a   :  { %2301 = vmatpush3.msra.mxu1 %v1743_v34 }
 0x76b   :  { %2302 = vmatprep.subr.mxu1 %v2488_v32 }
 0x76c   :  { %2303 = vmatpush3.msra.mxu1 %v1742_v38 }
 0x76d   :  { %2307 = vmatprep.subr.mxu1 %v2488_v32 }
 0x825   :  { %v1692_v9 = vpop.f32.mrf.mxu1 }
 0x827   :  { %v1694_v47 = vpop.f32.mrf.mxu1 }
 0x828   :  { %v1699_v48 = vcombine.low %v1692_v9, %v1694_v47 }
 0x82a   :  { %v1706_v49 = vrot.slane %v1699_v48, %v4024_v5 }
 0x82c   :  { %v1708_v51 = vadd.f32 %v1706_v49, %v1622_v50 }
 0x82e   :  { %1719 = vrot.lane.b32.xlu1 %v1708_v51, %s2490_s10  ;;  %v2249_v52 = vmul.f32 -1.442695, %v1708_v51  ;;  %v1716_v53 = vrot.slane %v1708_v51, 2 }
 0x830   :  { %2419 = vpow2.f32 %v2249_v52 }
 0x831   :  { %2421 = vtanh.f32 %v1716_v53  ;;  %v2130_v53 = vld [vmem:[%s4228_s21] sm:$0xf]  ;;  %s2494_s21 = smov [#allocation6]  }
 0x832   :  { %s2224_s8 = sshll.u32 %s2494_s21, 4  ;;  %s2225_s8 = int_to_ptr.vmem [resolvable:$true] %s2224_s8 }
 0x833   :  { %s2457_s1 = scalar_lea.vmem %s2225_s8, 32  ;;  %p2462_p6 = scmp.lt.s32.totalorder %s2225_s8, %s2225_s8 }
 0x834   :  { %p2458_p5 = scmp.ne.s32.totalorder %s2225_s8, %s2457_s1  ;;  %p2463_p7 = scmp.lt.s32.totalorder %s2457_s1, %s2457_s1 }
 0x836   :  { %p2464_p8 = por %p2463_p7, %p2462_p6 }
 0x838   :  { %p2465_p9 = pnand %p2464_p8, %p2458_p5 }
 0x83d   :  { %v2420_v54 = vpop.eup %2419 }
 0x83e   :  { %v1712_v55 = vadd.f32 1.0, %v2420_v54  ;;  %v2422_v28 = vpop.eup %2421  ;;  %v2254_v54 = vld [vmem:[%s4222_s15] ss:$0 sm:$0xff] }
 0x840   :  { %2423 = vrcp.f32 %v1712_v55  ;;  %v2259_v55 = vld [vmem:[%s4226_s19] ss:$0 sm:$0xff] }
 0x84d   :  { %v2424_v29 = vpop.eup %2423 }
 0x84e   :  { %v1730_v30 = vmul.f32 %v2424_v29, %v2422_v28  ;;  %v1729_v35 = vmul.f32 %v2424_v29, %v1615_v22  ;;  %v2021_v22 = vld [vmem:[%s4225_s18 + $0x10] sm:$0xff] }
 0x850   :  { %1732 = vrot.lane.b32.xlu0 %v1730_v30, %s2490_s10 }
 0x8a0   :  { %v1720_v56 = vpop.permute.xlu1 %1719 }
 0x8a1   :  { %v1721_v57 = vrot.slane %v1720_v56, 2 }
 0x8a3   :  { %v2250_v58 = vmul.f32 -1.442695, %v1721_v57 }
 0x8c2   :  { %v1733_v36 = vpop.permute.xlu0 %1732 }
 0x8c3   :  { %v1735_v37 = vadd.f32 %v1733_v36, %v1729_v35 }
 0x8c5   :  { %2425 = vtanh.f32 %v1735_v37 }
 0x8c6   :  { %2427 = vpow2.f32 %v2250_v58 }
 0x8d2   :  { %v2426_v42 = vpop.eup %2425 }
 0x8d3   :  { %1738 = vrot.lane.b32.xlu0 %v2426_v42, %s2490_s10  ;;  %v2428_v59 = vpop.eup %2427  ;;  %v2263_v42 = vld [vmem:[%s4229_s22] ss:$0 sm:$0xff] }
 0x8d4   :  { %v1726_v60 = vadd.f32 1.0, %v2428_v59 }
 0x8d6   :  { %2429 = vrcp.f32 %v1726_v60 }
 0x8e3   :  { %v2430_v61 = vpop.eup %2429 }
 0x945   :  { %v1739_v62 = vpop.permute.xlu0 %1738 }
 0x946   :  { %v1741_v63 = vmul.f32 %v2430_v61, %v1739_v62 }
 0x948   :  { %v1938_v0 = vrot.slane %v1741_v63, %v4024_v5  ;;  %2305 = vmatmul.mubr.msk.f32.vlgmr.msra.gmra.mxu1 %vm1753_vm3, %v1741_v63  ;;  %v1838_v5 = vld [vmem:[%s4221_s14 + $0x28] sm:$0xff] }
 0x949   :  { %2323 = vmatprep.mubr.msk.f32.mxu1 %vm2491_vm2, %v2488_v32  ;;  %2308 = vmatpush3.msra.mxu1 %v1840_v1 }
 0x94a   :  { %1939 = vrot.lane.b32.xlu1 %v1938_v0, %s2492_s16  ;;  %2309 = vmatprep.subr.mxu1 %v2488_v32 }
 0x94b   :  { %2310 = vmatpush3.msra.mxu1 %v1839_v2 }
 0x94c   :  { %2311 = vmatprep.subr.mxu1 %v2488_v32 }
 0x94d   :  { %2312 = vmatpush3.msra.mxu1 %v1838_v5 }
 0x94e   :  { %2313 = vmatprep.subr.mxu1 %v2488_v32 }
 0x94f   :  { %2314 = vmatpush3.msra.mxu1 %v1837_v4 }
 0x950   :  { %2315 = vmatprep.subr.mxu1 %v2488_v32 }
 0x951   :  { %2316 = vmatpush3.msra.mxu1 %v1836_v3 }
 0x952   :  { %2317 = vmatprep.subr.mxu1 %v2488_v32 }
 0x953   :  { %2318 = vmatpush3.msra.mxu1 %v1835_v6 }
 0x954   :  { %2319 = vmatprep.subr.mxu1 %v2488_v32 }
 0x955   :  { %2320 = vmatpush3.msra.mxu1 %v1834_v7 }
 0x956   :  { %2321 = vmatprep.subr.mxu1 %v2488_v32 }
 0x957   :  { %2322 = vmatpush3.msra.mxu1 %v1833_v8 }
 0x958   :  { %2356 = vmatprep.subr.mxu1 %v2488_v32 }
 0x9bc   :  { %v1940_v15 = vpop.permute.xlu1 %1939 }
 0x9bd   :  { %2335 = vmatmul.mubr.msk.f32.vlgmr.msra.gmra.mxu0 %vm1753_vm3, %v1940_v15 }
 0x9be   :  { %2353 = vmatprep.mubr.msk.f32.mxu0 %vm2491_vm2, %v2488_v32  ;;  %2338 = vmatpush3.msra.mxu0 %v2026_v18 }
 0x9bf   :  { %2339 = vmatprep.subr.mxu0 %v2488_v32 }
 0x9c0   :  { %2340 = vmatpush3.msra.mxu0 %v2025_v19 }
 0x9c1   :  { %2341 = vmatprep.subr.mxu0 %v2488_v32 }
 0x9c2   :  { %2342 = vmatpush3.msra.mxu0 %v2024_v10 }
 0x9c3   :  { %2343 = vmatprep.subr.mxu0 %v2488_v32 }
 0x9c4   :  { %2344 = vmatpush3.msra.mxu0 %v2023_v20 }
 0x9c5   :  { %2345 = vmatprep.subr.mxu0 %v2488_v32 }
 0x9c6   :  { %2346 = vmatpush3.msra.mxu0 %v2022_v21 }
 0x9c7   :  { %2347 = vmatprep.subr.mxu0 %v2488_v32 }
 0x9c8   :  { %2348 = vmatpush3.msra.mxu0 %v2021_v22 }
 0x9c9   :  { %2349 = vmatprep.subr.mxu0 %v2488_v32 }
 0x9ca   :  { %2350 = vmatpush3.msra.mxu0 %v2020_v25 }
 0x9cb   :  { %2351 = vmatprep.subr.mxu0 %v2488_v32 }
 0x9cc   :  { %2352 = vmatpush3.msra.mxu0 %v2019_v26 }
 0xa08   :  { %v1823_v12 = vpop.f32.mrf.mxu1 }
 0xa09   :  { %v1824_v14 = vadd.f32 %v2251_v11, %v1823_v12 }
 0xa0a   :  { %v2306_v16 = vpop.f32.mrf.mxu1 }
 0xa0b   :  { %v2253_v17 = vmul.f32 -1.442695, %v1824_v14 }
 0xa0d   :  { %2431 = vpow2.f32 %v2253_v17 }
 0xa1a   :  { %v2432_v23 = vpop.eup %2431 }
 0xa1b   :  { %v1830_v24 = vadd.f32 1.0, %v2432_v23 }
 0xa1d   :  { %2433 = vrcp.f32 %v1830_v24 }
 0xa1e   :  { %2435 = vrcp.f32 %v2113_v43 }
 0xa2a   :  { %v2434_v27 = vpop.eup %2433 }
 0xa2b   :  { %2324 = vmatmul.mubr.msk.f32.vlgmr.msra.gmra.mxu1 %vm1249_vm1, %v2434_v27  ;;  %v2436_v44 = vpop.eup %2435 }
 0xa2c   :  { %2358 = vmatprep.mubr.msk.f32.mxu1 %vm2491_vm2, %v2488_v32  ;;  %2361 = vpush %v2436_v44  ;;  %2357 = vmatpush3.msk.msra.mxu1 %vm2142_vm4, %v2130_v53 }
 0xa5d   :  { %s2362_s17 = spop %2361 }
 0xa5e   :  { %s2116_s30 = smul.f32 %s2362_s17, %s4177_s29 }
 0xa5f   :  { %s2119_s24 = smul.f32 %s2362_s17, %s4179_s3 }
 0xa60   :  { %v2117_v29 = vstv %s2116_s30 }
 0xa61   :  { %v2120_v30 = vstv %s2119_s24 }
 0xa7d   :  { %v2009_v46 = vpop.f32.mrf.mxu0 }
 0xa7e   :  { %v2010_v9 = vadd.f32 %v2256_v45, %v2009_v46 }
 0xa7f   :  { %v2336_v47 = vpop.f32.mrf.mxu0 }
 0xa80   :  { %v2258_v48 = vmul.f32 -1.442695, %v2010_v9 }
 0xa82   :  { %2437 = vpow2.f32 %v2258_v48 }
 0xa8f   :  { %v2438_v49 = vpop.eup %2437 }
 0xa90   :  { %v2016_v50 = vadd.f32 1.0, %v2438_v49 }
 0xa92   :  { %2439 = vrcp.f32 %v2016_v50 }
 0xa9f   :  { %v2440_v51 = vpop.eup %2439 }
 0xaa0   :  { %2354 = vmatmul.mubr.msk.f32.vlgmr.msra.gmra.mxu0 %vm1249_vm1, %v2440_v51 }
 0xaeb   :  { %v1917_v32 = vpop.f32.mrf.mxu1 }
 0xaec   :  { %v1918_v28 = vadd.f32 %v2254_v54, %v1917_v32 }
 0xaed   :  { %v2325_v52 = vpop.f32.mrf.mxu1 }
 0xaee   :  { %v2118_v35 = vmul.f32 %v2117_v29, %v1918_v28 }
 0xb60   :  { %v2103_v31 = vpop.f32.mrf.mxu0 }
 0xb61   :  { %v2104_v33 = vadd.f32 %v2259_v55, %v2103_v31 }
 0xb62   :  { %v2355_v34 = vpop.f32.mrf.mxu0 }
 0xb63   :  { %v2121_v36 = vmul.f32 %v2120_v30, %v2104_v33 }
 0xb65   :  { %v2122_v37 = vadd.f32 %v2121_v36, %v2118_v35 }
 0xb67   :  { %v2262_v38 = vmul.f32 -1.442695, %v2122_v37 }
 0xb69   :  { %2441 = vpow2.f32 %v2262_v38 }
 0xb76   :  { %v2442_v39 = vpop.eup %2441 }
 0xb77   :  { %v2126_v40 = vadd.f32 1.0, %v2442_v39 }
 0xb79   :  { %2443 = vrcp.f32 %v2126_v40 }
 0xb86   :  { %v2444_v13 = vpop.eup %2443 }
 0xb87   :  { %v2129_v41 = vmul.f32 %v2444_v13, %v2122_v37 }
 0xb89   :  { %2359 = vmatmul.mubr.msk.f32.vlgmr.msra.gmra.mxu1 %vm2138_vm5, %v2129_v41 }
 0xc49   :  { %v2212_v56 = vpop.f32.mrf.mxu1 }
 0xc4a   :  { %v2213_v57 = vadd.f32 %v2263_v42, %v2212_v56 }
 0xc4b   :  { %v2360_v58 = vpop.f32.mrf.mxu1 }
 0xc4c   :  { %2217 = vst.msk [vmem:[#allocation6] sm:$0x3] %vm2216_vm6, %v2213_v57 }
 0xc4d   :  { %2468 = shalt.err (!%p2465_p9)
}
 0xc4e   :  { %2227 = dma.vmem_to_hbm [thread:$0]  %s2225_s8, 32, %s4230_s23, [#allocation4]  }
 0xc4f   :  { %2479 = dma.done.wait [#allocation4], 32  }
 0xc50   :  { %2480 = vsyncadd [#allocation4], 4294967264 }
 0xc51   :  { %2231 = vsyncpa [#allocation4], 1 }
 0xc52   :  { %2232 = vsyncpa [#allocation5], 1 }

</bundles_post_ra>
